<compile_context>
chip_gen: v7x
topology: tpu7x:2x2x1
jax: 0.10.0
libtpu: 0.0.40
codegen_flags: <defaults>
</compile_context>

<pallas_src>
import functools

import numpy as np
import jax
import jax.numpy as jnp
from jax import lax
from jax.experimental import pallas as pl
from jax.experimental.pallas import tpu as pltpu


_WHOLE_VMEM = pl.BlockSpec(memory_space=pltpu.MemorySpace.VMEM)
_MM_VMEM_BUDGET = 24 * 1024 * 1024   # per-step blocks incl. double buffering
_MM_VMEM_LIMIT = 48 * 1024 * 1024    # scoped VMEM limit (safe on v7x's 64 MiB)


def _leaky(x):
    # F.leaky_relu(x, 0.2)
    return jnp.where(x >= 0, x, 0.2 * x)


def _choose(dim, candidates):
    """Largest candidate tile that divides `dim`; fall back to the full dim."""
    for c in candidates:
        if c <= dim and dim % c == 0:
            return c
    return dim


# ------------------ conv2d == im2col + tiled matmul kernel -------------------
def _tile_cands(dim, cands):
    out = [dim]
    out += [c for c in cands if c < dim and dim % c == 0]
    return out


def _select_tiles(M, K, N, mn_bytes):
    """Pick (tm, tk, tn).

    Preference order (per perf review):
      1. tk = K  -> whole reduction folds into one jnp.dot (no K grid axis,
                    no per-k accumulator RMW); else large multiples of 256.
      2. tn = N  -> weight block resident / patches streamed once; else
                    lane-dense 1024/512/256/128 tiles.
      3. largest tm that keeps per-step VMEM blocks (double-buffered) under
         the budget.
    """
    def fits(tm, tk, tn):
        x_b = 2 * tm * tk * 2            # bf16 patches, double buffered
        w_b = 2 * tk * tn * 2            # bf16 weights, double buffered
        o_b = 2 * tm * tn * mn_bytes     # out (+ residual), double buffered
        a_b = tm * tn * 4                # f32 accumulator scratch
        return x_b + w_b + o_b + a_b <= _MM_VMEM_BUDGET

    tk_list = _tile_cands(K, (4096, 2048, 1024, 512, 256))
    tn_list = _tile_cands(N, (1024, 512, 256, 128))
    tm_list = _tile_cands(M, (512, 256, 128, 64, 32, 16, 8))
    for tk in tk_list:
        for tn in tn_list:
            for tm in tm_list:
                if fits(tm, tk, tn):
                    return tm, tk, tn
    return tm_list[-1], tk_list[-1], tn_list[-1]


def _split_refs(has_bias, has_res, refs):
    it = iter(refs)
    x_ref = next(it)
    w_ref = next(it)
    b_ref = next(it) if has_bias else None
    r_ref = next(it) if has_res else None
    return x_ref, w_ref, b_ref, r_ref, list(it)


def _epilogue(acc, b_ref, r_ref, alpha, out_act):
    if b_ref is not None:
        acc = acc + b_ref[...].astype(jnp.float32)
    if r_ref is not None:
        # out = x_s + alpha * (conv + bias)   (alpha scales the bias too)
        acc = r_ref[...].astype(jnp.float32) + alpha * acc
    if out_act:
        acc = _leaky(acc)
    return acc


def _mm_kernel_single_k(has_bias, has_res, alpha, out_act, *refs):
    x_ref, w_ref, b_ref, r_ref, (o_ref,) = _split_refs(has_bias, has_res, refs)
    acc = jnp.dot(x_ref[...], w_ref[...], preferred_element_type=jnp.float32)
    o_ref[...] = _epilogue(acc, b_ref, r_ref, alpha, out_act).astype(o_ref.dtype)


def _mm_kernel_multi_k(has_bias, has_res, alpha, out_act, *refs):
    x_ref, w_ref, b_ref, r_ref, (o_ref, acc_ref) = _split_refs(
        has_bias, has_res, refs)
    k = pl.program_id(2)

    @pl.when(k == 0)
    def _init():
        acc_ref[...] = jnp.zeros_like(acc_ref)

    acc_ref[...] += jnp.dot(x_ref[...], w_ref[...],
                            preferred_element_type=jnp.float32)

    @pl.when(k == pl.num_programs(2) - 1)
    def _finalize():
        o_ref[...] = _epilogue(acc_ref[...], b_ref, r_ref, alpha,
                               out_act).astype(o_ref.dtype)


def _matmul_bias_act(x, w, b, res, *, alpha, out_act, out_dtype):
    M, K = x.shape
    K2, N = w.shape
    assert K == K2
    mn_bytes = np.dtype(out_dtype).itemsize
    if res is not None:
        mn_bytes += res.dtype.itemsize
    tm, tk, tn = _select_tiles(M, K, N, mn_bytes)
    has_bias = b is not None
    has_res = res is not None

    if tk == K:
        # K collapsed into a single jnp.dot.  Grid is (Cout tiles, row tiles)
        # with rows innermost so the (K, tn) weight block stays resident while
        # the im2col patches stream through it.
        kernel = functools.partial(_mm_kernel_single_k, has_bias, has_res,
                                   float(alpha), out_act)
        ins = [x, w]
        in_specs = [pl.BlockSpec((tm, K), lambda j, i: (i, 0)),
                    pl.BlockSpec((K, tn), lambda j, i: (0, j))]
        if has_bias:
            ins.append(b)
            in_specs.append(pl.BlockSpec((1, tn), lambda j, i: (0, j)))
        if has_res:
            ins.append(res)
            in_specs.append(pl.BlockSpec((tm, tn), lambda j, i: (i, j)))
        return pl.pallas_call(
            kernel,
            out_shape=jax.ShapeDtypeStruct((M, N), out_dtype),
            grid=(N // tn, M // tm),
            in_specs=in_specs,
            out_specs=pl.BlockSpec((tm, tn), lambda j, i: (i, j)),
            compiler_params=pltpu.CompilerParams(
                dimension_semantics=("parallel", "parallel"),
                vmem_limit_bytes=_MM_VMEM_LIMIT),
        )(*ins)

    # Fallback: K does not fit in one block -> tiled reduction (large K tiles,
    # K axis last) with an f32 VMEM scratch accumulator.
    kernel = functools.partial(_mm_kernel_multi_k, has_bias, has_res,
                               float(alpha), out_act)
    ins = [x, w]
    in_specs = [pl.BlockSpec((tm, tk), lambda i, j, k: (i, k)),
                pl.BlockSpec((tk, tn), lambda i, j, k: (k, j))]
    if has_bias:
        ins.append(b)
        in_specs.append(pl.BlockSpec((1, tn), lambda i, j, k: (0, j)))
    if has_res:
        ins.append(res)
        in_specs.append(pl.BlockSpec((tm, tn), lambda i, j, k: (i, j)))
    return pl.pallas_call(
        kernel,
        out_shape=jax.ShapeDtypeStruct((M, N), out_dtype),
        grid=(M // tm, N // tn, K // tk),
        in_specs=in_specs,
        out_specs=pl.BlockSpec((tm, tn), lambda i, j, k: (i, j)),
        scratch_shapes=[pltpu.VMEM((tm, tn), jnp.float32)],
        compiler_params=pltpu.CompilerParams(
            dimension_semantics=("parallel", "parallel", "arbitrary"),
            vmem_limit_bytes=_MM_VMEM_LIMIT),
    )(*ins)


def conv2d(x, w, b=None, *, ksize, padding, pre_act=False, out_act=False,
           residual=None, alpha=1.0, out_dtype=jnp.float32):
    """Stride-1 conv.  NHWC activations, weight flattened to [k*k*Cin, Cout]."""
    B, H, W, Cin = x.shape
    KKC, Cout = w.shape
    assert KKC == ksize * ksize * Cin
    if pre_act:
        x = _leaky(x)                 # leaky(0) == 0, so zero padding stays valid
    if padding:
        x = jnp.pad(x, ((0, 0), (padding, padding), (padding, padding), (0, 0)))
    Ho = H + 2 * padding - ksize + 1
    Wo = W + 2 * padding - ksize + 1
    # im2col (pad + gather + cast fuse into one XLA fusion under jit).
    # TODO(synk): replace with a halo-tiled direct-conv kernel (manual DMA,
    # pl.ANY inputs) for early high-resolution layers to avoid the k^2
    # activation expansion in HBM.
    taps = [x[:, kh:kh + Ho, kw:kw + Wo, :]
            for kh in range(ksize) for kw in range(ksize)]
    patches = taps[0] if len(taps) == 1 else jnp.concatenate(taps, axis=-1)
    patches = patches.reshape(B * Ho * Wo, KKC).astype(jnp.bfloat16)
    w = w.astype(jnp.bfloat16)
    kpad = (-KKC) % 8                 # keep the contraction dim 8-aligned
    if kpad:                          # (only conv_img: 27 -> 32)
        patches = jnp.pad(patches, ((0, 0), (0, kpad)))
        w = jnp.pad(w, ((0, kpad), (0, 0)))
    res2d = None
    if residual is not None:
        res2d = residual.astype(jnp.bfloat16).reshape(B * Ho * Wo, Cout)
    y = _matmul_bias_act(patches, w, b, res2d,
                         alpha=alpha, out_act=out_act, out_dtype=out_dtype)
    return y.reshape(B, Ho, Wo, Cout)


# ------------------- AvgPool2d(3, stride=2, padding=1) -----------------------
# count_include_pad=True (PyTorch default) => always divide by 9.
# Grid over (batch, output-row tiles, channel tiles); the stride-2 selection is
# absorbed by parity planes (a wrapper reshape); the one-row halo below each
# row tile is delivered as an extra 1-row block.
def _pool_kernel(ee_ref, eo_ref, oe_ref, oo_ref, eex_ref, eox_ref, o_ref):
    th, Wo = o_ref.shape[1], o_ref.shape[2]
    f32 = jnp.float32
    ee = ee_ref[...].astype(f32)       # (1, th, Wo+1, ct)  padded rows 2r
    eo = eo_ref[...].astype(f32)
    oe = oe_ref[...].astype(f32)       # (1, th, Wo+1, ct)  padded rows 2r+1
    oo = oo_ref[...].astype(f32)
    eex = eex_ref[...].astype(f32)     # (1, 1, Wo+1, ct)   halo row (2*th)
    eox = eox_ref[...].astype(f32)
    # horizontal 3-tap sums (stride 2 already absorbed by the parity split)
    rows_e = ee[:, :, :Wo, :] + eo[:, :, :Wo, :] + ee[:, :, 1:, :]
    rows_o = oe[:, :, :Wo, :] + oo[:, :, :Wo, :] + oe[:, :, 1:, :]
    rows_x = eex[:, :, :Wo, :] + eox[:, :, :Wo, :] + eex[:, :, 1:, :]
    base = rows_e + rows_o
    scale = 1.0 / 9.0
    if th > 1:
        o_ref[:, :th - 1] = ((base[:, :th - 1] + rows_e[:, 1:th])
                             * scale).astype(o_ref.dtype)
    o_ref[:, th - 1:] = ((base[:, th - 1:] + rows_x) * scale).astype(o_ref.dtype)


def avg_pool_3x3_s2_p1(x):
    B, H, W, C = x.shape
    assert H % 2 == 0 and W % 2 == 0
    Ho, Wo = H // 2, W // 2
    xp = jnp.pad(x, ((0, 0), (1, 1), (1, 1), (0, 0)))       # [B, H+2, W+2, C]
    # parity planes: x_{hp,wp}[b, i, j, c] = xp[b, 2i+hp, 2j+wp, c]
    # TODO(synk): do the stride-2 selection in-kernel with pl.ds(..., stride=2)
    # reads from the padded tensor to drop this materialized pre-split.
    xr = xp.reshape(B, Ho + 1, 2, Wo + 1, 2, C)
    x_ee = xr[:, :, 0, :, 0, :]
    x_eo = xr[:, :, 0, :, 1, :]
    x_oe = xr[:, :, 1, :, 0, :]
    x_oo = xr[:, :, 1, :, 1, :]

    ct = _choose(C, (256, 128))
    itemsize = x.dtype.itemsize
    th = 1
    for cand in (Ho, 128, 64, 32, 16, 8, 4, 2, 1):
        if (cand <= Ho and Ho % cand == 0
                and 8 * (cand + 1) * (Wo + 1) * ct * itemsize <= (8 << 20)):
            th = cand
            break

    main = pl.BlockSpec((1, th, Wo + 1, ct), lambda b, r, c: (b, r, 0, c))
    halo = pl.BlockSpec((1, 1, Wo + 1, ct),
                        lambda b, r, c, th=th: (b, (r + 1) * th, 0, c))
    return pl.pallas_call(
        _pool_kernel,
        out_shape=jax.ShapeDtypeStruct((B, Ho, Wo, C), jnp.bfloat16),
        grid=(B, Ho // th, C // ct),
        in_specs=[main, main, main, main, halo, halo],
        out_specs=pl.BlockSpec((1, th, Wo, ct), lambda b, r, c: (b, r, 0, c)),
        compiler_params=pltpu.CompilerParams(
            dimension_semantics=("parallel", "parallel", "parallel"),
            vmem_limit_bytes=32 * 1024 * 1024),
    )(x_ee, x_eo, x_oe, x_oo, x_ee, x_eo)


# --------------------------------- head --------------------------------------
# split -> sigmoid -> leaky_relu -> fc, fused.  Tensors are tiny ([B, nf1]).
def _head_kernel(p_ref, fcw_ref, fcb_ref, out_ref, mus_ref, sig_ref):
    p = p_ref[...]                     # [B, nf1] f32
    half = mus_ref.shape[-1]
    mus = p[:, :half]
    sig = jax.nn.sigmoid(p[:, half:])
    mus_ref[...] = mus
    sig_ref[...] = sig
    act = _leaky(mus).astype(jnp.bfloat16)
    out_ref[...] = (jnp.dot(act, fcw_ref[...],
                            preferred_element_type=jnp.float32) + fcb_ref[...])


def head(params2d, fc_w, fc_b):
    B, nf1 = params2d.shape
    half = nf1 // 2
    return pl.pallas_call(
        _head_kernel,
        out_shape=(jax.ShapeDtypeStruct((B, 1), jnp.float32),
                   jax.ShapeDtypeStruct((B, half), jnp.float32),
                   jax.ShapeDtypeStruct((B, half), jnp.float32)),
        in_specs=[_WHOLE_VMEM, _WHOLE_VMEM, _WHOLE_VMEM],
        out_specs=(_WHOLE_VMEM, _WHOLE_VMEM, _WHOLE_VMEM),
    )(params2d, fc_w, fc_b)


# -------------------------------- parameters ---------------------------------
def _init_conv(key, cin, cout, k, use_bias=True):
    kw_, kb_ = jax.random.split(key)
    bound = 1.0 / np.sqrt(cin * k * k)
    w = jax.random.uniform(kw_, (k * k * cin, cout), jnp.float32, -bound, bound)
    w = w.astype(jnp.bfloat16)          # bf16 weights (MXU native, 2x smaller)
    b = (jax.random.uniform(kb_, (1, cout), jnp.float32, -bound, bound)
         if use_bias else None)
    return w, b


class DiscriminatorPallas:
    def __init__(self, size, num_filters=64, max_filters=1024, *, key):
        assert max_filters % 2 == 0
        assert num_filters % 2 == 0
        assert size >= 4
        assert size & (size - 1) == 0
        self.s0 = 4
        self.nf = nf = num_filters
        self.nf_max = nf_max = max_filters
        num_layers = int(np.log2(size / self.s0))

        self._key = key
        self._kc = 0

        def nk():
            self._kc += 1
            return jax.random.fold_in(self._key, self._kc)

        def make_block(fin, fout):
            fhidden = min(fin, fout)
            w0, b0 = _init_conv(nk(), fin, fhidden, 3, True)
            w1, b1 = _init_conv(nk(), fhidden, fout, 3, True)
            ws = None
            if fin != fout:
                ws, _ = _init_conv(nk(), fin, fout, 1, False)
            return dict(w0=w0, b0=b0, w1=w1, b1=b1, ws=ws)

        self.layer_kinds = ["block"]
        blocks = [make_block(nf, nf)]
        for i in range(num_layers):
            nf0 = min(nf * 2 ** i, nf_max)
            nf1 = min(nf * 2 ** (i + 1), nf_max)
            self.layer_kinds += ["pool", "block"]
            blocks.append(make_block(nf0, nf1))
        self.nf1 = min(nf * 2 ** num_layers, nf_max)

        w_img, b_img = _init_conv(nk(), 3, nf, 3, True)
        w_cc, b_cc = _init_conv(nk(), self.nf1, self.nf1, 4, True)
        half = self.nf1 // 2
        kfw, kfb = jax.random.split(nk())
        bound = 1.0 / np.sqrt(half)
        fc_w = jax.random.uniform(kfw, (half, 1), jnp.float32,
                                  -bound, bound).astype(jnp.bfloat16)
        fc_b = jax.random.uniform(kfb, (1, 1), jnp.float32, -bound, bound)

        self.params = dict(conv_img=dict(w=w_img, b=b_img),
                           blocks=blocks,
                           conv_conv=dict(w=w_cc, b=b_cc),
                           fc_w=fc_w, fc_b=fc_b)
        self._forward = jax.jit(self._forward_impl)

    def _block(self, x, p):
        # shortcut (1x1 conv or identity) kept in bf16
        x_s = x if p["ws"] is None else conv2d(x, p["ws"], None, ksize=1,
                                               padding=0,
                                               out_dtype=jnp.bfloat16)
        # conv_0: pre-act leaky fused into the im2col fusion, post-act leaky
        # fused into the matmul epilogue; hand off to conv_1 directly in bf16.
        h = conv2d(x, p["w0"], p["b0"], ksize=3, padding=1, pre_act=True,
                   out_act=True, out_dtype=jnp.bfloat16)
        # conv_1: residual epilogue  out = x_s + 0.1 * (conv(h) + bias)
        return conv2d(h, p["w1"], p["b1"], ksize=3, padding=1,
                      residual=x_s, alpha=0.1, out_dtype=jnp.bfloat16)

    def _forward_impl(self, params, x_nchw):
        x = jnp.transpose(x_nchw, (0, 2, 3, 1)).astype(jnp.float32)  # -> NHWC
        out = conv2d(x, params["conv_img"]["w"], params["conv_img"]["b"],
                     ksize=3, padding=1, out_dtype=jnp.bfloat16)
        bi = 0
        for kind in self.layer_kinds:
            if kind == "pool":
                out = avg_pool_3x3_s2_p1(out)
            else:
                out = self._block(out, params["blocks"][bi])
                bi += 1
        p2d = conv2d(out, params["conv_conv"]["w"], params["conv_conv"]["b"],
                     ksize=4, padding=0, pre_act=True)
        p2d = p2d.reshape(p2d.shape[0], self.nf1)   # squeeze(-1).squeeze(-1)
        # TODO(synk): mean_mode=False branch (th.randn_like sampling) not
        # implemented; only the default mean_mode=True path is reproduced.
        return head(p2d, params["fc_w"], params["fc_b"])

    def __call__(self, x_nchw):
        return self._forward(self.params, x_nchw)


# ---------------------- plain-JAX reference (for checking) -------------------
def _ref_conv(x, w_flat, b, k, pad, pre_act=False, out_act=False):
    if pre_act:
        x = _leaky(x)
    cout = w_flat.shape[-1]
    cin = w_flat.shape[0] // (k * k)
    w = w_flat.reshape(k, k, cin, cout)                 # bf16, HWIO
    y = lax.conv_general_dilated(x.astype(jnp.bfloat16), w, (1, 1),
                                 [(pad, pad), (pad, pad)],
                                 dimension_numbers=("NHWC", "HWIO", "NHWC"),
                                 preferred_element_type=jnp.float32)
    if b is not None:
        y = y + b.reshape(1, 1, 1, -1)
    if out_act:
        y = _leaky(y)
    return y


def _ref_pool(x):
    s = lax.reduce_window(x, 0.0, lax.add, (1, 3, 3, 1), (1, 2, 2, 1),
                          [(0, 0), (1, 1), (1, 1), (0, 0)])
    return s / 9.0


def reference_forward(disc, x_nchw):
    p = disc.params
    bf16 = jnp.bfloat16
    x = jnp.transpose(x_nchw, (0, 2, 3, 1)).astype(jnp.float32)
    out = _ref_conv(x, p["conv_img"]["w"], p["conv_img"]["b"], 3, 1).astype(bf16)
    bi = 0
    for kind in disc.layer_kinds:
        if kind == "pool":
            out = _ref_pool(out.astype(jnp.float32)).astype(bf16)
        else:
            blk = p["blocks"][bi]
            bi += 1
            x_s = out if blk["ws"] is None else _ref_conv(out, blk["ws"],
                                                          None, 1, 0).astype(bf16)
            h = _ref_conv(out, blk["w0"], blk["b0"], 3, 1,
                          pre_act=True, out_act=True).astype(bf16)
            dx = _ref_conv(h, blk["w1"], blk["b1"], 3, 1)          # f32
            out = (x_s.astype(jnp.float32) + 0.1 * dx).astype(bf16)
    params2d = _ref_conv(out, p["conv_conv"]["w"], p["conv_conv"]["b"], 4, 0,
                         pre_act=True)
    B = params2d.shape[0]
    params2d = params2d.reshape(B, disc.nf1)
    half = disc.nf1 // 2
    mus = params2d[:, :half]
    sigmas = jax.nn.sigmoid(params2d[:, half:])
    o = jnp.dot(_leaky(mus).astype(bf16), p["fc_w"],
                preferred_element_type=jnp.float32) + p["fc_b"]
    return o, mus, sigmas


# ----------------------------------- main -------------------------------------
if __name__ == "__main__":
    key = jax.random.PRNGKey(0)
    k_param, k_in = jax.random.split(key)

    size = 16            # small but structurally complete (2 pooling stages)
    disc = DiscriminatorPallas(size=size, num_filters=8, max_filters=32,
                               key=k_param)

    x = jax.random.normal(k_in, (2, 3, size, size), jnp.float32)  # NCHW input

    out, mus, sigmas = disc(x)
    out, mus, sigmas = jax.block_until_ready((out, mus, sigmas))

    assert out.shape == (2, 1)
    assert mus.shape == (2, disc.nf1 // 2)
    assert sigmas.shape == (2, disc.nf1 // 2)

    # correctness check against a plain-JAX reference mirroring the bf16 chain
    ro, rm, rs = jax.block_until_ready(reference_forward(disc, x))
    np.testing.assert_allclose(np.asarray(mus), np.asarray(rm),
                               rtol=1e-2, atol=1e-2)
    np.testing.assert_allclose(np.asarray(sigmas), np.asarray(rs),
                               rtol=1e-2, atol=1e-2)
    np.testing.assert_allclose(np.asarray(out), np.asarray(ro),
                               rtol=1e-2, atol=1e-2)

    print("KERNEL_OK")
</pallas_src>

<mosaic_0001>
module attributes {stable_mosaic.version = 11 : i64} {
  func.func @_mm_kernel_single_k(%arg0: i32, %arg1: i32, %arg2: memref<512x32xbf16, #tpu.memory_space<vmem>>, %arg3: memref<32x8xbf16, #tpu.memory_space<vmem>>, %arg4: memref<1x8xf32, #tpu.memory_space<vmem>>, %arg5: memref<512x8xbf16, #tpu.memory_space<vmem>>) attributes {dimension_semantics = [#tpu.dimension_semantics<parallel>, #tpu.dimension_semantics<parallel>], iteration_bounds = array<i64: 1, 1>, scalar_prefetch = 0 : i64, scratch_operands = 0 : i64, tpu.core_type = #tpu.core_type<tc>, window_params = [{transform_indices = @transform_0, window_bounds = array<i64: 512, 32>}, {transform_indices = @transform_1, window_bounds = array<i64: 32, 8>}, {transform_indices = @transform_2, window_bounds = array<i64: 1, 8>}, {transform_indices = @transform_3, window_bounds = array<i64: 512, 8>}]} {
    %c0 = arith.constant 0 : index
    %c0_0 = arith.constant 0 : index
    %0 = vector.load %arg2[%c0, %c0_0] : memref<512x32xbf16, #tpu.memory_space<vmem>>, vector<512x32xbf16>
    %c0_1 = arith.constant 0 : index
    %c0_2 = arith.constant 0 : index
    %1 = vector.load %arg3[%c0_1, %c0_2] : memref<32x8xbf16, #tpu.memory_space<vmem>>, vector<32x8xbf16>
    %cst = arith.constant dense<0.000000e+00> : vector<512x8xf32>
    %2 = tpu.matmul %0, %1, %cst {dimension_numbers = #tpu.dot_dimension_numbers<[1], [0], [0], [1], [0, 0, 1, 1], [], []>} : vector<512x32xbf16>, vector<32x8xbf16>, vector<512x8xf32> -> vector<512x8xf32>
    %c0_3 = arith.constant 0 : index
    %c0_4 = arith.constant 0 : index
    %3 = vector.load %arg4[%c0_3, %c0_4] : memref<1x8xf32, #tpu.memory_space<vmem>>, vector<1x8xf32>
    %4 = vector.broadcast %3 : vector<1x8xf32> to vector<512x8xf32>
    %5 = arith.addf %2, %4 : vector<512x8xf32>
    %6 = arith.truncf %5 : vector<512x8xf32> to vector<512x8xbf16>
    %c0_5 = arith.constant 0 : index
    %c0_6 = arith.constant 0 : index
    %7 = vector.load %arg5[%c0_5, %c0_6] : memref<512x8xbf16, #tpu.memory_space<vmem>>, vector<512x8xbf16>
    tpu.vector_store %arg5[%c0_5, %c0_6], %6 {strides = array<i32>} : memref<512x8xbf16, #tpu.memory_space<vmem>>, vector<512x8xbf16>,
    return
  }
  func.func @transform_0(%arg0: i32, %arg1: i32) -> (i32, i32) {
    %c0_i32 = arith.constant 0 : i32
    %c0_i32_0 = arith.constant 0 : i32
    return %arg1, %c0_i32 : i32, i32
  }
  func.func @transform_1(%arg0: i32, %arg1: i32) -> (i32, i32) {
    %c0_i32 = arith.constant 0 : i32
    %c0_i32_0 = arith.constant 0 : i32
    return %c0_i32, %arg0 : i32, i32
  }
  func.func @transform_2(%arg0: i32, %arg1: i32) -> (i32, i32) {
    %c0_i32 = arith.constant 0 : i32
    %c0_i32_0 = arith.constant 0 : i32
    return %c0_i32, %arg0 : i32, i32
  }
  func.func @transform_3(%arg0: i32, %arg1: i32) -> (i32, i32) {
    %c0_i32 = arith.constant 0 : i32
    return %arg1, %arg0 : i32, i32
  }
}

module attributes {stable_mosaic.version = 11 : i64} {
  func.func @_mm_kernel_single_k(%arg0: i32, %arg1: i32, %arg2: memref<512x72xbf16, #tpu.memory_space<vmem>>, %arg3: memref<72x8xbf16, #tpu.memory_space<vmem>>, %arg4: memref<1x8xf32, #tpu.memory_space<vmem>>, %arg5: memref<512x8xbf16, #tpu.memory_space<vmem>>) attributes {dimension_semantics = [#tpu.dimension_semantics<parallel>, #tpu.dimension_semantics<parallel>], iteration_bounds = array<i64: 1, 1>, scalar_prefetch = 0 : i64, scratch_operands = 0 : i64, tpu.core_type = #tpu.core_type<tc>, window_params = [{transform_indices = @transform_0, window_bounds = array<i64: 512, 72>}, {transform_indices = @transform_1, window_bounds = array<i64: 72, 8>}, {transform_indices = @transform_2, window_bounds = array<i64: 1, 8>}, {transform_indices = @transform_3, window_bounds = array<i64: 512, 8>}]} {
    %c0 = arith.constant 0 : index
    %c0_0 = arith.constant 0 : index
    %0 = vector.load %arg2[%c0, %c0_0] : memref<512x72xbf16, #tpu.memory_space<vmem>>, vector<512x72xbf16>
    %c0_1 = arith.constant 0 : index
    %c0_2 = arith.constant 0 : index
    %1 = vector.load %arg3[%c0_1, %c0_2] : memref<72x8xbf16, #tpu.memory_space<vmem>>, vector<72x8xbf16>
    %cst = arith.constant dense<0.000000e+00> : vector<512x8xf32>
    %2 = tpu.matmul %0, %1, %cst {dimension_numbers = #tpu.dot_dimension_numbers<[1], [0], [0], [1], [0, 0, 1, 1], [], []>} : vector<512x72xbf16>, vector<72x8xbf16>, vector<512x8xf32> -> vector<512x8xf32>
    %c0_3 = arith.constant 0 : index
    %c0_4 = arith.constant 0 : index
    %3 = vector.load %arg4[%c0_3, %c0_4] : memref<1x8xf32, #tpu.memory_space<vmem>>, vector<1x8xf32>
    %4 = vector.broadcast %3 : vector<1x8xf32> to vector<512x8xf32>
    %5 = arith.addf %2, %4 : vector<512x8xf32>
    %cst_5 = arith.constant 0.000000e+00 : f32
    %6 = vector.broadcast %cst_5 : f32 to vector<512x8xf32>
    %7 = arith.cmpf oge, %5, %6 : vector<512x8xf32>
    %cst_6 = arith.constant 2.000000e-01 : f32
    %8 = vector.broadcast %cst_6 : f32 to vector<512x8xf32>
    %9 = arith.mulf %8, %5 : vector<512x8xf32>
    %10 = arith.select %7, %5, %9 : vector<512x8xi1>, vector<512x8xf32>
    %11 = arith.truncf %10 : vector<512x8xf32> to vector<512x8xbf16>
    %c0_7 = arith.constant 0 : index
    %c0_8 = arith.constant 0 : index
    %12 = vector.load %arg5[%c0_7, %c0_8] : memref<512x8xbf16, #tpu.memory_space<vmem>>, vector<512x8xbf16>
    tpu.vector_store %arg5[%c0_7, %c0_8], %11 {strides = array<i32>} : memref<512x8xbf16, #tpu.memory_space<vmem>>, vector<512x8xbf16>,
    return
  }
  func.func @transform_0(%arg0: i32, %arg1: i32) -> (i32, i32) {
    %c0_i32 = arith.constant 0 : i32
    %c0_i32_0 = arith.constant 0 : i32
    return %arg1, %c0_i32 : i32, i32
  }
  func.func @transform_1(%arg0: i32, %arg1: i32) -> (i32, i32) {
    %c0_i32 = arith.constant 0 : i32
    %c0_i32_0 = arith.constant 0 : i32
    return %c0_i32, %arg0 : i32, i32
  }
  func.func @transform_2(%arg0: i32, %arg1: i32) -> (i32, i32) {
    %c0_i32 = arith.constant 0 : i32
    %c0_i32_0 = arith.constant 0 : i32
    return %c0_i32, %arg0 : i32, i32
  }
  func.func @transform_3(%arg0: i32, %arg1: i32) -> (i32, i32) {
    %c0_i32 = arith.constant 0 : i32
    return %arg1, %arg0 : i32, i32
  }
}

module attributes {stable_mosaic.version = 11 : i64} {
  func.func @_mm_kernel_single_k(%arg0: i32, %arg1: i32, %arg2: memref<512x72xbf16, #tpu.memory_space<vmem>>, %arg3: memref<72x8xbf16, #tpu.memory_space<vmem>>, %arg4: memref<1x8xf32, #tpu.memory_space<vmem>>, %arg5: memref<512x8xbf16, #tpu.memory_space<vmem>>, %arg6: memref<512x8xbf16, #tpu.memory_space<vmem>>) attributes {dimension_semantics = [#tpu.dimension_semantics<parallel>, #tpu.dimension_semantics<parallel>], iteration_bounds = array<i64: 1, 1>, scalar_prefetch = 0 : i64, scratch_operands = 0 : i64, tpu.core_type = #tpu.core_type<tc>, window_params = [{transform_indices = @transform_0, window_bounds = array<i64: 512, 72>}, {transform_indices = @transform_1, window_bounds = array<i64: 72, 8>}, {transform_indices = @transform_2, window_bounds = array<i64: 1, 8>}, {transform_indices = @transform_3, window_bounds = array<i64: 512, 8>}, {transform_indices = @transform_4, window_bounds = array<i64: 512, 8>}]} {
    %c0 = arith.constant 0 : index
    %c0_0 = arith.constant 0 : index
    %0 = vector.load %arg2[%c0, %c0_0] : memref<512x72xbf16, #tpu.memory_space<vmem>>, vector<512x72xbf16>
    %c0_1 = arith.constant 0 : index
    %c0_2 = arith.constant 0 : index
    %1 = vector.load %arg3[%c0_1, %c0_2] : memref<72x8xbf16, #tpu.memory_space<vmem>>, vector<72x8xbf16>
    %cst = arith.constant dense<0.000000e+00> : vector<512x8xf32>
    %2 = tpu.matmul %0, %1, %cst {dimension_numbers = #tpu.dot_dimension_numbers<[1], [0], [0], [1], [0, 0, 1, 1], [], []>} : vector<512x72xbf16>, vector<72x8xbf16>, vector<512x8xf32> -> vector<512x8xf32>
    %c0_3 = arith.constant 0 : index
    %c0_4 = arith.constant 0 : index
    %3 = vector.load %arg4[%c0_3, %c0_4] : memref<1x8xf32, #tpu.memory_space<vmem>>, vector<1x8xf32>
    %4 = vector.broadcast %3 : vector<1x8xf32> to vector<512x8xf32>
    %5 = arith.addf %2, %4 : vector<512x8xf32>
    %c0_5 = arith.constant 0 : index
    %c0_6 = arith.constant 0 : index
    %6 = vector.load %arg5[%c0_5, %c0_6] : memref<512x8xbf16, #tpu.memory_space<vmem>>, vector<512x8xbf16>
    %7 = arith.extf %6 : vector<512x8xbf16> to vector<512x8xf32>
    %cst_7 = arith.constant 1.000000e-01 : f32
    %8 = vector.broadcast %cst_7 : f32 to vector<512x8xf32>
    %9 = arith.mulf %8, %5 : vector<512x8xf32>
    %10 = arith.addf %7, %9 : vector<512x8xf32>
    %11 = arith.truncf %10 : vector<512x8xf32> to vector<512x8xbf16>
    %c0_8 = arith.constant 0 : index
    %c0_9 = arith.constant 0 : index
    %12 = vector.load %arg6[%c0_8, %c0_9] : memref<512x8xbf16, #tpu.memory_space<vmem>>, vector<512x8xbf16>
    tpu.vector_store %arg6[%c0_8, %c0_9], %11 {strides = array<i32>} : memref<512x8xbf16, #tpu.memory_space<vmem>>, vector<512x8xbf16>,
    return
  }
  func.func @transform_0(%arg0: i32, %arg1: i32) -> (i32, i32) {
    %c0_i32 = arith.constant 0 : i32
    %c0_i32_0 = arith.constant 0 : i32
    return %arg1, %c0_i32 : i32, i32
  }
  func.func @transform_1(%arg0: i32, %arg1: i32) -> (i32, i32) {
    %c0_i32 = arith.constant 0 : i32
    %c0_i32_0 = arith.constant 0 : i32
    return %c0_i32, %arg0 : i32, i32
  }
  func.func @transform_2(%arg0: i32, %arg1: i32) -> (i32, i32) {
    %c0_i32 = arith.constant 0 : i32
    %c0_i32_0 = arith.constant 0 : i32
    return %c0_i32, %arg0 : i32, i32
  }
  func.func @transform_3(%arg0: i32, %arg1: i32) -> (i32, i32) {
    %c0_i32 = arith.constant 0 : i32
    return %arg1, %arg0 : i32, i32
  }
  func.func @transform_4(%arg0: i32, %arg1: i32) -> (i32, i32) {
    %c0_i32 = arith.constant 0 : i32
    return %arg1, %arg0 : i32, i32
  }
}

module attributes {stable_mosaic.version = 11 : i64} {
  func.func @_pool_kernel(%arg0: i32, %arg1: i32, %arg2: i32, %arg3: memref<1x8x9x8xbf16, #tpu.memory_space<vmem>>, %arg4: memref<1x8x9x8xbf16, #tpu.memory_space<vmem>>, %arg5: memref<1x8x9x8xbf16, #tpu.memory_space<vmem>>, %arg6: memref<1x8x9x8xbf16, #tpu.memory_space<vmem>>, %arg7: memref<1x1x9x8xbf16, #tpu.memory_space<vmem>>, %arg8: memref<1x1x9x8xbf16, #tpu.memory_space<vmem>>, %arg9: memref<1x8x8x8xbf16, #tpu.memory_space<vmem>>) attributes {dimension_semantics = [#tpu.dimension_semantics<parallel>, #tpu.dimension_semantics<parallel>, #tpu.dimension_semantics<parallel>], iteration_bounds = array<i64: 2, 1, 1>, scalar_prefetch = 0 : i64, scratch_operands = 0 : i64, tpu.core_type = #tpu.core_type<tc>, window_params = [{transform_indices = @transform_0, window_bounds = array<i64: 1, 8, 9, 8>}, {transform_indices = @transform_1, window_bounds = array<i64: 1, 8, 9, 8>}, {transform_indices = @transform_2, window_bounds = array<i64: 1, 8, 9, 8>}, {transform_indices = @transform_3, window_bounds = array<i64: 1, 8, 9, 8>}, {transform_indices = @transform_4, window_bounds = array<i64: 1, 1, 9, 8>}, {transform_indices = @transform_5, window_bounds = array<i64: 1, 1, 9, 8>}, {transform_indices = @transform_6, window_bounds = array<i64: 1, 8, 8, 8>}]} {
    %c0 = arith.constant 0 : index
    %c0_0 = arith.constant 0 : index
    %c0_1 = arith.constant 0 : index
    %c0_2 = arith.constant 0 : index
    %0 = vector.load %arg3[%c0, %c0_0, %c0_1, %c0_2] : memref<1x8x9x8xbf16, #tpu.memory_space<vmem>>, vector<1x8x9x8xbf16>
    %1 = arith.extf %0 : vector<1x8x9x8xbf16> to vector<1x8x9x8xf32>
    %c0_3 = arith.constant 0 : index
    %c0_4 = arith.constant 0 : index
    %c0_5 = arith.constant 0 : index
    %c0_6 = arith.constant 0 : index
    %2 = vector.load %arg4[%c0_3, %c0_4, %c0_5, %c0_6] : memref<1x8x9x8xbf16, #tpu.memory_space<vmem>>, vector<1x8x9x8xbf16>
    %3 = arith.extf %2 : vector<1x8x9x8xbf16> to vector<1x8x9x8xf32>
    %c0_7 = arith.constant 0 : index
    %c0_8 = arith.constant 0 : index
    %c0_9 = arith.constant 0 : index
    %c0_10 = arith.constant 0 : index
    %4 = vector.load %arg5[%c0_7, %c0_8, %c0_9, %c0_10] : memref<1x8x9x8xbf16, #tpu.memory_space<vmem>>, vector<1x8x9x8xbf16>
    %5 = arith.extf %4 : vector<1x8x9x8xbf16> to vector<1x8x9x8xf32>
    %c0_11 = arith.constant 0 : index
    %c0_12 = arith.constant 0 : index
    %c0_13 = arith.constant 0 : index
    %c0_14 = arith.constant 0 : index
    %6 = vector.load %arg6[%c0_11, %c0_12, %c0_13, %c0_14] : memref<1x8x9x8xbf16, #tpu.memory_space<vmem>>, vector<1x8x9x8xbf16>
    %7 = arith.extf %6 : vector<1x8x9x8xbf16> to vector<1x8x9x8xf32>
    %c0_15 = arith.constant 0 : index
    %c0_16 = arith.constant 0 : index
    %c0_17 = arith.constant 0 : index
    %c0_18 = arith.constant 0 : index
    %8 = vector.load %arg7[%c0_15, %c0_16, %c0_17, %c0_18] : memref<1x1x9x8xbf16, #tpu.memory_space<vmem>>, vector<1x1x9x8xbf16>
    %9 = arith.extf %8 : vector<1x1x9x8xbf16> to vector<1x1x9x8xf32>
    %c0_19 = arith.constant 0 : index
    %c0_20 = arith.constant 0 : index
    %c0_21 = arith.constant 0 : index
    %c0_22 = arith.constant 0 : index
    %10 = vector.load %arg8[%c0_19, %c0_20, %c0_21, %c0_22] : memref<1x1x9x8xbf16, #tpu.memory_space<vmem>>, vector<1x1x9x8xbf16>
    %11 = arith.extf %10 : vector<1x1x9x8xbf16> to vector<1x1x9x8xf32>
    %12 = vector.extract_strided_slice %1 {offsets = [0, 0, 0, 0], sizes = [1, 8, 8, 8], strides = [1, 1, 1, 1]} : vector<1x8x9x8xf32> to vector<1x8x8x8xf32>
    %13 = vector.extract_strided_slice %3 {offsets = [0, 0, 0, 0], sizes = [1, 8, 8, 8], strides = [1, 1, 1, 1]} : vector<1x8x9x8xf32> to vector<1x8x8x8xf32>
    %14 = arith.addf %12, %13 : vector<1x8x8x8xf32>
    %15 = vector.extract_strided_slice %1 {offsets = [0, 0, 1, 0], sizes = [1, 8, 8, 8], strides = [1, 1, 1, 1]} : vector<1x8x9x8xf32> to vector<1x8x8x8xf32>
    %16 = arith.addf %14, %15 : vector<1x8x8x8xf32>
    %17 = vector.extract_strided_slice %5 {offsets = [0, 0, 0, 0], sizes = [1, 8, 8, 8], strides = [1, 1, 1, 1]} : vector<1x8x9x8xf32> to vector<1x8x8x8xf32>
    %18 = vector.extract_strided_slice %7 {offsets = [0, 0, 0, 0], sizes = [1, 8, 8, 8], strides = [1, 1, 1, 1]} : vector<1x8x9x8xf32> to vector<1x8x8x8xf32>
    %19 = arith.addf %17, %18 : vector<1x8x8x8xf32>
    %20 = vector.extract_strided_slice %5 {offsets = [0, 0, 1, 0], sizes = [1, 8, 8, 8], strides = [1, 1, 1, 1]} : vector<1x8x9x8xf32> to vector<1x8x8x8xf32>
    %21 = arith.addf %19, %20 : vector<1x8x8x8xf32>
    %22 = vector.extract_strided_slice %9 {offsets = [0, 0, 0, 0], sizes = [1, 1, 8, 8], strides = [1, 1, 1, 1]} : vector<1x1x9x8xf32> to vector<1x1x8x8xf32>
    %23 = vector.extract_strided_slice %11 {offsets = [0, 0, 0, 0], sizes = [1, 1, 8, 8], strides = [1, 1, 1, 1]} : vector<1x1x9x8xf32> to vector<1x1x8x8xf32>
    %24 = arith.addf %22, %23 : vector<1x1x8x8xf32>
    %25 = vector.extract_strided_slice %9 {offsets = [0, 0, 1, 0], sizes = [1, 1, 8, 8], strides = [1, 1, 1, 1]} : vector<1x1x9x8xf32> to vector<1x1x8x8xf32>
    %26 = arith.addf %24, %25 : vector<1x1x8x8xf32>
    %27 = arith.addf %16, %21 : vector<1x8x8x8xf32>
    %28 = vector.extract_strided_slice %27 {offsets = [0, 0, 0, 0], sizes = [1, 7, 8, 8], strides = [1, 1, 1, 1]} : vector<1x8x8x8xf32> to vector<1x7x8x8xf32>
    %29 = vector.extract_strided_slice %16 {offsets = [0, 1, 0, 0], sizes = [1, 7, 8, 8], strides = [1, 1, 1, 1]} : vector<1x8x8x8xf32> to vector<1x7x8x8xf32>
    %30 = arith.addf %28, %29 : vector<1x7x8x8xf32>
    %cst = arith.constant 0.111111112 : f32
    %31 = vector.broadcast %cst : f32 to vector<1x7x8x8xf32>
    %32 = arith.mulf %30, %31 : vector<1x7x8x8xf32>
    %33 = arith.truncf %32 : vector<1x7x8x8xf32> to vector<1x7x8x8xbf16>
    %c0_23 = arith.constant 0 : index
    %c0_24 = arith.constant 0 : index
    %c0_25 = arith.constant 0 : index
    %c0_26 = arith.constant 0 : index
    %34 = vector.load %arg9[%c0_23, %c0_24, %c0_25, %c0_26] : memref<1x8x8x8xbf16, #tpu.memory_space<vmem>>, vector<1x7x8x8xbf16>
    tpu.vector_store %arg9[%c0_23, %c0_24, %c0_25, %c0_26], %33 {strides = array<i32>} : memref<1x8x8x8xbf16, #tpu.memory_space<vmem>>, vector<1x7x8x8xbf16>,
    %35 = vector.extract_strided_slice %27 {offsets = [0, 7, 0, 0], sizes = [1, 1, 8, 8], strides = [1, 1, 1, 1]} : vector<1x8x8x8xf32> to vector<1x1x8x8xf32>
    %36 = arith.addf %35, %26 : vector<1x1x8x8xf32>
    %cst_27 = arith.constant 0.111111112 : f32
    %37 = vector.broadcast %cst_27 : f32 to vector<1x1x8x8xf32>
    %38 = arith.mulf %36, %37 : vector<1x1x8x8xf32>
    %39 = arith.truncf %38 : vector<1x1x8x8xf32> to vector<1x1x8x8xbf16>
    %c0_28 = arith.constant 0 : index
    %c7 = arith.constant 7 : index
    %c0_29 = arith.constant 0 : index
    %c0_30 = arith.constant 0 : index
    %40 = vector.load %arg9[%c0_28, %c7, %c0_29, %c0_30] : memref<1x8x8x8xbf16, #tpu.memory_space<vmem>>, vector<1x1x8x8xbf16>
    tpu.vector_store %arg9[%c0_28, %c7, %c0_29, %c0_30], %39 {strides = array<i32>} : memref<1x8x8x8xbf16, #tpu.memory_space<vmem>>, vector<1x1x8x8xbf16>,
    return
  }
  func.func @transform_0(%arg0: i32, %arg1: i32, %arg2: i32) -> (i32, i32, i32, i32) {
    %c0_i32 = arith.constant 0 : i32
    %c0_i32_0 = arith.constant 0 : i32
    return %arg0, %arg1, %c0_i32, %arg2 : i32, i32, i32, i32
  }
  func.func @transform_1(%arg0: i32, %arg1: i32, %arg2: i32) -> (i32, i32, i32, i32) {
    %c0_i32 = arith.constant 0 : i32
    %c0_i32_0 = arith.constant 0 : i32
    return %arg0, %arg1, %c0_i32, %arg2 : i32, i32, i32, i32
  }
  func.func @transform_2(%arg0: i32, %arg1: i32, %arg2: i32) -> (i32, i32, i32, i32) {
    %c0_i32 = arith.constant 0 : i32
    %c0_i32_0 = arith.constant 0 : i32
    return %arg0, %arg1, %c0_i32, %arg2 : i32, i32, i32, i32
  }
  func.func @transform_3(%arg0: i32, %arg1: i32, %arg2: i32) -> (i32, i32, i32, i32) {
    %c0_i32 = arith.constant 0 : i32
    %c0_i32_0 = arith.constant 0 : i32
    return %arg0, %arg1, %c0_i32, %arg2 : i32, i32, i32, i32
  }
  func.func @transform_4(%arg0: i32, %arg1: i32, %arg2: i32) -> (i32, i32, i32, i32) {
    %c1_i32 = arith.constant 1 : i32
    %0 = arith.addi %arg1, %c1_i32 : i32
    %c8_i32 = arith.constant 8 : i32
    %1 = arith.muli %0, %c8_i32 : i32
    %c0_i32 = arith.constant 0 : i32
    %c0_i32_0 = arith.constant 0 : i32
    return %arg0, %1, %c0_i32, %arg2 : i32, i32, i32, i32
  }
  func.func @transform_5(%arg0: i32, %arg1: i32, %arg2: i32) -> (i32, i32, i32, i32) {
    %c1_i32 = arith.constant 1 : i32
    %0 = arith.addi %arg1, %c1_i32 : i32
    %c8_i32 = arith.constant 8 : i32
    %1 = arith.muli %0, %c8_i32 : i32
    %c0_i32 = arith.constant 0 : i32
    %c0_i32_0 = arith.constant 0 : i32
    return %arg0, %1, %c0_i32, %arg2 : i32, i32, i32, i32
  }
  func.func @transform_6(%arg0: i32, %arg1: i32, %arg2: i32) -> (i32, i32, i32, i32) {
    %c0_i32 = arith.constant 0 : i32
    %c0_i32_0 = arith.constant 0 : i32
    return %arg0, %arg1, %c0_i32, %arg2 : i32, i32, i32, i32
  }
}

module attributes {stable_mosaic.version = 11 : i64} {
  func.func @_mm_kernel_single_k(%arg0: i32, %arg1: i32, %arg2: memref<128x72xbf16, #tpu.memory_space<vmem>>, %arg3: memref<72x8xbf16, #tpu.memory_space<vmem>>, %arg4: memref<1x8xf32, #tpu.memory_space<vmem>>, %arg5: memref<128x8xbf16, #tpu.memory_space<vmem>>) attributes {dimension_semantics = [#tpu.dimension_semantics<parallel>, #tpu.dimension_semantics<parallel>], iteration_bounds = array<i64: 1, 1>, scalar_prefetch = 0 : i64, scratch_operands = 0 : i64, tpu.core_type = #tpu.core_type<tc>, window_params = [{transform_indices = @transform_0, window_bounds = array<i64: 128, 72>}, {transform_indices = @transform_1, window_bounds = array<i64: 72, 8>}, {transform_indices = @transform_2, window_bounds = array<i64: 1, 8>}, {transform_indices = @transform_3, window_bounds = array<i64: 128, 8>}]} {
    %c0 = arith.constant 0 : index
    %c0_0 = arith.constant 0 : index
    %0 = vector.load %arg2[%c0, %c0_0] : memref<128x72xbf16, #tpu.memory_space<vmem>>, vector<128x72xbf16>
    %c0_1 = arith.constant 0 : index
    %c0_2 = arith.constant 0 : index
    %1 = vector.load %arg3[%c0_1, %c0_2] : memref<72x8xbf16, #tpu.memory_space<vmem>>, vector<72x8xbf16>
    %cst = arith.constant dense<0.000000e+00> : vector<128x8xf32>
    %2 = tpu.matmul %0, %1, %cst {dimension_numbers = #tpu.dot_dimension_numbers<[1], [0], [0], [1], [0, 0, 1, 1], [], []>} : vector<128x72xbf16>, vector<72x8xbf16>, vector<128x8xf32> -> vector<128x8xf32>
    %c0_3 = arith.constant 0 : index
    %c0_4 = arith.constant 0 : index
    %3 = vector.load %arg4[%c0_3, %c0_4] : memref<1x8xf32, #tpu.memory_space<vmem>>, vector<1x8xf32>
    %4 = vector.broadcast %3 : vector<1x8xf32> to vector<128x8xf32>
    %5 = arith.addf %2, %4 : vector<128x8xf32>
    %cst_5 = arith.constant 0.000000e+00 : f32
    %6 = vector.broadcast %cst_5 : f32 to vector<128x8xf32>
    %7 = arith.cmpf oge, %5, %6 : vector<128x8xf32>
    %cst_6 = arith.constant 2.000000e-01 : f32
    %8 = vector.broadcast %cst_6 : f32 to vector<128x8xf32>
    %9 = arith.mulf %8, %5 : vector<128x8xf32>
    %10 = arith.select %7, %5, %9 : vector<128x8xi1>, vector<128x8xf32>
    %11 = arith.truncf %10 : vector<128x8xf32> to vector<128x8xbf16>
    %c0_7 = arith.constant 0 : index
    %c0_8 = arith.constant 0 : index
    %12 = vector.load %arg5[%c0_7, %c0_8] : memref<128x8xbf16, #tpu.memory_space<vmem>>, vector<128x8xbf16>
    tpu.vector_store %arg5[%c0_7, %c0_8], %11 {strides = array<i32>} : memref<128x8xbf16, #tpu.memory_space<vmem>>, vector<128x8xbf16>,
    return
  }
  func.func @transform_0(%arg0: i32, %arg1: i32) -> (i32, i32) {
    %c0_i32 = arith.constant 0 : i32
    %c0_i32_0 = arith.constant 0 : i32
    return %arg1, %c0_i32 : i32, i32
  }
  func.func @transform_1(%arg0: i32, %arg1: i32) -> (i32, i32) {
    %c0_i32 = arith.constant 0 : i32
    %c0_i32_0 = arith.constant 0 : i32
    return %c0_i32, %arg0 : i32, i32
  }
  func.func @transform_2(%arg0: i32, %arg1: i32) -> (i32, i32) {
    %c0_i32 = arith.constant 0 : i32
    %c0_i32_0 = arith.constant 0 : i32
    return %c0_i32, %arg0 : i32, i32
  }
  func.func @transform_3(%arg0: i32, %arg1: i32) -> (i32, i32) {
    %c0_i32 = arith.constant 0 : i32
    return %arg1, %arg0 : i32, i32
  }
}

module attributes {stable_mosaic.version = 11 : i64} {
  func.func @_mm_kernel_single_k(%arg0: i32, %arg1: i32, %arg2: memref<128x8xbf16, #tpu.memory_space<vmem>>, %arg3: memref<8x16xbf16, #tpu.memory_space<vmem>>, %arg4: memref<128x16xbf16, #tpu.memory_space<vmem>>) attributes {dimension_semantics = [#tpu.dimension_semantics<parallel>, #tpu.dimension_semantics<parallel>], iteration_bounds = array<i64: 1, 1>, scalar_prefetch = 0 : i64, scratch_operands = 0 : i64, tpu.core_type = #tpu.core_type<tc>, window_params = [{transform_indices = @transform_0, window_bounds = array<i64: 128, 8>}, {transform_indices = @transform_1, window_bounds = array<i64: 8, 16>}, {transform_indices = @transform_2, window_bounds = array<i64: 128, 16>}]} {
    %c0 = arith.constant 0 : index
    %c0_0 = arith.constant 0 : index
    %0 = vector.load %arg2[%c0, %c0_0] : memref<128x8xbf16, #tpu.memory_space<vmem>>, vector<128x8xbf16>
    %c0_1 = arith.constant 0 : index
    %c0_2 = arith.constant 0 : index
    %1 = vector.load %arg3[%c0_1, %c0_2] : memref<8x16xbf16, #tpu.memory_space<vmem>>, vector<8x16xbf16>
    %cst = arith.constant dense<0.000000e+00> : vector<128x16xf32>
    %2 = tpu.matmul %0, %1, %cst {dimension_numbers = #tpu.dot_dimension_numbers<[1], [0], [0], [1], [0, 0, 1, 1], [], []>} : vector<128x8xbf16>, vector<8x16xbf16>, vector<128x16xf32> -> vector<128x16xf32>
    %3 = arith.truncf %2 : vector<128x16xf32> to vector<128x16xbf16>
    %c0_3 = arith.constant 0 : index
    %c0_4 = arith.constant 0 : index
    %4 = vector.load %arg4[%c0_3, %c0_4] : memref<128x16xbf16, #tpu.memory_space<vmem>>, vector<128x16xbf16>
    tpu.vector_store %arg4[%c0_3, %c0_4], %3 {strides = array<i32>} : memref<128x16xbf16, #tpu.memory_space<vmem>>, vector<128x16xbf16>,
    return
  }
  func.func @transform_0(%arg0: i32, %arg1: i32) -> (i32, i32) {
    %c0_i32 = arith.constant 0 : i32
    %c0_i32_0 = arith.constant 0 : i32
    return %arg1, %c0_i32 : i32, i32
  }
  func.func @transform_1(%arg0: i32, %arg1: i32) -> (i32, i32) {
    %c0_i32 = arith.constant 0 : i32
    %c0_i32_0 = arith.constant 0 : i32
    return %c0_i32, %arg0 : i32, i32
  }
  func.func @transform_2(%arg0: i32, %arg1: i32) -> (i32, i32) {
    %c0_i32 = arith.constant 0 : i32
    return %arg1, %arg0 : i32, i32
  }
}

module attributes {stable_mosaic.version = 11 : i64} {
  func.func @_mm_kernel_single_k(%arg0: i32, %arg1: i32, %arg2: memref<128x72xbf16, #tpu.memory_space<vmem>>, %arg3: memref<72x16xbf16, #tpu.memory_space<vmem>>, %arg4: memref<1x16xf32, #tpu.memory_space<vmem>>, %arg5: memref<128x16xbf16, #tpu.memory_space<vmem>>, %arg6: memref<128x16xbf16, #tpu.memory_space<vmem>>) attributes {dimension_semantics = [#tpu.dimension_semantics<parallel>, #tpu.dimension_semantics<parallel>], iteration_bounds = array<i64: 1, 1>, scalar_prefetch = 0 : i64, scratch_operands = 0 : i64, tpu.core_type = #tpu.core_type<tc>, window_params = [{transform_indices = @transform_0, window_bounds = array<i64: 128, 72>}, {transform_indices = @transform_1, window_bounds = array<i64: 72, 16>}, {transform_indices = @transform_2, window_bounds = array<i64: 1, 16>}, {transform_indices = @transform_3, window_bounds = array<i64: 128, 16>}, {transform_indices = @transform_4, window_bounds = array<i64: 128, 16>}]} {
    %c0 = arith.constant 0 : index
    %c0_0 = arith.constant 0 : index
    %0 = vector.load %arg2[%c0, %c0_0] : memref<128x72xbf16, #tpu.memory_space<vmem>>, vector<128x72xbf16>
    %c0_1 = arith.constant 0 : index
    %c0_2 = arith.constant 0 : index
    %1 = vector.load %arg3[%c0_1, %c0_2] : memref<72x16xbf16, #tpu.memory_space<vmem>>, vector<72x16xbf16>
    %cst = arith.constant dense<0.000000e+00> : vector<128x16xf32>
    %2 = tpu.matmul %0, %1, %cst {dimension_numbers = #tpu.dot_dimension_numbers<[1], [0], [0], [1], [0, 0, 1, 1], [], []>} : vector<128x72xbf16>, vector<72x16xbf16>, vector<128x16xf32> -> vector<128x16xf32>
    %c0_3 = arith.constant 0 : index
    %c0_4 = arith.constant 0 : index
    %3 = vector.load %arg4[%c0_3, %c0_4] : memref<1x16xf32, #tpu.memory_space<vmem>>, vector<1x16xf32>
    %4 = vector.broadcast %3 : vector<1x16xf32> to vector<128x16xf32>
    %5 = arith.addf %2, %4 : vector<128x16xf32>
    %c0_5 = arith.constant 0 : index
    %c0_6 = arith.constant 0 : index
    %6 = vector.load %arg5[%c0_5, %c0_6] : memref<128x16xbf16, #tpu.memory_space<vmem>>, vector<128x16xbf16>
    %7 = arith.extf %6 : vector<128x16xbf16> to vector<128x16xf32>
    %cst_7 = arith.constant 1.000000e-01 : f32
    %8 = vector.broadcast %cst_7 : f32 to vector<128x16xf32>
    %9 = arith.mulf %8, %5 : vector<128x16xf32>
    %10 = arith.addf %7, %9 : vector<128x16xf32>
    %11 = arith.truncf %10 : vector<128x16xf32> to vector<128x16xbf16>
    %c0_8 = arith.constant 0 : index
    %c0_9 = arith.constant 0 : index
    %12 = vector.load %arg6[%c0_8, %c0_9] : memref<128x16xbf16, #tpu.memory_space<vmem>>, vector<128x16xbf16>
    tpu.vector_store %arg6[%c0_8, %c0_9], %11 {strides = array<i32>} : memref<128x16xbf16, #tpu.memory_space<vmem>>, vector<128x16xbf16>,
    return
  }
  func.func @transform_0(%arg0: i32, %arg1: i32) -> (i32, i32) {
    %c0_i32 = arith.constant 0 : i32
    %c0_i32_0 = arith.constant 0 : i32
    return %arg1, %c0_i32 : i32, i32
  }
  func.func @transform_1(%arg0: i32, %arg1: i32) -> (i32, i32) {
    %c0_i32 = arith.constant 0 : i32
    %c0_i32_0 = arith.constant 0 : i32
    return %c0_i32, %arg0 : i32, i32
  }
  func.func @transform_2(%arg0: i32, %arg1: i32) -> (i32, i32) {
    %c0_i32 = arith.constant 0 : i32
    %c0_i32_0 = arith.constant 0 : i32
    return %c0_i32, %arg0 : i32, i32
  }
  func.func @transform_3(%arg0: i32, %arg1: i32) -> (i32, i32) {
    %c0_i32 = arith.constant 0 : i32
    return %arg1, %arg0 : i32, i32
  }
  func.func @transform_4(%arg0: i32, %arg1: i32) -> (i32, i32) {
    %c0_i32 = arith.constant 0 : i32
    return %arg1, %arg0 : i32, i32
  }
}

module attributes {stable_mosaic.version = 11 : i64} {
  func.func @_pool_kernel(%arg0: i32, %arg1: i32, %arg2: i32, %arg3: memref<1x4x5x16xbf16, #tpu.memory_space<vmem>>, %arg4: memref<1x4x5x16xbf16, #tpu.memory_space<vmem>>, %arg5: memref<1x4x5x16xbf16, #tpu.memory_space<vmem>>, %arg6: memref<1x4x5x16xbf16, #tpu.memory_space<vmem>>, %arg7: memref<1x1x5x16xbf16, #tpu.memory_space<vmem>>, %arg8: memref<1x1x5x16xbf16, #tpu.memory_space<vmem>>, %arg9: memref<1x4x4x16xbf16, #tpu.memory_space<vmem>>) attributes {dimension_semantics = [#tpu.dimension_semantics<parallel>, #tpu.dimension_semantics<parallel>, #tpu.dimension_semantics<parallel>], iteration_bounds = array<i64: 2, 1, 1>, scalar_prefetch = 0 : i64, scratch_operands = 0 : i64, tpu.core_type = #tpu.core_type<tc>, window_params = [{transform_indices = @transform_0, window_bounds = array<i64: 1, 4, 5, 16>}, {transform_indices = @transform_1, window_bounds = array<i64: 1, 4, 5, 16>}, {transform_indices = @transform_2, window_bounds = array<i64: 1, 4, 5, 16>}, {transform_indices = @transform_3, window_bounds = array<i64: 1, 4, 5, 16>}, {transform_indices = @transform_4, window_bounds = array<i64: 1, 1, 5, 16>}, {transform_indices = @transform_5, window_bounds = array<i64: 1, 1, 5, 16>}, {transform_indices = @transform_6, window_bounds = array<i64: 1, 4, 4, 16>}]} {
    %c0 = arith.constant 0 : index
    %c0_0 = arith.constant 0 : index
    %c0_1 = arith.constant 0 : index
    %c0_2 = arith.constant 0 : index
    %0 = vector.load %arg3[%c0, %c0_0, %c0_1, %c0_2] : memref<1x4x5x16xbf16, #tpu.memory_space<vmem>>, vector<1x4x5x16xbf16>
    %1 = arith.extf %0 : vector<1x4x5x16xbf16> to vector<1x4x5x16xf32>
    %c0_3 = arith.constant 0 : index
    %c0_4 = arith.constant 0 : index
    %c0_5 = arith.constant 0 : index
    %c0_6 = arith.constant 0 : index
    %2 = vector.load %arg4[%c0_3, %c0_4, %c0_5, %c0_6] : memref<1x4x5x16xbf16, #tpu.memory_space<vmem>>, vector<1x4x5x16xbf16>
    %3 = arith.extf %2 : vector<1x4x5x16xbf16> to vector<1x4x5x16xf32>
    %c0_7 = arith.constant 0 : index
    %c0_8 = arith.constant 0 : index
    %c0_9 = arith.constant 0 : index
    %c0_10 = arith.constant 0 : index
    %4 = vector.load %arg5[%c0_7, %c0_8, %c0_9, %c0_10] : memref<1x4x5x16xbf16, #tpu.memory_space<vmem>>, vector<1x4x5x16xbf16>
    %5 = arith.extf %4 : vector<1x4x5x16xbf16> to vector<1x4x5x16xf32>
    %c0_11 = arith.constant 0 : index
    %c0_12 = arith.constant 0 : index
    %c0_13 = arith.constant 0 : index
    %c0_14 = arith.constant 0 : index
    %6 = vector.load %arg6[%c0_11, %c0_12, %c0_13, %c0_14] : memref<1x4x5x16xbf16, #tpu.memory_space<vmem>>, vector<1x4x5x16xbf16>
    %7 = arith.extf %6 : vector<1x4x5x16xbf16> to vector<1x4x5x16xf32>
    %c0_15 = arith.constant 0 : index
    %c0_16 = arith.constant 0 : index
    %c0_17 = arith.constant 0 : index
    %c0_18 = arith.constant 0 : index
    %8 = vector.load %arg7[%c0_15, %c0_16, %c0_17, %c0_18] : memref<1x1x5x16xbf16, #tpu.memory_space<vmem>>, vector<1x1x5x16xbf16>
    %9 = arith.extf %8 : vector<1x1x5x16xbf16> to vector<1x1x5x16xf32>
    %c0_19 = arith.constant 0 : index
    %c0_20 = arith.constant 0 : index
    %c0_21 = arith.constant 0 : index
    %c0_22 = arith.constant 0 : index
    %10 = vector.load %arg8[%c0_19, %c0_20, %c0_21, %c0_22] : memref<1x1x5x16xbf16, #tpu.memory_space<vmem>>, vector<1x1x5x16xbf16>
    %11 = arith.extf %10 : vector<1x1x5x16xbf16> to vector<1x1x5x16xf32>
    %12 = vector.extract_strided_slice %1 {offsets = [0, 0, 0, 0], sizes = [1, 4, 4, 16], strides = [1, 1, 1, 1]} : vector<1x4x5x16xf32> to vector<1x4x4x16xf32>
    %13 = vector.extract_strided_slice %3 {offsets = [0, 0, 0, 0], sizes = [1, 4, 4, 16], strides = [1, 1, 1, 1]} : vector<1x4x5x16xf32> to vector<1x4x4x16xf32>
    %14 = arith.addf %12, %13 : vector<1x4x4x16xf32>
    %15 = vector.extract_strided_slice %1 {offsets = [0, 0, 1, 0], sizes = [1, 4, 4, 16], strides = [1, 1, 1, 1]} : vector<1x4x5x16xf32> to vector<1x4x4x16xf32>
    %16 = arith.addf %14, %15 : vector<1x4x4x16xf32>
    %17 = vector.extract_strided_slice %5 {offsets = [0, 0, 0, 0], sizes = [1, 4, 4, 16], strides = [1, 1, 1, 1]} : vector<1x4x5x16xf32> to vector<1x4x4x16xf32>
    %18 = vector.extract_strided_slice %7 {offsets = [0, 0, 0, 0], sizes = [1, 4, 4, 16], strides = [1, 1, 1, 1]} : vector<1x4x5x16xf32> to vector<1x4x4x16xf32>
    %19 = arith.addf %17, %18 : vector<1x4x4x16xf32>
    %20 = vector.extract_strided_slice %5 {offsets = [0, 0, 1, 0], sizes = [1, 4, 4, 16], strides = [1, 1, 1, 1]} : vector<1x4x5x16xf32> to vector<1x4x4x16xf32>
    %21 = arith.addf %19, %20 : vector<1x4x4x16xf32>
    %22 = vector.extract_strided_slice %9 {offsets = [0, 0, 0, 0], sizes = [1, 1, 4, 16], strides = [1, 1, 1, 1]} : vector<1x1x5x16xf32> to vector<1x1x4x16xf32>
    %23 = vector.extract_strided_slice %11 {offsets = [0, 0, 0, 0], sizes = [1, 1, 4, 16], strides = [1, 1, 1, 1]} : vector<1x1x5x16xf32> to vector<1x1x4x16xf32>
    %24 = arith.addf %22, %23 : vector<1x1x4x16xf32>
    %25 = vector.extract_strided_slice %9 {offsets = [0, 0, 1, 0], sizes = [1, 1, 4, 16], strides = [1, 1, 1, 1]} : vector<1x1x5x16xf32> to vector<1x1x4x16xf32>
    %26 = arith.addf %24, %25 : vector<1x1x4x16xf32>
    %27 = arith.addf %16, %21 : vector<1x4x4x16xf32>
    %28 = vector.extract_strided_slice %27 {offsets = [0, 0, 0, 0], sizes = [1, 3, 4, 16], strides = [1, 1, 1, 1]} : vector<1x4x4x16xf32> to vector<1x3x4x16xf32>
    %29 = vector.extract_strided_slice %16 {offsets = [0, 1, 0, 0], sizes = [1, 3, 4, 16], strides = [1, 1, 1, 1]} : vector<1x4x4x16xf32> to vector<1x3x4x16xf32>
    %30 = arith.addf %28, %29 : vector<1x3x4x16xf32>
    %cst = arith.constant 0.111111112 : f32
    %31 = vector.broadcast %cst : f32 to vector<1x3x4x16xf32>
    %32 = arith.mulf %30, %31 : vector<1x3x4x16xf32>
    %33 = arith.truncf %32 : vector<1x3x4x16xf32> to vector<1x3x4x16xbf16>
    %c0_23 = arith.constant 0 : index
    %c0_24 = arith.constant 0 : index
    %c0_25 = arith.constant 0 : index
    %c0_26 = arith.constant 0 : index
    %34 = vector.load %arg9[%c0_23, %c0_24, %c0_25, %c0_26] : memref<1x4x4x16xbf16, #tpu.memory_space<vmem>>, vector<1x3x4x16xbf16>
    tpu.vector_store %arg9[%c0_23, %c0_24, %c0_25, %c0_26], %33 {strides = array<i32>} : memref<1x4x4x16xbf16, #tpu.memory_space<vmem>>, vector<1x3x4x16xbf16>,
    %35 = vector.extract_strided_slice %27 {offsets = [0, 3, 0, 0], sizes = [1, 1, 4, 16], strides = [1, 1, 1, 1]} : vector<1x4x4x16xf32> to vector<1x1x4x16xf32>
    %36 = arith.addf %35, %26 : vector<1x1x4x16xf32>
    %cst_27 = arith.constant 0.111111112 : f32
    %37 = vector.broadcast %cst_27 : f32 to vector<1x1x4x16xf32>
    %38 = arith.mulf %36, %37 : vector<1x1x4x16xf32>
    %39 = arith.truncf %38 : vector<1x1x4x16xf32> to vector<1x1x4x16xbf16>
    %c0_28 = arith.constant 0 : index
    %c3 = arith.constant 3 : index
    %c0_29 = arith.constant 0 : index
    %c0_30 = arith.constant 0 : index
    %40 = vector.load %arg9[%c0_28, %c3, %c0_29, %c0_30] : memref<1x4x4x16xbf16, #tpu.memory_space<vmem>>, vector<1x1x4x16xbf16>
    tpu.vector_store %arg9[%c0_28, %c3, %c0_29, %c0_30], %39 {strides = array<i32>} : memref<1x4x4x16xbf16, #tpu.memory_space<vmem>>, vector<1x1x4x16xbf16>,
    return
  }
  func.func @transform_0(%arg0: i32, %arg1: i32, %arg2: i32) -> (i32, i32, i32, i32) {
    %c0_i32 = arith.constant 0 : i32
    %c0_i32_0 = arith.constant 0 : i32
    return %arg0, %arg1, %c0_i32, %arg2 : i32, i32, i32, i32
  }
  func.func @transform_1(%arg0: i32, %arg1: i32, %arg2: i32) -> (i32, i32, i32, i32) {
    %c0_i32 = arith.constant 0 : i32
    %c0_i32_0 = arith.constant 0 : i32
    return %arg0, %arg1, %c0_i32, %arg2 : i32, i32, i32, i32
  }
  func.func @transform_2(%arg0: i32, %arg1: i32, %arg2: i32) -> (i32, i32, i32, i32) {
    %c0_i32 = arith.constant 0 : i32
    %c0_i32_0 = arith.constant 0 : i32
    return %arg0, %arg1, %c0_i32, %arg2 : i32, i32, i32, i32
  }
  func.func @transform_3(%arg0: i32, %arg1: i32, %arg2: i32) -> (i32, i32, i32, i32) {
    %c0_i32 = arith.constant 0 : i32
    %c0_i32_0 = arith.constant 0 : i32
    return %arg0, %arg1, %c0_i32, %arg2 : i32, i32, i32, i32
  }
  func.func @transform_4(%arg0: i32, %arg1: i32, %arg2: i32) -> (i32, i32, i32, i32) {
    %c1_i32 = arith.constant 1 : i32
    %0 = arith.addi %arg1, %c1_i32 : i32
    %c4_i32 = arith.constant 4 : i32
    %1 = arith.muli %0, %c4_i32 : i32
    %c0_i32 = arith.constant 0 : i32
    %c0_i32_0 = arith.constant 0 : i32
    return %arg0, %1, %c0_i32, %arg2 : i32, i32, i32, i32
  }
  func.func @transform_5(%arg0: i32, %arg1: i32, %arg2: i32) -> (i32, i32, i32, i32) {
    %c1_i32 = arith.constant 1 : i32
    %0 = arith.addi %arg1, %c1_i32 : i32
    %c4_i32 = arith.constant 4 : i32
    %1 = arith.muli %0, %c4_i32 : i32
    %c0_i32 = arith.constant 0 : i32
    %c0_i32_0 = arith.constant 0 : i32
    return %arg0, %1, %c0_i32, %arg2 : i32, i32, i32, i32
  }
  func.func @transform_6(%arg0: i32, %arg1: i32, %arg2: i32) -> (i32, i32, i32, i32) {
    %c0_i32 = arith.constant 0 : i32
    %c0_i32_0 = arith.constant 0 : i32
    return %arg0, %arg1, %c0_i32, %arg2 : i32, i32, i32, i32
  }
}

module attributes {stable_mosaic.version = 11 : i64} {
  func.func @_mm_kernel_single_k(%arg0: i32, %arg1: i32, %arg2: memref<32x144xbf16, #tpu.memory_space<vmem>>, %arg3: memref<144x16xbf16, #tpu.memory_space<vmem>>, %arg4: memref<1x16xf32, #tpu.memory_space<vmem>>, %arg5: memref<32x16xbf16, #tpu.memory_space<vmem>>) attributes {dimension_semantics = [#tpu.dimension_semantics<parallel>, #tpu.dimension_semantics<parallel>], iteration_bounds = array<i64: 1, 1>, scalar_prefetch = 0 : i64, scratch_operands = 0 : i64, tpu.core_type = #tpu.core_type<tc>, window_params = [{transform_indices = @transform_0, window_bounds = array<i64: 32, 144>}, {transform_indices = @transform_1, window_bounds = array<i64: 144, 16>}, {transform_indices = @transform_2, window_bounds = array<i64: 1, 16>}, {transform_indices = @transform_3, window_bounds = array<i64: 32, 16>}]} {
    %c0 = arith.constant 0 : index
    %c0_0 = arith.constant 0 : index
    %0 = vector.load %arg2[%c0, %c0_0] : memref<32x144xbf16, #tpu.memory_space<vmem>>, vector<32x144xbf16>
    %c0_1 = arith.constant 0 : index
    %c0_2 = arith.constant 0 : index
    %1 = vector.load %arg3[%c0_1, %c0_2] : memref<144x16xbf16, #tpu.memory_space<vmem>>, vector<144x16xbf16>
    %cst = arith.constant dense<0.000000e+00> : vector<32x16xf32>
    %2 = tpu.matmul %0, %1, %cst {dimension_numbers = #tpu.dot_dimension_numbers<[1], [0], [0], [1], [0, 0, 1, 1], [], []>} : vector<32x144xbf16>, vector<144x16xbf16>, vector<32x16xf32> -> vector<32x16xf32>
    %c0_3 = arith.constant 0 : index
    %c0_4 = arith.constant 0 : index
    %3 = vector.load %arg4[%c0_3, %c0_4] : memref<1x16xf32, #tpu.memory_space<vmem>>, vector<1x16xf32>
    %4 = vector.broadcast %3 : vector<1x16xf32> to vector<32x16xf32>
    %5 = arith.addf %2, %4 : vector<32x16xf32>
    %cst_5 = arith.constant 0.000000e+00 : f32
    %6 = vector.broadcast %cst_5 : f32 to vector<32x16xf32>
    %7 = arith.cmpf oge, %5, %6 : vector<32x16xf32>
    %cst_6 = arith.constant 2.000000e-01 : f32
    %8 = vector.broadcast %cst_6 : f32 to vector<32x16xf32>
    %9 = arith.mulf %8, %5 : vector<32x16xf32>
    %10 = arith.select %7, %5, %9 : vector<32x16xi1>, vector<32x16xf32>
    %11 = arith.truncf %10 : vector<32x16xf32> to vector<32x16xbf16>
    %c0_7 = arith.constant 0 : index
    %c0_8 = arith.constant 0 : index
    %12 = vector.load %arg5[%c0_7, %c0_8] : memref<32x16xbf16, #tpu.memory_space<vmem>>, vector<32x16xbf16>
    tpu.vector_store %arg5[%c0_7, %c0_8], %11 {strides = array<i32>} : memref<32x16xbf16, #tpu.memory_space<vmem>>, vector<32x16xbf16>,
    return
  }
  func.func @transform_0(%arg0: i32, %arg1: i32) -> (i32, i32) {
    %c0_i32 = arith.constant 0 : i32
    %c0_i32_0 = arith.constant 0 : i32
    return %arg1, %c0_i32 : i32, i32
  }
  func.func @transform_1(%arg0: i32, %arg1: i32) -> (i32, i32) {
    %c0_i32 = arith.constant 0 : i32
    %c0_i32_0 = arith.constant 0 : i32
    return %c0_i32, %arg0 : i32, i32
  }
  func.func @transform_2(%arg0: i32, %arg1: i32) -> (i32, i32) {
    %c0_i32 = arith.constant 0 : i32
    %c0_i32_0 = arith.constant 0 : i32
    return %c0_i32, %arg0 : i32, i32
  }
  func.func @transform_3(%arg0: i32, %arg1: i32) -> (i32, i32) {
    %c0_i32 = arith.constant 0 : i32
    return %arg1, %arg0 : i32, i32
  }
}

module attributes {stable_mosaic.version = 11 : i64} {
  func.func @_mm_kernel_single_k(%arg0: i32, %arg1: i32, %arg2: memref<32x16xbf16, #tpu.memory_space<vmem>>, %arg3: memref<16x32xbf16, #tpu.memory_space<vmem>>, %arg4: memref<32x32xbf16, #tpu.memory_space<vmem>>) attributes {dimension_semantics = [#tpu.dimension_semantics<parallel>, #tpu.dimension_semantics<parallel>], iteration_bounds = array<i64: 1, 1>, scalar_prefetch = 0 : i64, scratch_operands = 0 : i64, tpu.core_type = #tpu.core_type<tc>, window_params = [{transform_indices = @transform_0, window_bounds = array<i64: 32, 16>}, {transform_indices = @transform_1, window_bounds = array<i64: 16, 32>}, {transform_indices = @transform_2, window_bounds = array<i64: 32, 32>}]} {
    %c0 = arith.constant 0 : index
    %c0_0 = arith.constant 0 : index
    %0 = vector.load %arg2[%c0, %c0_0] : memref<32x16xbf16, #tpu.memory_space<vmem>>, vector<32x16xbf16>
    %c0_1 = arith.constant 0 : index
    %c0_2 = arith.constant 0 : index
    %1 = vector.load %arg3[%c0_1, %c0_2] : memref<16x32xbf16, #tpu.memory_space<vmem>>, vector<16x32xbf16>
    %cst = arith.constant dense<0.000000e+00> : vector<32x32xf32>
    %2 = tpu.matmul %0, %1, %cst {dimension_numbers = #tpu.dot_dimension_numbers<[1], [0], [0], [1], [0, 0, 1, 1], [], []>} : vector<32x16xbf16>, vector<16x32xbf16>, vector<32x32xf32> -> vector<32x32xf32>
    %3 = arith.truncf %2 : vector<32x32xf32> to vector<32x32xbf16>
    %c0_3 = arith.constant 0 : index
    %c0_4 = arith.constant 0 : index
    %4 = vector.load %arg4[%c0_3, %c0_4] : memref<32x32xbf16, #tpu.memory_space<vmem>>, vector<32x32xbf16>
    tpu.vector_store %arg4[%c0_3, %c0_4], %3 {strides = array<i32>} : memref<32x32xbf16, #tpu.memory_space<vmem>>, vector<32x32xbf16>,
    return
  }
  func.func @transform_0(%arg0: i32, %arg1: i32) -> (i32, i32) {
    %c0_i32 = arith.constant 0 : i32
    %c0_i32_0 = arith.constant 0 : i32
    return %arg1, %c0_i32 : i32, i32
  }
  func.func @transform_1(%arg0: i32, %arg1: i32) -> (i32, i32) {
    %c0_i32 = arith.constant 0 : i32
    %c0_i32_0 = arith.constant 0 : i32
    return %c0_i32, %arg0 : i32, i32
  }
  func.func @transform_2(%arg0: i32, %arg1: i32) -> (i32, i32) {
    %c0_i32 = arith.constant 0 : i32
    return %arg1, %arg0 : i32, i32
  }
}

module attributes {stable_mosaic.version = 11 : i64} {
  func.func @_mm_kernel_single_k(%arg0: i32, %arg1: i32, %arg2: memref<32x144xbf16, #tpu.memory_space<vmem>>, %arg3: memref<144x32xbf16, #tpu.memory_space<vmem>>, %arg4: memref<1x32xf32, #tpu.memory_space<vmem>>, %arg5: memref<32x32xbf16, #tpu.memory_space<vmem>>, %arg6: memref<32x32xbf16, #tpu.memory_space<vmem>>) attributes {dimension_semantics = [#tpu.dimension_semantics<parallel>, #tpu.dimension_semantics<parallel>], iteration_bounds = array<i64: 1, 1>, scalar_prefetch = 0 : i64, scratch_operands = 0 : i64, tpu.core_type = #tpu.core_type<tc>, window_params = [{transform_indices = @transform_0, window_bounds = array<i64: 32, 144>}, {transform_indices = @transform_1, window_bounds = array<i64: 144, 32>}, {transform_indices = @transform_2, window_bounds = array<i64: 1, 32>}, {transform_indices = @transform_3, window_bounds = array<i64: 32, 32>}, {transform_indices = @transform_4, window_bounds = array<i64: 32, 32>}]} {
    %c0 = arith.constant 0 : index
    %c0_0 = arith.constant 0 : index
    %0 = vector.load %arg2[%c0, %c0_0] : memref<32x144xbf16, #tpu.memory_space<vmem>>, vector<32x144xbf16>
    %c0_1 = arith.constant 0 : index
    %c0_2 = arith.constant 0 : index
    %1 = vector.load %arg3[%c0_1, %c0_2] : memref<144x32xbf16, #tpu.memory_space<vmem>>, vector<144x32xbf16>
    %cst = arith.constant dense<0.000000e+00> : vector<32x32xf32>
    %2 = tpu.matmul %0, %1, %cst {dimension_numbers = #tpu.dot_dimension_numbers<[1], [0], [0], [1], [0, 0, 1, 1], [], []>} : vector<32x144xbf16>, vector<144x32xbf16>, vector<32x32xf32> -> vector<32x32xf32>
    %c0_3 = arith.constant 0 : index
    %c0_4 = arith.constant 0 : index
    %3 = vector.load %arg4[%c0_3, %c0_4] : memref<1x32xf32, #tpu.memory_space<vmem>>, vector<1x32xf32>
    %4 = vector.broadcast %3 : vector<1x32xf32> to vector<32x32xf32>
    %5 = arith.addf %2, %4 : vector<32x32xf32>
    %c0_5 = arith.constant 0 : index
    %c0_6 = arith.constant 0 : index
    %6 = vector.load %arg5[%c0_5, %c0_6] : memref<32x32xbf16, #tpu.memory_space<vmem>>, vector<32x32xbf16>
    %7 = arith.extf %6 : vector<32x32xbf16> to vector<32x32xf32>
    %cst_7 = arith.constant 1.000000e-01 : f32
    %8 = vector.broadcast %cst_7 : f32 to vector<32x32xf32>
    %9 = arith.mulf %8, %5 : vector<32x32xf32>
    %10 = arith.addf %7, %9 : vector<32x32xf32>
    %11 = arith.truncf %10 : vector<32x32xf32> to vector<32x32xbf16>
    %c0_8 = arith.constant 0 : index
    %c0_9 = arith.constant 0 : index
    %12 = vector.load %arg6[%c0_8, %c0_9] : memref<32x32xbf16, #tpu.memory_space<vmem>>, vector<32x32xbf16>
    tpu.vector_store %arg6[%c0_8, %c0_9], %11 {strides = array<i32>} : memref<32x32xbf16, #tpu.memory_space<vmem>>, vector<32x32xbf16>,
    return
  }
  func.func @transform_0(%arg0: i32, %arg1: i32) -> (i32, i32) {
    %c0_i32 = arith.constant 0 : i32
    %c0_i32_0 = arith.constant 0 : i32
    return %arg1, %c0_i32 : i32, i32
  }
  func.func @transform_1(%arg0: i32, %arg1: i32) -> (i32, i32) {
    %c0_i32 = arith.constant 0 : i32
    %c0_i32_0 = arith.constant 0 : i32
    return %c0_i32, %arg0 : i32, i32
  }
  func.func @transform_2(%arg0: i32, %arg1: i32) -> (i32, i32) {
    %c0_i32 = arith.constant 0 : i32
    %c0_i32_0 = arith.constant 0 : i32
    return %c0_i32, %arg0 : i32, i32
  }
  func.func @transform_3(%arg0: i32, %arg1: i32) -> (i32, i32) {
    %c0_i32 = arith.constant 0 : i32
    return %arg1, %arg0 : i32, i32
  }
  func.func @transform_4(%arg0: i32, %arg1: i32) -> (i32, i32) {
    %c0_i32 = arith.constant 0 : i32
    return %arg1, %arg0 : i32, i32
  }
}

module attributes {stable_mosaic.version = 11 : i64} {
  func.func @_head_kernel(%arg0: memref<2x32xf32, #tpu.memory_space<vmem>>, %arg1: memref<16x1xbf16, #tpu.memory_space<vmem>>, %arg2: memref<1x1xf32, #tpu.memory_space<vmem>>, %arg3: memref<2x1xf32, #tpu.memory_space<vmem>>, %arg4: memref<2x16xf32, #tpu.memory_space<vmem>>, %arg5: memref<2x16xf32, #tpu.memory_space<vmem>>) attributes {dimension_semantics = [], scalar_prefetch = 0 : i64, scratch_operands = 0 : i64, tpu.core_type = #tpu.core_type<tc>} {
    %c0 = arith.constant 0 : index
    %c0_0 = arith.constant 0 : index
    %0 = vector.load %arg0[%c0, %c0_0] : memref<2x32xf32, #tpu.memory_space<vmem>>, vector<2x32xf32>
    %1 = vector.extract_strided_slice %0 {offsets = [0, 0], sizes = [2, 16], strides = [1, 1]} : vector<2x32xf32> to vector<2x16xf32>
    %2 = vector.extract_strided_slice %0 {offsets = [0, 16], sizes = [2, 16], strides = [1, 1]} : vector<2x32xf32> to vector<2x16xf32>
    %3 = arith.negf %2 : vector<2x16xf32>
    %4 = math.exp %3 : vector<2x16xf32>
    %cst = arith.constant 1.000000e+00 : f32
    %5 = vector.broadcast %cst : f32 to vector<2x16xf32>
    %6 = arith.addf %5, %4 : vector<2x16xf32>
    %7 = arith.divf %5, %6 : vector<2x16xf32>
    %c0_1 = arith.constant 0 : index
    %c0_2 = arith.constant 0 : index
    %8 = vector.load %arg4[%c0_1, %c0_2] : memref<2x16xf32, #tpu.memory_space<vmem>>, vector<2x16xf32>
    tpu.vector_store %arg4[%c0_1, %c0_2], %1 {strides = array<i32>} : memref<2x16xf32, #tpu.memory_space<vmem>>, vector<2x16xf32>,
    %c0_3 = arith.constant 0 : index
    %c0_4 = arith.constant 0 : index
    %9 = vector.load %arg5[%c0_3, %c0_4] : memref<2x16xf32, #tpu.memory_space<vmem>>, vector<2x16xf32>
    tpu.vector_store %arg5[%c0_3, %c0_4], %7 {strides = array<i32>} : memref<2x16xf32, #tpu.memory_space<vmem>>, vector<2x16xf32>,
    %cst_5 = arith.constant 0.000000e+00 : f32
    %10 = vector.broadcast %cst_5 : f32 to vector<2x16xf32>
    %11 = arith.cmpf oge, %1, %10 : vector<2x16xf32>
    %cst_6 = arith.constant 2.000000e-01 : f32
    %12 = vector.broadcast %cst_6 : f32 to vector<2x16xf32>
    %13 = arith.mulf %12, %1 : vector<2x16xf32>
    %14 = arith.select %11, %1, %13 : vector<2x16xi1>, vector<2x16xf32>
    %15 = arith.truncf %14 : vector<2x16xf32> to vector<2x16xbf16>
    %c0_7 = arith.constant 0 : index
    %c0_8 = arith.constant 0 : index
    %16 = vector.load %arg1[%c0_7, %c0_8] : memref<16x1xbf16, #tpu.memory_space<vmem>>, vector<16x1xbf16>
    %cst_9 = arith.constant dense<0.000000e+00> : vector<2x1xf32>
    %17 = tpu.matmul %15, %16, %cst_9 {dimension_numbers = #tpu.dot_dimension_numbers<[1], [0], [0], [1], [0, 0, 1, 1], [], []>} : vector<2x16xbf16>, vector<16x1xbf16>, vector<2x1xf32> -> vector<2x1xf32>
    %c0_10 = arith.constant 0 : index
    %c0_11 = arith.constant 0 : index
    %18 = vector.load %arg2[%c0_10, %c0_11] : memref<1x1xf32, #tpu.memory_space<vmem>>, vector<1x1xf32>
    %19 = vector.broadcast %18 : vector<1x1xf32> to vector<2x1xf32>
    %20 = arith.addf %17, %19 : vector<2x1xf32>
    %c0_12 = arith.constant 0 : index
    %c0_13 = arith.constant 0 : index
    %21 = vector.load %arg3[%c0_12, %c0_13] : memref<2x1xf32, #tpu.memory_space<vmem>>, vector<2x1xf32>
    tpu.vector_store %arg3[%c0_12, %c0_13], %20 {strides = array<i32>} : memref<2x1xf32, #tpu.memory_space<vmem>>, vector<2x1xf32>,
    return
  }
}

module attributes {stable_mosaic.version = 11 : i64} {
  func.func @_mm_kernel_single_k(%arg0: i32, %arg1: i32, %arg2: memref<2x512xbf16, #tpu.memory_space<vmem>>, %arg3: memref<512x32xbf16, #tpu.memory_space<vmem>>, %arg4: memref<1x32xf32, #tpu.memory_space<vmem>>, %arg5: memref<2x32xf32, #tpu.memory_space<vmem>>) attributes {dimension_semantics = [#tpu.dimension_semantics<parallel>, #tpu.dimension_semantics<parallel>], iteration_bounds = array<i64: 1, 1>, scalar_prefetch = 0 : i64, scratch_operands = 0 : i64, tpu.core_type = #tpu.core_type<tc>, window_params = [{transform_indices = @transform_0, window_bounds = array<i64: 2, 512>}, {transform_indices = @transform_1, window_bounds = array<i64: 512, 32>}, {transform_indices = @transform_2, window_bounds = array<i64: 1, 32>}, {transform_indices = @transform_3, window_bounds = array<i64: 2, 32>}]} {
    %c0 = arith.constant 0 : index
    %c0_0 = arith.constant 0 : index
    %0 = vector.load %arg2[%c0, %c0_0] : memref<2x512xbf16, #tpu.memory_space<vmem>>, vector<2x512xbf16>
    %c0_1 = arith.constant 0 : index
    %c0_2 = arith.constant 0 : index
    %1 = vector.load %arg3[%c0_1, %c0_2] : memref<512x32xbf16, #tpu.memory_space<vmem>>, vector<512x32xbf16>
    %cst = arith.constant dense<0.000000e+00> : vector<2x32xf32>
    %2 = tpu.matmul %0, %1, %cst {dimension_numbers = #tpu.dot_dimension_numbers<[1], [0], [0], [1], [0, 0, 1, 1], [], []>} : vector<2x512xbf16>, vector<512x32xbf16>, vector<2x32xf32> -> vector<2x32xf32>
    %c0_3 = arith.constant 0 : index
    %c0_4 = arith.constant 0 : index
    %3 = vector.load %arg4[%c0_3, %c0_4] : memref<1x32xf32, #tpu.memory_space<vmem>>, vector<1x32xf32>
    %4 = vector.broadcast %3 : vector<1x32xf32> to vector<2x32xf32>
    %5 = arith.addf %2, %4 : vector<2x32xf32>
    %c0_5 = arith.constant 0 : index
    %c0_6 = arith.constant 0 : index
    %6 = vector.load %arg5[%c0_5, %c0_6] : memref<2x32xf32, #tpu.memory_space<vmem>>, vector<2x32xf32>
    tpu.vector_store %arg5[%c0_5, %c0_6], %5 {strides = array<i32>} : memref<2x32xf32, #tpu.memory_space<vmem>>, vector<2x32xf32>,
    return
  }
  func.func @transform_0(%arg0: i32, %arg1: i32) -> (i32, i32) {
    %c0_i32 = arith.constant 0 : i32
    %c0_i32_0 = arith.constant 0 : i32
    return %arg1, %c0_i32 : i32, i32
  }
  func.func @transform_1(%arg0: i32, %arg1: i32) -> (i32, i32) {
    %c0_i32 = arith.constant 0 : i32
    %c0_i32_0 = arith.constant 0 : i32
    return %c0_i32, %arg0 : i32, i32
  }
  func.func @transform_2(%arg0: i32, %arg1: i32) -> (i32, i32) {
    %c0_i32 = arith.constant 0 : i32
    %c0_i32_0 = arith.constant 0 : i32
    return %c0_i32, %arg0 : i32, i32
  }
  func.func @transform_3(%arg0: i32, %arg1: i32) -> (i32, i32) {
    %c0_i32 = arith.constant 0 : i32
    return %arg1, %arg0 : i32, i32
  }
}

</mosaic_0001>

<bundles_post_ra>
// kernel: _forward_impl.13
= control target key start
LH: loop header
LB: loop body
LE: loop exit
PB: predicated region body
PF: predicated region fallthrough
CT: control target
= control target key end

     0   :  { %vm262_vm0 = vcmask 261120   ;;  %vm904_vm1 = vcmask 60416   ;;  %s1787_s1 = inlined_call_operand.vmem [shape: bf16[32,8], index: 1, kind: input, shape index: {}]   ;;  %s1788_s0 = inlined_call_operand.vmem [shape: bf16[512,32], index: 0, kind: input, shape index: {}]   ;;  %s1789_s2 = inlined_call_operand.vmem [shape: f32[1,8], index: 2, kind: input, shape index: {}]   ;;  %s1790_s3 = inlined_call_operand.vmem [shape: bf16[512,8], index: 3, kind: output, shape index: {}]  }
   0x1   :  { %v1274_v0 = vld [vmem:[%s1787_s1] sm:$0xff]   ;;  %v1275_v1 = vld [vmem:[%s1787_s1 + $0x8] sm:$0xff]   ;;  %v1280_v6 = vld [vmem:[%s1788_s0 + $0x10] sm:$0xff]  }
   0x2   :  { %1202 = vmatprep.subr.bf16.mxu0 %v1274_v0  ;;  %1270 = vmatprep.subr.bf16.mxu1 %v1274_v0  ;;  %v1276_v2 = vld [vmem:[%s1788_s0] sm:$0xff]   ;;  %v1278_v4 = vld [vmem:[%s1788_s0 + $0x8] sm:$0xff]   ;;  %v1281_v7 = vld [vmem:[%s1788_s0 + $0x90] sm:$0xff]  }
   0x3   :  { %1203 = vmatpush3.bf16.msra.mxu0 %v1274_v0  ;;  %1272 = vmatpush3.bf16.msra.mxu1 %v1274_v0  ;;  %v1277_v3 = vld [vmem:[%s1788_s0 + $0x80] sm:$0xff]   ;;  %v1279_v5 = vld [vmem:[%s1788_s0 + $0x88] sm:$0xff]   ;;  %v1282_v8 = vld [vmem:[%s1788_s0 + $0x18] sm:$0xff]  }
   0x4   :  { %1204 = vmatprep.subr.bf16.mxu0 %v1275_v1  ;;  %1271 = vmatprep.subr.bf16.mxu1 %v1275_v1  ;;  %v1283_v9 = vld [vmem:[%s1788_s0 + $0x98] sm:$0xff]   ;;  %v1284_v10 = vld [vmem:[%s1788_s0 + $0x20] sm:$0xff]   ;;  %v1286_v12 = vld [vmem:[%s1788_s0 + $0x28] sm:$0xff]  }
   0x5   :  { %1206 = vmatprep.mubr.msk.bf16.mxu0 %vm262_vm0, %v1276_v2  ;;  %1238 = vmatprep.mubr.msk.bf16.mxu1 %vm262_vm0, %v1277_v3  ;;  %v1285_v11 = vld [vmem:[%s1788_s0 + $0xa0] sm:$0xff]   ;;  %v1287_v13 = vld [vmem:[%s1788_s0 + $0xa8] sm:$0xff]   ;;  %v1288_v14 = vld [vmem:[%s1788_s0 + $0x30] sm:$0xff]  }
   0x6   :  { %v1289_v15 = vld [vmem:[%s1788_s0 + $0xb0] sm:$0xff]   ;;  %v1290_v16 = vld [vmem:[%s1788_s0 + $0x38] sm:$0xff]   ;;  %v1292_v18 = vld [vmem:[%s1788_s0 + $0x40] sm:$0xff]  }
   0x7   :  { %1205 = vmatpush3.bf16.msra.mxu0 %v1275_v1  ;;  %1273 = vmatpush3.bf16.msra.mxu1 %v1275_v1  ;;  %v1291_v17 = vld [vmem:[%s1788_s0 + $0xb8] sm:$0xff]   ;;  %v1293_v19 = vld [vmem:[%s1788_s0 + $0xc0] sm:$0xff]   ;;  %v1294_v20 = vld [vmem:[%s1788_s0 + $0x48] sm:$0xff]  }
   0x8   :  { %v1295_v21 = vld [vmem:[%s1788_s0 + $0xc8] sm:$0xff]   ;;  %v1296_v22 = vld [vmem:[%s1788_s0 + $0x50] sm:$0xff]   ;;  %v1298_v24 = vld [vmem:[%s1788_s0 + $0x58] sm:$0xff]  }
   0x9   :  { %v1297_v23 = vld [vmem:[%s1788_s0 + $0xd0] sm:$0xff]   ;;  %v1299_v25 = vld [vmem:[%s1788_s0 + $0xd8] sm:$0xff]   ;;  %v1300_v26 = vld [vmem:[%s1788_s0 + $0x60] sm:$0xff]  }
   0xa   :  { %1207 = vmatmul.mubr.msk.bf16.vlgmr.msra.gmra.mrb[0].mxu0 %vm262_vm0, %v1278_v4  ;;  %1239 = vmatmul.mubr.msk.bf16.vlgmr.msra.gmra.mrb[0].mxu1 %vm262_vm0, %v1279_v5  ;;  %v1301_v27 = vld [vmem:[%s1788_s0 + $0xe0] sm:$0xff]   ;;  %v1302_v28 = vld [vmem:[%s1788_s0 + $0x68] sm:$0xff]   ;;  %v1304_v30 = vld [vmem:[%s1788_s0 + $0x70] sm:$0xff]  }
   0xb   :  { %1210 = vmatprep.mubr.msk.bf16.mxu0 %vm262_vm0, %v1280_v6  ;;  %1242 = vmatprep.mubr.msk.bf16.mxu1 %vm262_vm0, %v1281_v7  ;;  %v1303_v29 = vld [vmem:[%s1788_s0 + $0xe8] sm:$0xff]   ;;  %v1305_v31 = vld [vmem:[%s1788_s0 + $0xf0] sm:$0xff]   ;;  %v1306_v32 = vld [vmem:[%s1788_s0 + $0x78] sm:$0xff]  }
   0xc   :  { %v1307_v33 = vld [vmem:[%s1788_s0 + $0xf8] sm:$0xff]   ;;  %v1465_v34 = vld [vmem:[%s1789_s2] ss:$0 sm:$0xff] }
  0x12   :  { %1211 = vmatmul.mubr.msk.bf16.gmra.mrb[4].mxu0 %vm262_vm0, %v1282_v8  ;;  %1243 = vmatmul.mubr.msk.bf16.gmra.mrb[4].mxu1 %vm262_vm0, %v1283_v9 }
  0x13   :  { %1214 = vmatprep.mubr.msk.bf16.mxu0 %vm262_vm0, %v1284_v10  ;;  %1246 = vmatprep.mubr.msk.bf16.mxu1 %vm262_vm0, %v1285_v11 }
  0x1a   :  { %1215 = vmatmul.mubr.msk.bf16.gmra.mrb[8].mxu0 %vm262_vm0, %v1286_v12  ;;  %1247 = vmatmul.mubr.msk.bf16.gmra.mrb[8].mxu1 %vm262_vm0, %v1287_v13 }
  0x1b   :  { %1218 = vmatprep.mubr.msk.bf16.mxu0 %vm262_vm0, %v1288_v14  ;;  %1250 = vmatprep.mubr.msk.bf16.mxu1 %vm262_vm0, %v1289_v15 }
  0x22   :  { %1219 = vmatmul.mubr.msk.bf16.gmra.mrb[12].mxu0 %vm262_vm0, %v1290_v16  ;;  %1251 = vmatmul.mubr.msk.bf16.gmra.mrb[12].mxu1 %vm262_vm0, %v1291_v17 }
  0x23   :  { %1222 = vmatprep.mubr.msk.bf16.mxu0 %vm262_vm0, %v1292_v18  ;;  %1254 = vmatprep.mubr.msk.bf16.mxu1 %vm262_vm0, %v1293_v19 }
  0x2a   :  { %1223 = vmatmul.mubr.msk.bf16.gmra.mrb[16].mxu0 %vm262_vm0, %v1294_v20  ;;  %1255 = vmatmul.mubr.msk.bf16.gmra.mrb[16].mxu1 %vm262_vm0, %v1295_v21 }
  0x2b   :  { %1226 = vmatprep.mubr.msk.bf16.mxu0 %vm262_vm0, %v1296_v22  ;;  %1258 = vmatprep.mubr.msk.bf16.mxu1 %vm262_vm0, %v1297_v23 }
  0x32   :  { %1227 = vmatmul.mubr.msk.bf16.gmra.mrb[20].mxu0 %vm262_vm0, %v1298_v24  ;;  %1259 = vmatmul.mubr.msk.bf16.gmra.mrb[20].mxu1 %vm262_vm0, %v1299_v25 }
  0x33   :  { %1230 = vmatprep.mubr.msk.bf16.mxu0 %vm262_vm0, %v1300_v26  ;;  %1262 = vmatprep.mubr.msk.bf16.mxu1 %vm262_vm0, %v1301_v27 }
  0x3a   :  { %1231 = vmatmul.mubr.msk.bf16.gmra.mrb[24].mxu0 %vm262_vm0, %v1302_v28  ;;  %1263 = vmatmul.mubr.msk.bf16.gmra.mrb[24].mxu1 %vm262_vm0, %v1303_v29 }
  0x3b   :  { %1234 = vmatprep.mubr.msk.bf16.mxu0 %vm262_vm0, %v1304_v30  ;;  %1266 = vmatprep.mubr.msk.bf16.mxu1 %vm262_vm0, %v1305_v31 }
  0x42   :  { %1235 = vmatmul.mubr.msk.bf16.gmra.mrb[28].mxu0 %vm262_vm0, %v1306_v32  ;;  %1267 = vmatmul.mubr.msk.bf16.gmra.mrb[28].mxu1 %vm262_vm0, %v1307_v33 }
  0xdd   :  { %v1208_v35 = vpop.f32.mrb[0].mxu0  ;;  %v1240_v36 = vpop.f32.mrb[0].mxu1 }
  0xde   :  { %v402_v37 = vadd.f32 %v1208_v35, %v1465_v34  ;;  %v530_v38 = vadd.f32 %v1240_v36, %v1465_v34  ;;  %v393_v39 = vpop.f32.mrb[1].mxu0  ;;  %v521_v40 = vpop.f32.mrb[1].mxu1 }
  0xdf   :  { %v394_v41 = vadd.f32 %v1465_v34, %v393_v39  ;;  %v522_v42 = vadd.f32 %v1465_v34, %v521_v40  ;;  %v1209_v43 = vpop.f32.mrb[2].mxu0  ;;  %v1241_v44 = vpop.f32.mrb[2].mxu1 }
  0xe0   :  { %v1106_v45 = vpack.c.bf16 %v402_v37, %v402_v37  ;;  %v1138_v46 = vpack.c.bf16 %v530_v38, %v530_v38  ;;  %v405_v47 = vadd.f32 %v1209_v43, %v1465_v34  ;;  %v533_v48 = vadd.f32 %v1241_v44, %v1465_v34  ;;  %v396_v49 = vpop.f32.mrb[3].mxu0  ;;  %v524_v50 = vpop.f32.mrb[3].mxu1 }
  0xe1   :  { %v1104_v51 = vpack.c.bf16 %v394_v41, %v394_v41  ;;  %v1136_v52 = vpack.c.bf16 %v522_v42, %v522_v42  ;;  %v397_v53 = vadd.f32 %v1465_v34, %v396_v49  ;;  %v525_v54 = vadd.f32 %v1465_v34, %v524_v50 }
  0xe2   :  { %907 = vst.msk [vmem:[%s1790_s3 + $0x8] sm:$0xf] %vm904_vm1, %v1106_v45  ;;  %939 = vst.msk [vmem:[%s1790_s3 + $0x88] sm:$0xf] %vm904_vm1, %v1138_v46  ;;  %v1107_v55 = vpack.c.bf16 %v405_v47, %v405_v47  ;;  %v1139_v56 = vpack.c.bf16 %v533_v48, %v533_v48 }
  0xe3   :  { %905 = vst.msk [vmem:[%s1790_s3] sm:$0xf] %vm904_vm1, %v1104_v51  ;;  %937 = vst.msk [vmem:[%s1790_s3 + $0x80] sm:$0xf] %vm904_vm1, %v1136_v52  ;;  %v1105_v57 = vpack.c.bf16 %v397_v53, %v397_v53  ;;  %v1137_v58 = vpack.c.bf16 %v525_v54, %v525_v54 }
  0xe4   :  { %908 = vst.msk [vmem:[%s1790_s3 + $0xc] sm:$0xf] %vm904_vm1, %v1107_v55  ;;  %940 = vst.msk [vmem:[%s1790_s3 + $0x8c] sm:$0xf] %vm904_vm1, %v1139_v56 }
  0xe5   :  { %906 = vst.msk [vmem:[%s1790_s3 + $0x4] sm:$0xf] %vm904_vm1, %v1105_v57  ;;  %938 = vst.msk [vmem:[%s1790_s3 + $0x84] sm:$0xf] %vm904_vm1, %v1137_v58  ;;  %v1212_v59 = vpop.f32.mrb[4].mxu0  ;;  %v1244_v60 = vpop.f32.mrb[4].mxu1 }
  0xe6   :  { %v418_v61 = vadd.f32 %v1212_v59, %v1465_v34  ;;  %v546_v62 = vadd.f32 %v1244_v60, %v1465_v34  ;;  %v409_v63 = vpop.f32.mrb[5].mxu0  ;;  %v537_v0 = vpop.f32.mrb[5].mxu1 }
  0xe7   :  { %v410_v1 = vadd.f32 %v1465_v34, %v409_v63  ;;  %v538_v2 = vadd.f32 %v1465_v34, %v537_v0  ;;  %v1213_v3 = vpop.f32.mrb[6].mxu0  ;;  %v1245_v4 = vpop.f32.mrb[6].mxu1 }
  0xe8   :  { %v1110_v5 = vpack.c.bf16 %v418_v61, %v418_v61  ;;  %v1142_v6 = vpack.c.bf16 %v546_v62, %v546_v62  ;;  %v421_v7 = vadd.f32 %v1213_v3, %v1465_v34  ;;  %v549_v8 = vadd.f32 %v1245_v4, %v1465_v34  ;;  %v412_v9 = vpop.f32.mrb[7].mxu0  ;;  %v540_v10 = vpop.f32.mrb[7].mxu1 }
  0xe9   :  { %v1108_v11 = vpack.c.bf16 %v410_v1, %v410_v1  ;;  %v1140_v12 = vpack.c.bf16 %v538_v2, %v538_v2  ;;  %v413_v13 = vadd.f32 %v1465_v34, %v412_v9  ;;  %v541_v14 = vadd.f32 %v1465_v34, %v540_v10 }
  0xea   :  { %911 = vst.msk [vmem:[%s1790_s3 + $0x18] sm:$0xf] %vm904_vm1, %v1110_v5  ;;  %943 = vst.msk [vmem:[%s1790_s3 + $0x98] sm:$0xf] %vm904_vm1, %v1142_v6  ;;  %v1111_v15 = vpack.c.bf16 %v421_v7, %v421_v7  ;;  %v1143_v16 = vpack.c.bf16 %v549_v8, %v549_v8 }
  0xeb   :  { %909 = vst.msk [vmem:[%s1790_s3 + $0x10] sm:$0xf] %vm904_vm1, %v1108_v11  ;;  %941 = vst.msk [vmem:[%s1790_s3 + $0x90] sm:$0xf] %vm904_vm1, %v1140_v12  ;;  %v1109_v17 = vpack.c.bf16 %v413_v13, %v413_v13  ;;  %v1141_v18 = vpack.c.bf16 %v541_v14, %v541_v14 }
  0xec   :  { %912 = vst.msk [vmem:[%s1790_s3 + $0x1c] sm:$0xf] %vm904_vm1, %v1111_v15  ;;  %944 = vst.msk [vmem:[%s1790_s3 + $0x9c] sm:$0xf] %vm904_vm1, %v1143_v16 }
  0xed   :  { %910 = vst.msk [vmem:[%s1790_s3 + $0x14] sm:$0xf] %vm904_vm1, %v1109_v17  ;;  %942 = vst.msk [vmem:[%s1790_s3 + $0x94] sm:$0xf] %vm904_vm1, %v1141_v18  ;;  %v1216_v19 = vpop.f32.mrb[8].mxu0  ;;  %v1248_v20 = vpop.f32.mrb[8].mxu1 }
  0xee   :  { %v434_v21 = vadd.f32 %v1216_v19, %v1465_v34  ;;  %v562_v22 = vadd.f32 %v1248_v20, %v1465_v34  ;;  %v425_v23 = vpop.f32.mrb[9].mxu0  ;;  %v553_v24 = vpop.f32.mrb[9].mxu1 }
  0xef   :  { %v426_v25 = vadd.f32 %v1465_v34, %v425_v23  ;;  %v554_v26 = vadd.f32 %v1465_v34, %v553_v24  ;;  %v1217_v27 = vpop.f32.mrb[10].mxu0  ;;  %v1249_v28 = vpop.f32.mrb[10].mxu1 }
  0xf0   :  { %v1114_v29 = vpack.c.bf16 %v434_v21, %v434_v21  ;;  %v1146_v30 = vpack.c.bf16 %v562_v22, %v562_v22  ;;  %v437_v31 = vadd.f32 %v1217_v27, %v1465_v34  ;;  %v565_v32 = vadd.f32 %v1249_v28, %v1465_v34  ;;  %v428_v33 = vpop.f32.mrb[11].mxu0  ;;  %v556_v35 = vpop.f32.mrb[11].mxu1 }
  0xf1   :  { %v1112_v36 = vpack.c.bf16 %v426_v25, %v426_v25  ;;  %v1144_v37 = vpack.c.bf16 %v554_v26, %v554_v26  ;;  %v429_v38 = vadd.f32 %v1465_v34, %v428_v33  ;;  %v557_v39 = vadd.f32 %v1465_v34, %v556_v35 }
  0xf2   :  { %915 = vst.msk [vmem:[%s1790_s3 + $0x28] sm:$0xf] %vm904_vm1, %v1114_v29  ;;  %947 = vst.msk [vmem:[%s1790_s3 + $0xa8] sm:$0xf] %vm904_vm1, %v1146_v30  ;;  %v1115_v40 = vpack.c.bf16 %v437_v31, %v437_v31  ;;  %v1147_v41 = vpack.c.bf16 %v565_v32, %v565_v32 }
  0xf3   :  { %913 = vst.msk [vmem:[%s1790_s3 + $0x20] sm:$0xf] %vm904_vm1, %v1112_v36  ;;  %945 = vst.msk [vmem:[%s1790_s3 + $0xa0] sm:$0xf] %vm904_vm1, %v1144_v37  ;;  %v1113_v42 = vpack.c.bf16 %v429_v38, %v429_v38  ;;  %v1145_v43 = vpack.c.bf16 %v557_v39, %v557_v39 }
  0xf4   :  { %916 = vst.msk [vmem:[%s1790_s3 + $0x2c] sm:$0xf] %vm904_vm1, %v1115_v40  ;;  %948 = vst.msk [vmem:[%s1790_s3 + $0xac] sm:$0xf] %vm904_vm1, %v1147_v41 }
  0xf5   :  { %914 = vst.msk [vmem:[%s1790_s3 + $0x24] sm:$0xf] %vm904_vm1, %v1113_v42  ;;  %946 = vst.msk [vmem:[%s1790_s3 + $0xa4] sm:$0xf] %vm904_vm1, %v1145_v43  ;;  %v1220_v44 = vpop.f32.mrb[12].mxu0  ;;  %v1252_v45 = vpop.f32.mrb[12].mxu1 }
  0xf6   :  { %v450_v46 = vadd.f32 %v1220_v44, %v1465_v34  ;;  %v578_v47 = vadd.f32 %v1252_v45, %v1465_v34  ;;  %v441_v48 = vpop.f32.mrb[13].mxu0  ;;  %v569_v49 = vpop.f32.mrb[13].mxu1 }
  0xf7   :  { %v442_v50 = vadd.f32 %v1465_v34, %v441_v48  ;;  %v570_v51 = vadd.f32 %v1465_v34, %v569_v49  ;;  %v1221_v52 = vpop.f32.mrb[14].mxu0  ;;  %v1253_v53 = vpop.f32.mrb[14].mxu1 }
  0xf8   :  { %v1118_v54 = vpack.c.bf16 %v450_v46, %v450_v46  ;;  %v1150_v55 = vpack.c.bf16 %v578_v47, %v578_v47  ;;  %v453_v56 = vadd.f32 %v1221_v52, %v1465_v34  ;;  %v581_v57 = vadd.f32 %v1253_v53, %v1465_v34  ;;  %v444_v58 = vpop.f32.mrb[15].mxu0  ;;  %v572_v59 = vpop.f32.mrb[15].mxu1 }
  0xf9   :  { %v1116_v60 = vpack.c.bf16 %v442_v50, %v442_v50  ;;  %v1148_v61 = vpack.c.bf16 %v570_v51, %v570_v51  ;;  %v445_v62 = vadd.f32 %v1465_v34, %v444_v58  ;;  %v573_v63 = vadd.f32 %v1465_v34, %v572_v59 }
  0xfa   :  { %919 = vst.msk [vmem:[%s1790_s3 + $0x38] sm:$0xf] %vm904_vm1, %v1118_v54  ;;  %951 = vst.msk [vmem:[%s1790_s3 + $0xb8] sm:$0xf] %vm904_vm1, %v1150_v55  ;;  %v1119_v0 = vpack.c.bf16 %v453_v56, %v453_v56  ;;  %v1151_v1 = vpack.c.bf16 %v581_v57, %v581_v57 }
  0xfb   :  { %917 = vst.msk [vmem:[%s1790_s3 + $0x30] sm:$0xf] %vm904_vm1, %v1116_v60  ;;  %949 = vst.msk [vmem:[%s1790_s3 + $0xb0] sm:$0xf] %vm904_vm1, %v1148_v61  ;;  %v1117_v2 = vpack.c.bf16 %v445_v62, %v445_v62  ;;  %v1149_v3 = vpack.c.bf16 %v573_v63, %v573_v63 }
  0xfc   :  { %920 = vst.msk [vmem:[%s1790_s3 + $0x3c] sm:$0xf] %vm904_vm1, %v1119_v0  ;;  %952 = vst.msk [vmem:[%s1790_s3 + $0xbc] sm:$0xf] %vm904_vm1, %v1151_v1 }
  0xfd   :  { %918 = vst.msk [vmem:[%s1790_s3 + $0x34] sm:$0xf] %vm904_vm1, %v1117_v2  ;;  %950 = vst.msk [vmem:[%s1790_s3 + $0xb4] sm:$0xf] %vm904_vm1, %v1149_v3  ;;  %v1224_v4 = vpop.f32.mrb[16].mxu0  ;;  %v1256_v5 = vpop.f32.mrb[16].mxu1 }
  0xfe   :  { %v466_v6 = vadd.f32 %v1224_v4, %v1465_v34  ;;  %v594_v7 = vadd.f32 %v1256_v5, %v1465_v34  ;;  %v457_v8 = vpop.f32.mrb[17].mxu0  ;;  %v585_v9 = vpop.f32.mrb[17].mxu1 }
  0xff   :  { %v458_v10 = vadd.f32 %v1465_v34, %v457_v8  ;;  %v586_v11 = vadd.f32 %v1465_v34, %v585_v9  ;;  %v1225_v12 = vpop.f32.mrb[18].mxu0  ;;  %v1257_v13 = vpop.f32.mrb[18].mxu1 }
 0x100   :  { %v1122_v14 = vpack.c.bf16 %v466_v6, %v466_v6  ;;  %v1154_v15 = vpack.c.bf16 %v594_v7, %v594_v7  ;;  %v469_v16 = vadd.f32 %v1225_v12, %v1465_v34  ;;  %v597_v17 = vadd.f32 %v1257_v13, %v1465_v34  ;;  %v460_v18 = vpop.f32.mrb[19].mxu0  ;;  %v588_v19 = vpop.f32.mrb[19].mxu1 }
 0x101   :  { %v1120_v20 = vpack.c.bf16 %v458_v10, %v458_v10  ;;  %v1152_v21 = vpack.c.bf16 %v586_v11, %v586_v11  ;;  %v461_v22 = vadd.f32 %v1465_v34, %v460_v18  ;;  %v589_v23 = vadd.f32 %v1465_v34, %v588_v19 }
 0x102   :  { %923 = vst.msk [vmem:[%s1790_s3 + $0x48] sm:$0xf] %vm904_vm1, %v1122_v14  ;;  %955 = vst.msk [vmem:[%s1790_s3 + $0xc8] sm:$0xf] %vm904_vm1, %v1154_v15  ;;  %v1123_v24 = vpack.c.bf16 %v469_v16, %v469_v16  ;;  %v1155_v25 = vpack.c.bf16 %v597_v17, %v597_v17 }
 0x103   :  { %921 = vst.msk [vmem:[%s1790_s3 + $0x40] sm:$0xf] %vm904_vm1, %v1120_v20  ;;  %953 = vst.msk [vmem:[%s1790_s3 + $0xc0] sm:$0xf] %vm904_vm1, %v1152_v21  ;;  %v1121_v26 = vpack.c.bf16 %v461_v22, %v461_v22  ;;  %v1153_v27 = vpack.c.bf16 %v589_v23, %v589_v23 }
 0x104   :  { %924 = vst.msk [vmem:[%s1790_s3 + $0x4c] sm:$0xf] %vm904_vm1, %v1123_v24  ;;  %956 = vst.msk [vmem:[%s1790_s3 + $0xcc] sm:$0xf] %vm904_vm1, %v1155_v25 }
 0x105   :  { %922 = vst.msk [vmem:[%s1790_s3 + $0x44] sm:$0xf] %vm904_vm1, %v1121_v26  ;;  %954 = vst.msk [vmem:[%s1790_s3 + $0xc4] sm:$0xf] %vm904_vm1, %v1153_v27  ;;  %v1228_v28 = vpop.f32.mrb[20].mxu0  ;;  %v1260_v29 = vpop.f32.mrb[20].mxu1 }
 0x106   :  { %v482_v30 = vadd.f32 %v1228_v28, %v1465_v34  ;;  %v610_v31 = vadd.f32 %v1260_v29, %v1465_v34  ;;  %v473_v32 = vpop.f32.mrb[21].mxu0  ;;  %v601_v33 = vpop.f32.mrb[21].mxu1 }
 0x107   :  { %v474_v35 = vadd.f32 %v1465_v34, %v473_v32  ;;  %v602_v36 = vadd.f32 %v1465_v34, %v601_v33  ;;  %v1229_v37 = vpop.f32.mrb[22].mxu0  ;;  %v1261_v38 = vpop.f32.mrb[22].mxu1 }
 0x108   :  { %v1126_v39 = vpack.c.bf16 %v482_v30, %v482_v30  ;;  %v1158_v40 = vpack.c.bf16 %v610_v31, %v610_v31  ;;  %v485_v41 = vadd.f32 %v1229_v37, %v1465_v34  ;;  %v613_v42 = vadd.f32 %v1261_v38, %v1465_v34  ;;  %v476_v43 = vpop.f32.mrb[23].mxu0  ;;  %v604_v44 = vpop.f32.mrb[23].mxu1 }
 0x109   :  { %v1124_v45 = vpack.c.bf16 %v474_v35, %v474_v35  ;;  %v1156_v46 = vpack.c.bf16 %v602_v36, %v602_v36  ;;  %v477_v47 = vadd.f32 %v1465_v34, %v476_v43  ;;  %v605_v48 = vadd.f32 %v1465_v34, %v604_v44 }
 0x10a   :  { %927 = vst.msk [vmem:[%s1790_s3 + $0x58] sm:$0xf] %vm904_vm1, %v1126_v39  ;;  %959 = vst.msk [vmem:[%s1790_s3 + $0xd8] sm:$0xf] %vm904_vm1, %v1158_v40  ;;  %v1127_v49 = vpack.c.bf16 %v485_v41, %v485_v41  ;;  %v1159_v50 = vpack.c.bf16 %v613_v42, %v613_v42 }
 0x10b   :  { %925 = vst.msk [vmem:[%s1790_s3 + $0x50] sm:$0xf] %vm904_vm1, %v1124_v45  ;;  %957 = vst.msk [vmem:[%s1790_s3 + $0xd0] sm:$0xf] %vm904_vm1, %v1156_v46  ;;  %v1125_v51 = vpack.c.bf16 %v477_v47, %v477_v47  ;;  %v1157_v52 = vpack.c.bf16 %v605_v48, %v605_v48 }
 0x10c   :  { %928 = vst.msk [vmem:[%s1790_s3 + $0x5c] sm:$0xf] %vm904_vm1, %v1127_v49  ;;  %960 = vst.msk [vmem:[%s1790_s3 + $0xdc] sm:$0xf] %vm904_vm1, %v1159_v50 }
 0x10d   :  { %926 = vst.msk [vmem:[%s1790_s3 + $0x54] sm:$0xf] %vm904_vm1, %v1125_v51  ;;  %958 = vst.msk [vmem:[%s1790_s3 + $0xd4] sm:$0xf] %vm904_vm1, %v1157_v52  ;;  %v1232_v53 = vpop.f32.mrb[24].mxu0  ;;  %v1264_v54 = vpop.f32.mrb[24].mxu1 }
 0x10e   :  { %v498_v55 = vadd.f32 %v1232_v53, %v1465_v34  ;;  %v626_v56 = vadd.f32 %v1264_v54, %v1465_v34  ;;  %v489_v57 = vpop.f32.mrb[25].mxu0  ;;  %v617_v58 = vpop.f32.mrb[25].mxu1 }
 0x10f   :  { %v490_v59 = vadd.f32 %v1465_v34, %v489_v57  ;;  %v618_v60 = vadd.f32 %v1465_v34, %v617_v58  ;;  %v1233_v61 = vpop.f32.mrb[26].mxu0  ;;  %v1265_v62 = vpop.f32.mrb[26].mxu1 }
 0x110   :  { %v1130_v63 = vpack.c.bf16 %v498_v55, %v498_v55  ;;  %v1162_v0 = vpack.c.bf16 %v626_v56, %v626_v56  ;;  %v501_v1 = vadd.f32 %v1233_v61, %v1465_v34  ;;  %v629_v2 = vadd.f32 %v1265_v62, %v1465_v34  ;;  %v492_v3 = vpop.f32.mrb[27].mxu0  ;;  %v620_v4 = vpop.f32.mrb[27].mxu1 }
 0x111   :  { %v1128_v5 = vpack.c.bf16 %v490_v59, %v490_v59  ;;  %v1160_v6 = vpack.c.bf16 %v618_v60, %v618_v60  ;;  %v493_v7 = vadd.f32 %v1465_v34, %v492_v3  ;;  %v621_v8 = vadd.f32 %v1465_v34, %v620_v4 }
 0x112   :  { %931 = vst.msk [vmem:[%s1790_s3 + $0x68] sm:$0xf] %vm904_vm1, %v1130_v63  ;;  %963 = vst.msk [vmem:[%s1790_s3 + $0xe8] sm:$0xf] %vm904_vm1, %v1162_v0  ;;  %v1131_v9 = vpack.c.bf16 %v501_v1, %v501_v1  ;;  %v1163_v10 = vpack.c.bf16 %v629_v2, %v629_v2 }
 0x113   :  { %929 = vst.msk [vmem:[%s1790_s3 + $0x60] sm:$0xf] %vm904_vm1, %v1128_v5  ;;  %961 = vst.msk [vmem:[%s1790_s3 + $0xe0] sm:$0xf] %vm904_vm1, %v1160_v6  ;;  %v1129_v11 = vpack.c.bf16 %v493_v7, %v493_v7  ;;  %v1161_v12 = vpack.c.bf16 %v621_v8, %v621_v8 }
 0x114   :  { %932 = vst.msk [vmem:[%s1790_s3 + $0x6c] sm:$0xf] %vm904_vm1, %v1131_v9  ;;  %964 = vst.msk [vmem:[%s1790_s3 + $0xec] sm:$0xf] %vm904_vm1, %v1163_v10 }
 0x115   :  { %930 = vst.msk [vmem:[%s1790_s3 + $0x64] sm:$0xf] %vm904_vm1, %v1129_v11  ;;  %962 = vst.msk [vmem:[%s1790_s3 + $0xe4] sm:$0xf] %vm904_vm1, %v1161_v12  ;;  %v1236_v13 = vpop.f32.mrb[28].mxu0  ;;  %v1268_v14 = vpop.f32.mrb[28].mxu1 }
 0x116   :  { %v514_v15 = vadd.f32 %v1236_v13, %v1465_v34  ;;  %v642_v16 = vadd.f32 %v1268_v14, %v1465_v34  ;;  %v505_v17 = vpop.f32.mrb[29].mxu0  ;;  %v633_v18 = vpop.f32.mrb[29].mxu1 }
 0x117   :  { %v506_v19 = vadd.f32 %v1465_v34, %v505_v17  ;;  %v634_v20 = vadd.f32 %v1465_v34, %v633_v18  ;;  %v1237_v21 = vpop.f32.mrb[30].mxu0  ;;  %v1269_v22 = vpop.f32.mrb[30].mxu1 }
 0x118   :  { %v1134_v23 = vpack.c.bf16 %v514_v15, %v514_v15  ;;  %v1166_v24 = vpack.c.bf16 %v642_v16, %v642_v16  ;;  %v517_v25 = vadd.f32 %v1237_v21, %v1465_v34  ;;  %v645_v26 = vadd.f32 %v1269_v22, %v1465_v34  ;;  %v508_v27 = vpop.f32.mrb[31].mxu0  ;;  %v636_v28 = vpop.f32.mrb[31].mxu1 }
 0x119   :  { %v1132_v29 = vpack.c.bf16 %v506_v19, %v506_v19  ;;  %v1164_v30 = vpack.c.bf16 %v634_v20, %v634_v20  ;;  %v509_v31 = vadd.f32 %v1465_v34, %v508_v27  ;;  %v637_v32 = vadd.f32 %v1465_v34, %v636_v28 }
 0x11a   :  { %935 = vst.msk [vmem:[%s1790_s3 + $0x78] sm:$0xf] %vm904_vm1, %v1134_v23  ;;  %967 = vst.msk [vmem:[%s1790_s3 + $0xf8] sm:$0xf] %vm904_vm1, %v1166_v24  ;;  %v1135_v33 = vpack.c.bf16 %v517_v25, %v517_v25  ;;  %v1167_v35 = vpack.c.bf16 %v645_v26, %v645_v26 }
 0x11b   :  { %933 = vst.msk [vmem:[%s1790_s3 + $0x70] sm:$0xf] %vm904_vm1, %v1132_v29  ;;  %965 = vst.msk [vmem:[%s1790_s3 + $0xf0] sm:$0xf] %vm904_vm1, %v1164_v30  ;;  %v1133_v34 = vpack.c.bf16 %v509_v31, %v509_v31  ;;  %v1165_v36 = vpack.c.bf16 %v637_v32, %v637_v32 }
 0x11c   :  { %936 = vst.msk [vmem:[%s1790_s3 + $0x7c] sm:$0xf] %vm904_vm1, %v1135_v33  ;;  %968 = vst.msk [vmem:[%s1790_s3 + $0xfc] sm:$0xf] %vm904_vm1, %v1167_v35 }
 0x11d   :  { %934 = vst.msk [vmem:[%s1790_s3 + $0x74] sm:$0xf] %vm904_vm1, %v1133_v34  ;;  %966 = vst.msk [vmem:[%s1790_s3 + $0xf4] sm:$0xf] %vm904_vm1, %v1165_v36 }

// kernel: _forward_impl.14
= control target key start
LH: loop header
LB: loop body
LE: loop exit
PB: predicated region body
PF: predicated region fallthrough
CT: control target
= control target key end

     0   :  { %vm282_vm0 = vcmask 588800   ;;  %vm379_vm1 = vcmask 1043456   ;;  %vm1120_vm2 = vcmask 60416   ;;  %s2114_s1 = inlined_call_operand.vmem [shape: bf16[72,8], index: 1, kind: input, shape index: {}]   ;;  %s2115_s0 = inlined_call_operand.vmem [shape: bf16[512,72], index: 0, kind: input, shape index: {}]   ;;  %s2116_s2 = inlined_call_operand.vmem [shape: f32[1,8], index: 2, kind: input, shape index: {}]   ;;  %s2117_s3 = inlined_call_operand.vmem [shape: bf16[512,8], index: 3, kind: output, shape index: {}]  }
   0x1   :  { %v1510_v0 = vld [vmem:[%s2114_s1] sm:$0xff]   ;;  %v1511_v1 = vld [vmem:[%s2114_s1 + $0x8] sm:$0xff]   ;;  %v1512_v2 = vld [vmem:[%s2114_s1 + $0x10] sm:$0xff]  }
   0x2   :  { %1424 = vmatprep.subr.bf16.mxu0 %v1510_v0  ;;  %1498 = vmatprep.subr.bf16.mxu1 %v1510_v0  ;;  %v1515_v3 = vld [vmem:[%s2115_s0] sm:$0xff]   ;;  %v1513_v5 = vld [vmem:[%s2114_s1 + $0x18] sm:$0xff]   ;;  %v1517_v8 = vld [vmem:[%s2115_s0 + $0x8] sm:$0xff]  }
   0x3   :  { %1425 = vmatpush3.bf16.msra.mxu0 %v1510_v0  ;;  %1503 = vmatpush3.bf16.msra.mxu1 %v1510_v0  ;;  %v1516_v4 = vld [vmem:[%s2115_s0 + $0x80] sm:$0xff]   ;;  %v1518_v9 = vld [vmem:[%s2115_s0 + $0x88] sm:$0xff]   ;;  %v1519_v10 = vld [vmem:[%s2115_s0 + $0x10] sm:$0xff]  }
   0x4   :  { %1426 = vmatprep.subr.bf16.mxu0 %v1511_v1  ;;  %1499 = vmatprep.subr.bf16.mxu1 %v1511_v1  ;;  %v1514_v6 = vld [vmem:[%s2114_s1 + $0x20] ss:$0 sps:$4 sm:$0xff]   ;;  %v1520_v11 = vld [vmem:[%s2115_s0 + $0x90] sm:$0xff]   ;;  %v1521_v12 = vld [vmem:[%s2115_s0 + $0x18] sm:$0xff]  }
   0x5   :  { %1434 = vmatprep.mubr.msk.bf16.mxu0 %vm282_vm0, %v1515_v3  ;;  %1466 = vmatprep.mubr.msk.bf16.mxu1 %vm282_vm0, %v1516_v4  ;;  %v381_v7 = vsel %vm379_vm1, %v1514_v6, 0  ;;  %v1522_v13 = vld [vmem:[%s2115_s0 + $0x98] sm:$0xff]   ;;  %v1523_v14 = vld [vmem:[%s2115_s0 + $0x20] sm:$0xff]   ;;  %v1525_v16 = vld [vmem:[%s2115_s0 + $0x28] sm:$0xff]  }
   0x6   :  { %v1524_v15 = vld [vmem:[%s2115_s0 + $0xa0] sm:$0xff]   ;;  %v1526_v17 = vld [vmem:[%s2115_s0 + $0xa8] sm:$0xff]   ;;  %v1527_v18 = vld [vmem:[%s2115_s0 + $0x30] sm:$0xff]  }
   0x7   :  { %1427 = vmatpush3.bf16.msra.mxu0 %v1511_v1  ;;  %1504 = vmatpush3.bf16.msra.mxu1 %v1511_v1  ;;  %v1528_v19 = vld [vmem:[%s2115_s0 + $0xb0] sm:$0xff]   ;;  %v1529_v20 = vld [vmem:[%s2115_s0 + $0x38] sm:$0xff]   ;;  %v1531_v22 = vld [vmem:[%s2115_s0 + $0x40] sm:$0xff]  }
   0x8   :  { %1428 = vmatprep.subr.bf16.mxu0 %v1512_v2  ;;  %1500 = vmatprep.subr.bf16.mxu1 %v1512_v2  ;;  %v1530_v21 = vld [vmem:[%s2115_s0 + $0xb8] sm:$0xff]   ;;  %v1532_v23 = vld [vmem:[%s2115_s0 + $0xc0] sm:$0xff]   ;;  %v1533_v24 = vld [vmem:[%s2115_s0 + $0x48] sm:$0xff]  }
   0x9   :  { %v1534_v25 = vld [vmem:[%s2115_s0 + $0xc8] sm:$0xff]   ;;  %v1535_v26 = vld [vmem:[%s2115_s0 + $0x50] sm:$0xff]   ;;  %v1537_v28 = vld [vmem:[%s2115_s0 + $0x58] sm:$0xff]  }
   0xa   :  { %v1536_v27 = vld [vmem:[%s2115_s0 + $0xd0] sm:$0xff]   ;;  %v1538_v29 = vld [vmem:[%s2115_s0 + $0xd8] sm:$0xff]   ;;  %v1539_v30 = vld [vmem:[%s2115_s0 + $0x60] sm:$0xff]  }
   0xb   :  { %1429 = vmatpush3.bf16.msra.mxu0 %v1512_v2  ;;  %1505 = vmatpush3.bf16.msra.mxu1 %v1512_v2  ;;  %v1540_v31 = vld [vmem:[%s2115_s0 + $0xe0] sm:$0xff]   ;;  %v1541_v32 = vld [vmem:[%s2115_s0 + $0x68] sm:$0xff]   ;;  %v1543_v34 = vld [vmem:[%s2115_s0 + $0x70] sm:$0xff]  }
   0xc   :  { %1430 = vmatprep.subr.bf16.mxu0 %v1513_v5  ;;  %1501 = vmatprep.subr.bf16.mxu1 %v1513_v5  ;;  %v1542_v33 = vld [vmem:[%s2115_s0 + $0xe8] sm:$0xff]   ;;  %v1544_v35 = vld [vmem:[%s2115_s0 + $0xf0] sm:$0xff]   ;;  %v1545_v36 = vld [vmem:[%s2115_s0 + $0x78] sm:$0xff]  }
   0xd   :  { %v1546_v37 = vld [vmem:[%s2115_s0 + $0xf8] sm:$0xff]   ;;  %v1713_v38 = vld [vmem:[%s2116_s2] ss:$0 sm:$0xff] }
   0xf   :  { %1431 = vmatpush3.bf16.msra.mxu0 %v1513_v5  ;;  %1506 = vmatpush3.bf16.msra.mxu1 %v1513_v5 }
  0x10   :  { %1508 = vmatprep.subr.msk.bf16.mxu0 %vm379_vm1, %v1514_v6  ;;  %1509 = vmatprep.subr.msk.bf16.mxu1 %vm379_vm1, %v1514_v6 }
  0x13   :  { %1433 = vmatpush3.bf16.msra.mxu0 %v381_v7  ;;  %1507 = vmatpush3.bf16.msra.mxu1 %v381_v7 }
  0x16   :  { %1435 = vmatmul.mubr.msk.bf16.vlgmr.msra.gmra.mrb[0].mxu0 %vm282_vm0, %v1517_v8  ;;  %1467 = vmatmul.mubr.msk.bf16.vlgmr.msra.gmra.mrb[0].mxu1 %vm282_vm0, %v1518_v9 }
  0x17   :  { %1438 = vmatprep.mubr.msk.bf16.mxu0 %vm282_vm0, %v1519_v10  ;;  %1470 = vmatprep.mubr.msk.bf16.mxu1 %vm282_vm0, %v1520_v11 }
  0x1e   :  { %1439 = vmatmul.mubr.msk.bf16.gmra.mrb[4].mxu0 %vm282_vm0, %v1521_v12  ;;  %1471 = vmatmul.mubr.msk.bf16.gmra.mrb[4].mxu1 %vm282_vm0, %v1522_v13 }
  0x1f   :  { %1442 = vmatprep.mubr.msk.bf16.mxu0 %vm282_vm0, %v1523_v14  ;;  %1474 = vmatprep.mubr.msk.bf16.mxu1 %vm282_vm0, %v1524_v15 }
  0x26   :  { %1443 = vmatmul.mubr.msk.bf16.gmra.mrb[8].mxu0 %vm282_vm0, %v1525_v16  ;;  %1475 = vmatmul.mubr.msk.bf16.gmra.mrb[8].mxu1 %vm282_vm0, %v1526_v17 }
  0x27   :  { %1446 = vmatprep.mubr.msk.bf16.mxu0 %vm282_vm0, %v1527_v18  ;;  %1478 = vmatprep.mubr.msk.bf16.mxu1 %vm282_vm0, %v1528_v19 }
  0x2e   :  { %1447 = vmatmul.mubr.msk.bf16.gmra.mrb[12].mxu0 %vm282_vm0, %v1529_v20  ;;  %1479 = vmatmul.mubr.msk.bf16.gmra.mrb[12].mxu1 %vm282_vm0, %v1530_v21 }
  0x2f   :  { %1450 = vmatprep.mubr.msk.bf16.mxu0 %vm282_vm0, %v1531_v22  ;;  %1482 = vmatprep.mubr.msk.bf16.mxu1 %vm282_vm0, %v1532_v23 }
  0x36   :  { %1451 = vmatmul.mubr.msk.bf16.gmra.mrb[16].mxu0 %vm282_vm0, %v1533_v24  ;;  %1483 = vmatmul.mubr.msk.bf16.gmra.mrb[16].mxu1 %vm282_vm0, %v1534_v25 }
  0x37   :  { %1454 = vmatprep.mubr.msk.bf16.mxu0 %vm282_vm0, %v1535_v26  ;;  %1486 = vmatprep.mubr.msk.bf16.mxu1 %vm282_vm0, %v1536_v27 }
  0x3e   :  { %1455 = vmatmul.mubr.msk.bf16.gmra.mrb[20].mxu0 %vm282_vm0, %v1537_v28  ;;  %1487 = vmatmul.mubr.msk.bf16.gmra.mrb[20].mxu1 %vm282_vm0, %v1538_v29 }
  0x3f   :  { %1458 = vmatprep.mubr.msk.bf16.mxu0 %vm282_vm0, %v1539_v30  ;;  %1490 = vmatprep.mubr.msk.bf16.mxu1 %vm282_vm0, %v1540_v31 }
  0x46   :  { %1459 = vmatmul.mubr.msk.bf16.gmra.mrb[24].mxu0 %vm282_vm0, %v1541_v32  ;;  %1491 = vmatmul.mubr.msk.bf16.gmra.mrb[24].mxu1 %vm282_vm0, %v1542_v33 }
  0x47   :  { %1462 = vmatprep.mubr.msk.bf16.mxu0 %vm282_vm0, %v1543_v34  ;;  %1494 = vmatprep.mubr.msk.bf16.mxu1 %vm282_vm0, %v1544_v35 }
  0x4e   :  { %1463 = vmatmul.mubr.msk.bf16.gmra.mrb[28].mxu0 %vm282_vm0, %v1545_v36  ;;  %1495 = vmatmul.mubr.msk.bf16.gmra.mrb[28].mxu1 %vm282_vm0, %v1546_v37 }
  0xe9   :  { %v1436_v39 = vpop.f32.mrb[0].mxu0  ;;  %v1468_v40 = vpop.f32.mrb[0].mxu1 }
  0xea   :  { %v426_v41 = vadd.f32 %v1436_v39, %v1713_v38  ;;  %v554_v42 = vadd.f32 %v1468_v40, %v1713_v38  ;;  %v417_v43 = vpop.f32.mrb[1].mxu0  ;;  %v545_v44 = vpop.f32.mrb[1].mxu1 }
  0xeb   :  { %v418_v45 = vadd.f32 %v1713_v38, %v417_v43  ;;  %v546_v46 = vadd.f32 %v1713_v38, %v545_v44  ;;  %v1437_v47 = vpop.f32.mrb[2].mxu0  ;;  %v1469_v48 = vpop.f32.mrb[2].mxu1 }
  0xec   :  { %vm674_vm3 = vcmp.ge.f32.partialorder %v426_v41, 0.0  ;;  %v738_v49 = vmul.f32 0.2, %v426_v41  ;;  %vm706_vm4 = vcmp.ge.f32.partialorder %v554_v42, 0.0  ;;  %v770_v50 = vmul.f32 0.2, %v554_v42 }
  0xed   :  { %vm672_vm5 = vcmp.ge.f32.partialorder %v418_v45, 0.0  ;;  %v736_v51 = vmul.f32 0.2, %v418_v45  ;;  %vm704_vm6 = vcmp.ge.f32.partialorder %v546_v46, 0.0  ;;  %v768_v52 = vmul.f32 0.2, %v546_v46 }
  0xee   :  { %v802_v53 = vsel %vm674_vm3, %v426_v41, %v738_v49  ;;  %v834_v54 = vsel %vm706_vm4, %v554_v42, %v770_v50  ;;  %v429_v55 = vadd.f32 %v1437_v47, %v1713_v38  ;;  %v557_v56 = vadd.f32 %v1469_v48, %v1713_v38  ;;  %v420_v57 = vpop.f32.mrb[3].mxu0  ;;  %v548_v58 = vpop.f32.mrb[3].mxu1 }
  0xef   :  { %v1325_v59 = vpack.c.bf16 %v802_v53, %v802_v53  ;;  %v1357_v60 = vpack.c.bf16 %v834_v54, %v834_v54  ;;  %v800_v61 = vsel %vm672_vm5, %v418_v45, %v736_v51  ;;  %v832_v62 = vsel %vm704_vm6, %v546_v46, %v768_v52 }
  0xf0   :  { %v1323_v63 = vpack.c.bf16 %v800_v61, %v800_v61  ;;  %v1355_v0 = vpack.c.bf16 %v832_v62, %v832_v62  ;;  %vm675_vm7 = vcmp.ge.f32.partialorder %v429_v55, 0.0  ;;  %v739_v1 = vmul.f32 0.2, %v429_v55 }
  0xf1   :  { %1123 = vst.msk [vmem:[%s2117_s3 + $0x8] sm:$0xf] %vm1120_vm2, %v1325_v59  ;;  %1155 = vst.msk [vmem:[%s2117_s3 + $0x88] sm:$0xf] %vm1120_vm2, %v1357_v60  ;;  %vm707_vm8 = vcmp.ge.f32.partialorder %v557_v56, 0.0  ;;  %v421_v3 = vadd.f32 %v1713_v38, %v420_v57  ;;  %v549_v4 = vadd.f32 %v1713_v38, %v548_v58  ;;  %v1440_v5 = vpop.f32.mrb[4].mxu0 }
  0xf2   :  { %v771_v2 = vmul.f32 0.2, %v557_v56  ;;  %v1472_v6 = vpop.f32.mrb[4].mxu1  ;;  %1121 = vst.msk [vmem:[%s2117_s3] sm:$0xf] %vm1120_vm2, %v1323_v63  ;;  %v803_v7 = vsel %vm675_vm7, %v429_v55, %v739_v1  ;;  %v442_v8 = vadd.f32 %v1440_v5, %v1713_v38  ;;  %v433_v10 = vpop.f32.mrb[5].mxu0 }
  0xf3   :  { %1153 = vst.msk [vmem:[%s2117_s3 + $0x80] sm:$0xf] %vm1120_vm2, %v1355_v0  ;;  %v570_v9 = vadd.f32 %v1472_v6, %v1713_v38  ;;  %v561_v11 = vpop.f32.mrb[5].mxu1  ;;  %v1326_v12 = vpack.c.bf16 %v803_v7, %v803_v7  ;;  %vm673_vm9 = vcmp.ge.f32.partialorder %v421_v3, 0.0  ;;  %v737_v14 = vmul.f32 0.2, %v421_v3 }
  0xf4   :  { %v835_v13 = vsel %vm707_vm8, %v557_v56, %v771_v2  ;;  %v1441_v15 = vpop.f32.mrb[6].mxu0  ;;  %v1473_v16 = vpop.f32.mrb[6].mxu1  ;;  %vm705_vm10 = vcmp.ge.f32.partialorder %v549_v4, 0.0  ;;  %v769_v18 = vmul.f32 0.2, %v549_v4  ;;  %vm678_vm11 = vcmp.ge.f32.partialorder %v442_v8, 0.0 }
  0xf5   :  { %v1358_v17 = vpack.c.bf16 %v835_v13, %v835_v13  ;;  %v436_v19 = vpop.f32.mrb[7].mxu0  ;;  %v564_v20 = vpop.f32.mrb[7].mxu1  ;;  %1124 = vst.msk [vmem:[%s2117_s3 + $0xc] sm:$0xf] %vm1120_vm2, %v1326_v12  ;;  %v801_v21 = vsel %vm673_vm9, %v421_v3, %v737_v14  ;;  %v742_v22 = vmul.f32 0.2, %v442_v8  ;;  %v434_v26 = vadd.f32 %v1713_v38, %v433_v10 }
  0xf6   :  { %vm710_vm12 = vcmp.ge.f32.partialorder %v570_v9, 0.0  ;;  %v774_v23 = vmul.f32 0.2, %v570_v9  ;;  %v1324_v24 = vpack.c.bf16 %v801_v21, %v801_v21  ;;  %v833_v25 = vsel %vm705_vm10, %v549_v4, %v769_v18 }
  0xf7   :  { %1156 = vst.msk [vmem:[%s2117_s3 + $0x8c] sm:$0xf] %vm1120_vm2, %v1358_v17  ;;  %v562_v27 = vadd.f32 %v1713_v38, %v561_v11  ;;  %v1356_v28 = vpack.c.bf16 %v833_v25, %v833_v25  ;;  %v806_v29 = vsel %vm678_vm11, %v442_v8, %v742_v22  ;;  %v445_v31 = vadd.f32 %v1441_v15, %v1713_v38 }
  0xf8   :  { %v838_v30 = vsel %vm710_vm12, %v570_v9, %v774_v23  ;;  %1122 = vst.msk [vmem:[%s2117_s3 + $0x4] sm:$0xf] %vm1120_vm2, %v1324_v24  ;;  %v1329_v32 = vpack.c.bf16 %v806_v29, %v806_v29  ;;  %vm676_vm13 = vcmp.ge.f32.partialorder %v434_v26, 0.0  ;;  %v740_v34 = vmul.f32 0.2, %v434_v26 }
  0xf9   :  { %v1361_v33 = vpack.c.bf16 %v838_v30, %v838_v30  ;;  %1154 = vst.msk [vmem:[%s2117_s3 + $0x84] sm:$0xf] %vm1120_vm2, %v1356_v28  ;;  %vm708_vm14 = vcmp.ge.f32.partialorder %v562_v27, 0.0  ;;  %v772_v35 = vmul.f32 0.2, %v562_v27  ;;  %vm679_vm15 = vcmp.ge.f32.partialorder %v445_v31, 0.0 }
  0xfa   :  { %v743_v36 = vmul.f32 0.2, %v445_v31  ;;  %1127 = vst.msk [vmem:[%s2117_s3 + $0x18] sm:$0xf] %vm1120_vm2, %v1329_v32  ;;  %v804_v37 = vsel %vm676_vm13, %v434_v26, %v740_v34  ;;  %v573_v39 = vadd.f32 %v1473_v16, %v1713_v38  ;;  %v437_v40 = vadd.f32 %v1713_v38, %v436_v19  ;;  %v1444_v42 = vpop.f32.mrb[8].mxu0  ;;  %v1476_v43 = vpop.f32.mrb[8].mxu1 }
  0xfb   :  { %1159 = vst.msk [vmem:[%s2117_s3 + $0x98] sm:$0xf] %vm1120_vm2, %v1361_v33  ;;  %v565_v41 = vadd.f32 %v1713_v38, %v564_v20  ;;  %v1327_v44 = vpack.c.bf16 %v804_v37, %v804_v37  ;;  %v836_v45 = vsel %vm708_vm14, %v562_v27, %v772_v35  ;;  %v458_v47 = vadd.f32 %v1444_v42, %v1713_v38  ;;  %v449_v48 = vpop.f32.mrb[9].mxu0  ;;  %v577_v49 = vpop.f32.mrb[9].mxu1 }
  0xfc   :  { %v807_v46 = vsel %vm679_vm15, %v445_v31, %v743_v36  ;;  %v1359_v50 = vpack.c.bf16 %v836_v45, %v836_v45  ;;  %vm711_vm0 = vcmp.ge.f32.partialorder %v573_v39, 0.0  ;;  %v775_v52 = vmul.f32 0.2, %v573_v39  ;;  %v1445_v53 = vpop.f32.mrb[10].mxu0  ;;  %v1477_v54 = vpop.f32.mrb[10].mxu1 }
  0xfd   :  { %v1330_v51 = vpack.c.bf16 %v807_v46, %v807_v46  ;;  %1125 = vst.msk [vmem:[%s2117_s3 + $0x10] sm:$0xf] %vm1120_vm2, %v1327_v44  ;;  %vm677_vm1 = vcmp.ge.f32.partialorder %v437_v40, 0.0  ;;  %v741_v55 = vmul.f32 0.2, %v437_v40  ;;  %vm709_vm3 = vcmp.ge.f32.partialorder %v565_v41, 0.0 }
  0xfe   :  { %v773_v56 = vmul.f32 0.2, %v565_v41  ;;  %1157 = vst.msk [vmem:[%s2117_s3 + $0x90] sm:$0xf] %vm1120_vm2, %v1359_v50  ;;  %v839_v57 = vsel %vm711_vm0, %v573_v39, %v775_v52  ;;  %vm682_vm4 = vcmp.ge.f32.partialorder %v458_v47, 0.0  ;;  %v586_v59 = vadd.f32 %v1476_v43, %v1713_v38  ;;  %v452_v60 = vpop.f32.mrb[11].mxu0 }
  0xff   :  { %1128 = vst.msk [vmem:[%s2117_s3 + $0x1c] sm:$0xf] %vm1120_vm2, %v1330_v51  ;;  %v746_v58 = vmul.f32 0.2, %v458_v47  ;;  %v580_v61 = vpop.f32.mrb[11].mxu1  ;;  %v1362_v62 = vpack.c.bf16 %v839_v57, %v839_v57  ;;  %v805_v63 = vsel %vm677_vm1, %v437_v40, %v741_v55  ;;  %v450_v1 = vadd.f32 %v1713_v38, %v449_v48 }
 0x100   :  { %v837_v0 = vsel %vm709_vm3, %v565_v41, %v773_v56  ;;  %v1328_v2 = vpack.c.bf16 %v805_v63, %v805_v63  ;;  %vm714_vm5 = vcmp.ge.f32.partialorder %v586_v59, 0.0  ;;  %v778_v6 = vmul.f32 0.2, %v586_v59 }
 0x101   :  { %v1360_v3 = vpack.c.bf16 %v837_v0, %v837_v0  ;;  %v810_v4 = vsel %vm682_vm4, %v458_v47, %v746_v58  ;;  %1160 = vst.msk [vmem:[%s2117_s3 + $0x9c] sm:$0xf] %vm1120_vm2, %v1362_v62  ;;  %vm680_vm6 = vcmp.ge.f32.partialorder %v450_v1, 0.0  ;;  %v744_v7 = vmul.f32 0.2, %v450_v1  ;;  %v1448_v8 = vpop.f32.mrb[12].mxu0 }
 0x102   :  { %v1333_v5 = vpack.c.bf16 %v810_v4, %v810_v4  ;;  %1126 = vst.msk [vmem:[%s2117_s3 + $0x14] sm:$0xf] %vm1120_vm2, %v1328_v2  ;;  %v578_v9 = vadd.f32 %v1713_v38, %v577_v49  ;;  %v461_v10 = vadd.f32 %v1445_v53, %v1713_v38  ;;  %v589_v11 = vadd.f32 %v1477_v54, %v1713_v38  ;;  %v1480_v13 = vpop.f32.mrb[12].mxu1  ;;  %v465_v14 = vpop.f32.mrb[13].mxu0 }
 0x103   :  { %1158 = vst.msk [vmem:[%s2117_s3 + $0x94] sm:$0xf] %vm1120_vm2, %v1360_v3  ;;  %v453_v12 = vadd.f32 %v1713_v38, %v452_v60  ;;  %v842_v15 = vsel %vm714_vm5, %v586_v59, %v778_v6  ;;  %v808_v16 = vsel %vm680_vm6, %v450_v1, %v744_v7  ;;  %v581_v17 = vadd.f32 %v1713_v38, %v580_v61  ;;  %v593_v19 = vpop.f32.mrb[13].mxu1  ;;  %v1449_v20 = vpop.f32.mrb[14].mxu0 }
 0x104   :  { %1131 = vst.msk [vmem:[%s2117_s3 + $0x28] sm:$0xf] %vm1120_vm2, %v1333_v5  ;;  %v474_v18 = vadd.f32 %v1448_v8, %v1713_v38  ;;  %v1365_v21 = vpack.c.bf16 %v842_v15, %v842_v15  ;;  %v1331_v22 = vpack.c.bf16 %v808_v16, %v808_v16  ;;  %vm712_vm7 = vcmp.ge.f32.partialorder %v578_v9, 0.0  ;;  %v1481_v24 = vpop.f32.mrb[14].mxu1  ;;  %v468_v25 = vpop.f32.mrb[15].mxu0 }
 0x105   :  { %v776_v23 = vmul.f32 0.2, %v578_v9  ;;  %vm683_vm8 = vcmp.ge.f32.partialorder %v461_v10, 0.0  ;;  %v747_v26 = vmul.f32 0.2, %v461_v10  ;;  %vm715_vm9 = vcmp.ge.f32.partialorder %v589_v11, 0.0 }
 0x106   :  { %v779_v27 = vmul.f32 0.2, %v589_v11  ;;  %1163 = vst.msk [vmem:[%s2117_s3 + $0xa8] sm:$0xf] %vm1120_vm2, %v1365_v21  ;;  %1129 = vst.msk [vmem:[%s2117_s3 + $0x20] sm:$0xf] %vm1120_vm2, %v1331_v22  ;;  %v602_v42 = vadd.f32 %v1480_v13, %v1713_v38  ;;  %v466_v46 = vadd.f32 %v1713_v38, %v465_v14  ;;  %v594_v47 = vadd.f32 %v1713_v38, %v593_v19 }
 0x107   :  { %v840_v28 = vsel %vm712_vm7, %v578_v9, %v776_v23  ;;  %vm681_vm10 = vcmp.ge.f32.partialorder %v453_v12, 0.0  ;;  %v745_v29 = vmul.f32 0.2, %v453_v12  ;;  %vm713_vm11 = vcmp.ge.f32.partialorder %v581_v17, 0.0  ;;  %v596_v30 = vpop.f32.mrb[15].mxu1 }
 0x108   :  { %v1363_v31 = vpack.c.bf16 %v840_v28, %v840_v28  ;;  %v811_v32 = vsel %vm683_vm8, %v461_v10, %v747_v26  ;;  %v843_v33 = vsel %vm715_vm9, %v589_v11, %v779_v27  ;;  %v777_v34 = vmul.f32 0.2, %v581_v17 }
 0x109   :  { %v1334_v35 = vpack.c.bf16 %v811_v32, %v811_v32  ;;  %v1366_v36 = vpack.c.bf16 %v843_v33, %v843_v33  ;;  %v809_v37 = vsel %vm681_vm10, %v453_v12, %v745_v29  ;;  %vm686_vm12 = vcmp.ge.f32.partialorder %v474_v18, 0.0  ;;  %v1452_v43 = vpop.f32.mrb[16].mxu0  ;;  %v1484_v44 = vpop.f32.mrb[16].mxu1 }
 0x10a   :  { %1161 = vst.msk [vmem:[%s2117_s3 + $0xa0] sm:$0xf] %vm1120_vm2, %v1363_v31  ;;  %v1332_v39 = vpack.c.bf16 %v809_v37, %v809_v37  ;;  %v841_v40 = vsel %vm713_vm11, %v581_v17, %v777_v34  ;;  %v750_v41 = vmul.f32 0.2, %v474_v18  ;;  %v477_v48 = vadd.f32 %v1449_v20, %v1713_v38  ;;  %v481_v49 = vpop.f32.mrb[17].mxu0  ;;  %v609_v50 = vpop.f32.mrb[17].mxu1 }
 0x10b   :  { %1132 = vst.msk [vmem:[%s2117_s3 + $0x2c] sm:$0xf] %vm1120_vm2, %v1334_v35  ;;  %1164 = vst.msk [vmem:[%s2117_s3 + $0xac] sm:$0xf] %vm1120_vm2, %v1366_v36  ;;  %v1364_v45 = vpack.c.bf16 %v841_v40, %v841_v40  ;;  %vm718_vm13 = vcmp.ge.f32.partialorder %v602_v42, 0.0  ;;  %v605_v53 = vadd.f32 %v1481_v24, %v1713_v38  ;;  %v1839_v54 = vpop.f32.mrb[18].mxu0  ;;  %v469_v5 = vadd.f32 %v1713_v38, %v468_v25 }
 0x10c   :  { %1130 = vst.msk [vmem:[%s2117_s3 + $0x24] sm:$0xf] %vm1120_vm2, %v1332_v39  ;;  %v814_v51 = vsel %vm686_vm12, %v474_v18, %v750_v41  ;;  %v782_v52 = vmul.f32 0.2, %v602_v42  ;;  %v1841_v55 = vpop.f32.mrb[18].mxu1  ;;  %vm684_vm14 = vcmp.ge.f32.partialorder %v466_v46, 0.0  ;;  %v597_v9 = vadd.f32 %v1713_v38, %v596_v30 }
 0x10d   :  { %1162 = vst.msk [vmem:[%s2117_s3 + $0xa4] sm:$0xf] %vm1120_vm2, %v1364_v45  ;;  %v1337_v56 = vpack.c.bf16 %v814_v51, %v814_v51  ;;  %v748_v57 = vmul.f32 0.2, %v466_v46  ;;  %vm716_vm15 = vcmp.ge.f32.partialorder %v594_v47, 0.0  ;;  %v1847_v58 = vpop.f32.mrb[19].mxu0  ;;  %v490_v12 = vadd.f32 %v1452_v43, %v1713_v38 }
 0x10e   :  { %v1849_v59 = vpop.f32.mrb[19].mxu1  ;;  %v846_v60 = vsel %vm718_vm13, %v602_v42, %v782_v52  ;;  %v780_v61 = vmul.f32 0.2, %v594_v47  ;;  %vm687_vm0 = vcmp.ge.f32.partialorder %v477_v48, 0.0  ;;  %v751_v62 = vmul.f32 0.2, %v477_v48 }
 0x10f   :  { %1135 = vst.msk [vmem:[%s2117_s3 + $0x38] sm:$0xf] %vm1120_vm2, %v1337_v56  ;;  %v1369_v63 = vpack.c.bf16 %v846_v60, %v846_v60  ;;  %v812_v0 = vsel %vm684_vm14, %v466_v46, %v748_v57  ;;  %vm719_vm1 = vcmp.ge.f32.partialorder %v605_v53, 0.0  ;;  %v783_v1 = vmul.f32 0.2, %v605_v53 }
 0x110   :  { %v1335_v2 = vpack.c.bf16 %v812_v0, %v812_v0  ;;  %v844_v3 = vsel %vm716_vm15, %v594_v47, %v780_v61  ;;  %v815_v4 = vsel %vm687_vm0, %v477_v48, %v751_v62  ;;  %vm685_vm3 = vcmp.ge.f32.partialorder %v469_v5, 0.0 }
 0x111   :  { %1167 = vst.msk [vmem:[%s2117_s3 + $0xb8] sm:$0xf] %vm1120_vm2, %v1369_v63  ;;  %v1367_v6 = vpack.c.bf16 %v844_v3, %v844_v3  ;;  %v1338_v7 = vpack.c.bf16 %v815_v4, %v815_v4  ;;  %v847_v8 = vsel %vm719_vm1, %v605_v53, %v783_v1  ;;  %v749_v11 = vmul.f32 0.2, %v469_v5  ;;  %v1456_v13 = vpop.f32.mrb[20].mxu0  ;;  %v1488_v14 = vpop.f32.mrb[20].mxu1 }
 0x112   :  { %1133 = vst.msk [vmem:[%s2117_s3 + $0x30] sm:$0xf] %vm1120_vm2, %v1335_v2  ;;  %v1370_v10 = vpack.c.bf16 %v847_v8, %v847_v8  ;;  %vm717_vm4 = vcmp.ge.f32.partialorder %v597_v9, 0.0  ;;  %v781_v15 = vmul.f32 0.2, %v597_v9  ;;  %v618_v16 = vadd.f32 %v1484_v44, %v1713_v38  ;;  %v497_v18 = vpop.f32.mrb[21].mxu0 }
 0x113   :  { %1165 = vst.msk [vmem:[%s2117_s3 + $0xb0] sm:$0xf] %vm1120_vm2, %v1367_v6  ;;  %1136 = vst.msk [vmem:[%s2117_s3 + $0x3c] sm:$0xf] %vm1120_vm2, %v1338_v7  ;;  %v482_v17 = vadd.f32 %v1713_v38, %v481_v49  ;;  %v1876_v19 = vpop.f32.mrb[21].mxu1  ;;  %v813_v20 = vsel %vm685_vm3, %v469_v5, %v749_v11  ;;  %vm690_vm5 = vcmp.ge.f32.partialorder %v490_v12, 0.0  ;;  %v610_v22 = vadd.f32 %v1713_v38, %v609_v50 }
 0x114   :  { %1168 = vst.msk [vmem:[%s2117_s3 + $0xbc] sm:$0xf] %vm1120_vm2, %v1370_v10  ;;  %v754_v21 = vmul.f32 0.2, %v490_v12  ;;  %v1883_v23 = vpop.f32.mrb[22].mxu0  ;;  %v1885_v24 = vpop.f32.mrb[22].mxu1  ;;  %v1336_v25 = vpack.c.bf16 %v813_v20, %v813_v20  ;;  %v845_v26 = vsel %vm717_vm4, %v597_v9, %v781_v15  ;;  %v493_v39 = vadd.f32 %v1839_v54, %v1713_v38 }
 0x115   :  { %vm722_vm6 = vcmp.ge.f32.partialorder %v618_v16, 0.0  ;;  %v786_v27 = vmul.f32 0.2, %v618_v16  ;;  %v1887_v28 = vpop.f32.mrb[23].mxu0  ;;  %v1889_v29 = vpop.f32.mrb[23].mxu1  ;;  %v1368_v30 = vpack.c.bf16 %v845_v26, %v845_v26  ;;  %vm688_vm7 = vcmp.ge.f32.partialorder %v482_v17, 0.0 }
 0x116   :  { %v818_v31 = vsel %vm690_vm5, %v490_v12, %v754_v21  ;;  %v752_v32 = vmul.f32 0.2, %v482_v17  ;;  %1134 = vst.msk [vmem:[%s2117_s3 + $0x34] sm:$0xf] %vm1120_vm2, %v1336_v25  ;;  %vm720_vm8 = vcmp.ge.f32.partialorder %v610_v22, 0.0  ;;  %v621_v40 = vadd.f32 %v1841_v55, %v1713_v38 }
 0x117   :  { %v1341_v33 = vpack.c.bf16 %v818_v31, %v818_v31  ;;  %v850_v34 = vsel %vm722_vm6, %v618_v16, %v786_v27  ;;  %v784_v35 = vmul.f32 0.2, %v610_v22  ;;  %1166 = vst.msk [vmem:[%s2117_s3 + $0xb4] sm:$0xf] %vm1120_vm2, %v1368_v30  ;;  %v485_v43 = vadd.f32 %v1713_v38, %v1847_v58 }
 0x118   :  { %v1373_v36 = vpack.c.bf16 %v850_v34, %v850_v34  ;;  %v816_v37 = vsel %vm688_vm7, %v482_v17, %v752_v32  ;;  %v613_v44 = vadd.f32 %v1713_v38, %v1849_v59  ;;  %vm691_vm9 = vcmp.ge.f32.partialorder %v493_v39, 0.0 }
 0x119   :  { %1139 = vst.msk [vmem:[%s2117_s3 + $0x48] sm:$0xf] %vm1120_vm2, %v1341_v33  ;;  %v1339_v41 = vpack.c.bf16 %v816_v37, %v816_v37  ;;  %v848_v42 = vsel %vm720_vm8, %v610_v22, %v784_v35  ;;  %v755_v46 = vmul.f32 0.2, %v493_v39  ;;  %vm723_vm10 = vcmp.ge.f32.partialorder %v621_v40, 0.0  ;;  %v1915_v47 = vpop.f32.mrb[24].mxu0 }
 0x11a   :  { %1171 = vst.msk [vmem:[%s2117_s3 + $0xc8] sm:$0xf] %vm1120_vm2, %v1373_v36  ;;  %v1371_v45 = vpack.c.bf16 %v848_v42, %v848_v42  ;;  %v1917_v48 = vpop.f32.mrb[24].mxu1  ;;  %v787_v49 = vmul.f32 0.2, %v621_v40  ;;  %vm689_vm11 = vcmp.ge.f32.partialorder %v485_v43, 0.0  ;;  %v506_v53 = vadd.f32 %v1456_v13, %v1713_v38 }
 0x11b   :  { %1137 = vst.msk [vmem:[%s2117_s3 + $0x40] sm:$0xf] %vm1120_vm2, %v1339_v41  ;;  %v753_v50 = vmul.f32 0.2, %v485_v43  ;;  %vm721_vm12 = vcmp.ge.f32.partialorder %v613_v44, 0.0  ;;  %v819_v51 = vsel %vm691_vm9, %v493_v39, %v755_v46  ;;  %v634_v54 = vadd.f32 %v1488_v14, %v1713_v38  ;;  %v1929_v55 = vpop.f32.mrb[25].mxu0 }
 0x11c   :  { %1169 = vst.msk [vmem:[%s2117_s3 + $0xc0] sm:$0xf] %vm1120_vm2, %v1371_v45  ;;  %v785_v52 = vmul.f32 0.2, %v613_v44  ;;  %v1931_v56 = vpop.f32.mrb[25].mxu1  ;;  %v1342_v57 = vpack.c.bf16 %v819_v51, %v819_v51  ;;  %v851_v58 = vsel %vm723_vm10, %v621_v40, %v787_v49  ;;  %v498_v60 = vadd.f32 %v1713_v38, %v497_v18  ;;  %v1935_v61 = vpop.f32.mrb[26].mxu0 }
 0x11d   :  { %v817_v59 = vsel %vm689_vm11, %v485_v43, %v753_v50  ;;  %v1937_v62 = vpop.f32.mrb[26].mxu1  ;;  %v1374_v63 = vpack.c.bf16 %v851_v58, %v851_v58  ;;  %vm694_vm13 = vcmp.ge.f32.partialorder %v506_v53, 0.0  ;;  %v1940_v2 = vpop.f32.mrb[27].mxu0  ;;  %v758_v5 = vmul.f32 0.2, %v506_v53 }
 0x11e   :  { %v1340_v0 = vpack.c.bf16 %v817_v59, %v817_v59  ;;  %v849_v1 = vsel %vm721_vm12, %v613_v44, %v785_v52  ;;  %v1942_v3 = vpop.f32.mrb[27].mxu1  ;;  %1140 = vst.msk [vmem:[%s2117_s3 + $0x4c] sm:$0xf] %vm1120_vm2, %v1342_v57  ;;  %vm726_vm14 = vcmp.ge.f32.partialorder %v634_v54, 0.0  ;;  %v790_v6 = vmul.f32 0.2, %v634_v54 }
 0x11f   :  { %v1372_v4 = vpack.c.bf16 %v849_v1, %v849_v1  ;;  %1172 = vst.msk [vmem:[%s2117_s3 + $0xcc] sm:$0xf] %vm1120_vm2, %v1374_v63  ;;  %vm692_vm15 = vcmp.ge.f32.partialorder %v498_v60, 0.0  ;;  %v756_v7 = vmul.f32 0.2, %v498_v60  ;;  %v626_v8 = vadd.f32 %v1713_v38, %v1876_v19 }
 0x120   :  { %1138 = vst.msk [vmem:[%s2117_s3 + $0x44] sm:$0xf] %vm1120_vm2, %v1340_v0  ;;  %v509_v9 = vadd.f32 %v1883_v23, %v1713_v38  ;;  %v822_v10 = vsel %vm694_vm13, %v506_v53, %v758_v5  ;;  %v854_v11 = vsel %vm726_vm14, %v634_v54, %v790_v6  ;;  %v637_v12 = vadd.f32 %v1885_v24, %v1713_v38 }
 0x121   :  { %1170 = vst.msk [vmem:[%s2117_s3 + $0xc4] sm:$0xf] %vm1120_vm2, %v1372_v4  ;;  %v501_v13 = vadd.f32 %v1713_v38, %v1887_v28  ;;  %v1345_v14 = vpack.c.bf16 %v822_v10, %v822_v10  ;;  %v1377_v15 = vpack.c.bf16 %v854_v11, %v854_v11  ;;  %v820_v16 = vsel %vm692_vm15, %v498_v60, %v756_v7  ;;  %v1968_v17 = vpop.f32.mrb[28].mxu0  ;;  %v1970_v18 = vpop.f32.mrb[28].mxu1 }
 0x122   :  { %vm724_vm0 = vcmp.ge.f32.partialorder %v626_v8, 0.0  ;;  %v1343_v19 = vpack.c.bf16 %v820_v16, %v820_v16  ;;  %v788_v20 = vmul.f32 0.2, %v626_v8  ;;  %vm695_vm1 = vcmp.ge.f32.partialorder %v509_v9, 0.0  ;;  %v1972_v22 = vpop.f32.mrb[29].mxu0  ;;  %v1990_v30 = vpop.f32.mrb[29].mxu1 }
 0x123   :  { %v759_v21 = vmul.f32 0.2, %v509_v9  ;;  %1143 = vst.msk [vmem:[%s2117_s3 + $0x58] sm:$0xf] %vm1120_vm2, %v1345_v14  ;;  %1175 = vst.msk [vmem:[%s2117_s3 + $0xd8] sm:$0xf] %vm1120_vm2, %v1377_v15  ;;  %v629_v27 = vadd.f32 %v1713_v38, %v1889_v29  ;;  %v522_v28 = vadd.f32 %v1915_v47, %v1713_v38  ;;  %v650_v43 = vadd.f32 %v1917_v48, %v1713_v38 }
 0x124   :  { %vm727_vm3 = vcmp.ge.f32.partialorder %v637_v12, 0.0  ;;  %v791_v23 = vmul.f32 0.2, %v637_v12  ;;  %vm693_vm4 = vcmp.ge.f32.partialorder %v501_v13, 0.0  ;;  %v757_v24 = vmul.f32 0.2, %v501_v13 }
 0x125   :  { %1141 = vst.msk [vmem:[%s2117_s3 + $0x50] sm:$0xf] %vm1120_vm2, %v1343_v19  ;;  %v852_v25 = vsel %vm724_vm0, %v626_v8, %v788_v20  ;;  %v823_v26 = vsel %vm695_vm1, %v509_v9, %v759_v21  ;;  %v1992_v31 = vpop.f32.mrb[30].mxu0  ;;  %v1994_v36 = vpop.f32.mrb[30].mxu1  ;;  %vm725_vm5 = vcmp.ge.f32.partialorder %v629_v27, 0.0  ;;  %vm698_vm6 = vcmp.ge.f32.partialorder %v522_v28, 0.0 }
 0x126   :  { %v1375_v32 = vpack.c.bf16 %v852_v25, %v852_v25  ;;  %v1346_v33 = vpack.c.bf16 %v823_v26, %v823_v26  ;;  %v855_v34 = vsel %vm727_vm3, %v637_v12, %v791_v23  ;;  %v821_v35 = vsel %vm693_vm4, %v501_v13, %v757_v24  ;;  %v1996_v37 = vpop.f32.mrb[31].mxu0  ;;  %v1998_v29 = vpop.f32.mrb[31].mxu1 }
 0x127   :  { %v1378_v39 = vpack.c.bf16 %v855_v34, %v855_v34  ;;  %v1344_v40 = vpack.c.bf16 %v821_v35, %v821_v35  ;;  %v789_v41 = vmul.f32 0.2, %v629_v27  ;;  %v762_v42 = vmul.f32 0.2, %v522_v28 }
 0x128   :  { %1173 = vst.msk [vmem:[%s2117_s3 + $0xd0] sm:$0xf] %vm1120_vm2, %v1375_v32  ;;  %1144 = vst.msk [vmem:[%s2117_s3 + $0x5c] sm:$0xf] %vm1120_vm2, %v1346_v33  ;;  %v514_v44 = vadd.f32 %v1713_v38, %v1929_v55  ;;  %v642_v46 = vadd.f32 %v1713_v38, %v1931_v56  ;;  %v525_v47 = vadd.f32 %v1935_v61, %v1713_v38  ;;  %vm730_vm7 = vcmp.ge.f32.partialorder %v650_v43, 0.0 }
 0x129   :  { %1176 = vst.msk [vmem:[%s2117_s3 + $0xdc] sm:$0xf] %vm1120_vm2, %v1378_v39  ;;  %1142 = vst.msk [vmem:[%s2117_s3 + $0x54] sm:$0xf] %vm1120_vm2, %v1344_v40  ;;  %v853_v45 = vsel %vm725_vm5, %v629_v27, %v789_v41  ;;  %v653_v48 = vadd.f32 %v1937_v62, %v1713_v38  ;;  %v826_v50 = vsel %vm698_vm6, %v522_v28, %v762_v42  ;;  %v794_v51 = vmul.f32 0.2, %v650_v43 }
 0x12a   :  { %v1376_v49 = vpack.c.bf16 %v853_v45, %v853_v45  ;;  %v1349_v52 = vpack.c.bf16 %v826_v50, %v826_v50  ;;  %vm696_vm8 = vcmp.ge.f32.partialorder %v514_v44, 0.0  ;;  %v760_v53 = vmul.f32 0.2, %v514_v44 }
 0x12b   :  { %vm728_vm9 = vcmp.ge.f32.partialorder %v642_v46, 0.0  ;;  %v858_v54 = vsel %vm730_vm7, %v650_v43, %v794_v51  ;;  %v792_v55 = vmul.f32 0.2, %v642_v46  ;;  %vm699_vm10 = vcmp.ge.f32.partialorder %v525_v47, 0.0 }
 0x12c   :  { %1174 = vst.msk [vmem:[%s2117_s3 + $0xd4] sm:$0xf] %vm1120_vm2, %v1376_v49  ;;  %v763_v56 = vmul.f32 0.2, %v525_v47  ;;  %1147 = vst.msk [vmem:[%s2117_s3 + $0x68] sm:$0xf] %vm1120_vm2, %v1349_v52  ;;  %v1381_v57 = vpack.c.bf16 %v858_v54, %v858_v54  ;;  %v824_v58 = vsel %vm696_vm8, %v514_v44, %v760_v53  ;;  %v517_v63 = vadd.f32 %v1713_v38, %v1940_v2 }
 0x12d   :  { %vm731_vm11 = vcmp.ge.f32.partialorder %v653_v48, 0.0  ;;  %v795_v59 = vmul.f32 0.2, %v653_v48  ;;  %v1347_v60 = vpack.c.bf16 %v824_v58, %v824_v58  ;;  %v856_v61 = vsel %vm728_vm9, %v642_v46, %v792_v55 }
 0x12e   :  { %v827_v62 = vsel %vm699_vm10, %v525_v47, %v763_v56  ;;  %1179 = vst.msk [vmem:[%s2117_s3 + $0xe8] sm:$0xf] %vm1120_vm2, %v1381_v57  ;;  %v1379_v0 = vpack.c.bf16 %v856_v61, %v856_v61  ;;  %v645_v5 = vadd.f32 %v1713_v38, %v1942_v3  ;;  %vm697_vm12 = vcmp.ge.f32.partialorder %v517_v63, 0.0 }
 0x12f   :  { %v1350_v1 = vpack.c.bf16 %v827_v62, %v827_v62  ;;  %v859_v4 = vsel %vm731_vm11, %v653_v48, %v795_v59  ;;  %1145 = vst.msk [vmem:[%s2117_s3 + $0x60] sm:$0xf] %vm1120_vm2, %v1347_v60  ;;  %v761_v7 = vmul.f32 0.2, %v517_v63  ;;  %v538_v2 = vadd.f32 %v1968_v17, %v1713_v38 }
 0x130   :  { %v1382_v6 = vpack.c.bf16 %v859_v4, %v859_v4  ;;  %1177 = vst.msk [vmem:[%s2117_s3 + $0xe0] sm:$0xf] %vm1120_vm2, %v1379_v0  ;;  %vm729_vm13 = vcmp.ge.f32.partialorder %v645_v5, 0.0  ;;  %v793_v3 = vmul.f32 0.2, %v645_v5  ;;  %v666_v8 = vadd.f32 %v1970_v18, %v1713_v38 }
 0x131   :  { %1148 = vst.msk [vmem:[%s2117_s3 + $0x6c] sm:$0xf] %vm1120_vm2, %v1350_v1  ;;  %v530_v9 = vadd.f32 %v1713_v38, %v1972_v22  ;;  %v825_v10 = vsel %vm697_vm12, %v517_v63, %v761_v7  ;;  %vm702_vm14 = vcmp.ge.f32.partialorder %v538_v2, 0.0  ;;  %v766_v11 = vmul.f32 0.2, %v538_v2 }
 0x132   :  { %1180 = vst.msk [vmem:[%s2117_s3 + $0xec] sm:$0xf] %vm1120_vm2, %v1382_v6  ;;  %v658_v12 = vadd.f32 %v1713_v38, %v1990_v30  ;;  %v1348_v13 = vpack.c.bf16 %v825_v10, %v825_v10  ;;  %v857_v14 = vsel %vm729_vm13, %v645_v5, %v793_v3  ;;  %vm734_vm15 = vcmp.ge.f32.partialorder %v666_v8, 0.0 }
 0x133   :  { %v798_v15 = vmul.f32 0.2, %v666_v8  ;;  %v1380_v16 = vpack.c.bf16 %v857_v14, %v857_v14  ;;  %v830_v17 = vsel %vm702_vm14, %v538_v2, %v766_v11  ;;  %vm700_vm0 = vcmp.ge.f32.partialorder %v530_v9, 0.0 }
 0x134   :  { %v764_v18 = vmul.f32 0.2, %v530_v9  ;;  %1146 = vst.msk [vmem:[%s2117_s3 + $0x64] sm:$0xf] %vm1120_vm2, %v1348_v13  ;;  %v1353_v19 = vpack.c.bf16 %v830_v17, %v830_v17  ;;  %vm732_vm1 = vcmp.ge.f32.partialorder %v658_v12, 0.0  ;;  %v541_v24 = vadd.f32 %v1992_v31, %v1713_v38 }
 0x135   :  { %v862_v20 = vsel %vm734_vm15, %v666_v8, %v798_v15  ;;  %v796_v21 = vmul.f32 0.2, %v658_v12  ;;  %1178 = vst.msk [vmem:[%s2117_s3 + $0xe4] sm:$0xf] %vm1120_vm2, %v1380_v16  ;;  %v669_v25 = vadd.f32 %v1994_v36, %v1713_v38  ;;  %v533_v28 = vadd.f32 %v1713_v38, %v1996_v37 }
 0x136   :  { %v1385_v22 = vpack.c.bf16 %v862_v20, %v862_v20  ;;  %v828_v23 = vsel %vm700_vm0, %v530_v9, %v764_v18  ;;  %1151 = vst.msk [vmem:[%s2117_s3 + $0x78] sm:$0xf] %vm1120_vm2, %v1353_v19  ;;  %v661_v30 = vadd.f32 %v1713_v38, %v1998_v29  ;;  %vm703_vm3 = vcmp.ge.f32.partialorder %v541_v24, 0.0 }
 0x137   :  { %v1351_v26 = vpack.c.bf16 %v828_v23, %v828_v23  ;;  %v860_v27 = vsel %vm732_vm1, %v658_v12, %v796_v21  ;;  %v767_v32 = vmul.f32 0.2, %v541_v24  ;;  %vm735_vm4 = vcmp.ge.f32.partialorder %v669_v25, 0.0 }
 0x138   :  { %1183 = vst.msk [vmem:[%s2117_s3 + $0xf8] sm:$0xf] %vm1120_vm2, %v1385_v22  ;;  %v1383_v31 = vpack.c.bf16 %v860_v27, %v860_v27  ;;  %v799_v33 = vmul.f32 0.2, %v669_v25  ;;  %vm701_vm5 = vcmp.ge.f32.partialorder %v533_v28, 0.0  ;;  %vm733_vm6 = vcmp.ge.f32.partialorder %v661_v30, 0.0 }
 0x139   :  { %1149 = vst.msk [vmem:[%s2117_s3 + $0x70] sm:$0xf] %vm1120_vm2, %v1351_v26  ;;  %v765_v34 = vmul.f32 0.2, %v533_v28  ;;  %v831_v38 = vsel %vm703_vm3, %v541_v24, %v767_v32  ;;  %v797_v35 = vmul.f32 0.2, %v661_v30 }
 0x13a   :  { %1181 = vst.msk [vmem:[%s2117_s3 + $0xf0] sm:$0xf] %vm1120_vm2, %v1383_v31  ;;  %v1354_v36 = vpack.c.bf16 %v831_v38, %v831_v38  ;;  %v863_v37 = vsel %vm735_vm4, %v669_v25, %v799_v33 }
 0x13b   :  { %v829_v39 = vsel %vm701_vm5, %v533_v28, %v765_v34  ;;  %v1386_v40 = vpack.c.bf16 %v863_v37, %v863_v37  ;;  %v861_v29 = vsel %vm733_vm6, %v661_v30, %v797_v35 }
 0x13c   :  { %v1352_v41 = vpack.c.bf16 %v829_v39, %v829_v39  ;;  %1152 = vst.msk [vmem:[%s2117_s3 + $0x7c] sm:$0xf] %vm1120_vm2, %v1354_v36  ;;  %v1384_v42 = vpack.c.bf16 %v861_v29, %v861_v29 }
 0x13d   :  { %1184 = vst.msk [vmem:[%s2117_s3 + $0xfc] sm:$0xf] %vm1120_vm2, %v1386_v40 }
 0x13e   :  { %1150 = vst.msk [vmem:[%s2117_s3 + $0x74] sm:$0xf] %vm1120_vm2, %v1352_v41  ;;  %1182 = vst.msk [vmem:[%s2117_s3 + $0xf4] sm:$0xf] %vm1120_vm2, %v1384_v42 }

// kernel: _forward_impl.15
= control target key start
LH: loop header
LB: loop body
LE: loop exit
PB: predicated region body
PF: predicated region fallthrough
CT: control target
= control target key end

     0   :  { %vm285_vm0 = vcmask 588800   ;;  %vm382_vm1 = vcmask 1043456   ;;  %vm1187_vm2 = vcmask 60416   ;;  %s2618_s1 = inlined_call_operand.vmem [shape: bf16[72,8], index: 1, kind: input, shape index: {}]   ;;  %s2619_s0 = inlined_call_operand.vmem [shape: bf16[512,72], index: 0, kind: input, shape index: {}]   ;;  %s2620_s3 = inlined_call_operand.vmem [shape: bf16[512,8], index: 3, kind: input, shape index: {}]   ;;  %s2621_s2 = inlined_call_operand.vmem [shape: f32[1,8], index: 2, kind: input, shape index: {}]   ;;  %s2622_s4 = inlined_call_operand.vmem [shape: bf16[512,8], index: 4, kind: output, shape index: {}]  }
   0x1   :  { %v1736_v0 = vld [vmem:[%s2618_s1] sm:$0xff]   ;;  %v1737_v1 = vld [vmem:[%s2618_s1 + $0x8] sm:$0xff]   ;;  %v1738_v2 = vld [vmem:[%s2618_s1 + $0x10] sm:$0xff]  }
   0x2   :  { %1650 = vmatprep.subr.bf16.mxu0 %v1736_v0  ;;  %1724 = vmatprep.subr.bf16.mxu1 %v1736_v0  ;;  %v1741_v3 = vld [vmem:[%s2619_s0] sm:$0xff]   ;;  %v1739_v5 = vld [vmem:[%s2618_s1 + $0x18] sm:$0xff]   ;;  %v1743_v8 = vld [vmem:[%s2619_s0 + $0x8] sm:$0xff]  }
   0x3   :  { %1651 = vmatpush3.bf16.msra.mxu0 %v1736_v0  ;;  %1729 = vmatpush3.bf16.msra.mxu1 %v1736_v0  ;;  %v1742_v4 = vld [vmem:[%s2619_s0 + $0x80] sm:$0xff]   ;;  %v1744_v9 = vld [vmem:[%s2619_s0 + $0x88] sm:$0xff]   ;;  %v1745_v10 = vld [vmem:[%s2619_s0 + $0x10] sm:$0xff]  }
   0x4   :  { %1652 = vmatprep.subr.bf16.mxu0 %v1737_v1  ;;  %1725 = vmatprep.subr.bf16.mxu1 %v1737_v1  ;;  %v1740_v6 = vld [vmem:[%s2618_s1 + $0x20] ss:$0 sps:$4 sm:$0xff]   ;;  %v1746_v11 = vld [vmem:[%s2619_s0 + $0x90] sm:$0xff]   ;;  %v1747_v12 = vld [vmem:[%s2619_s0 + $0x18] sm:$0xff]  }
   0x5   :  { %1660 = vmatprep.mubr.msk.bf16.mxu0 %vm285_vm0, %v1741_v3  ;;  %1692 = vmatprep.mubr.msk.bf16.mxu1 %vm285_vm0, %v1742_v4  ;;  %v384_v7 = vsel %vm382_vm1, %v1740_v6, 0  ;;  %v1748_v13 = vld [vmem:[%s2619_s0 + $0x98] sm:$0xff]   ;;  %v1749_v14 = vld [vmem:[%s2619_s0 + $0x20] sm:$0xff]   ;;  %v1751_v16 = vld [vmem:[%s2619_s0 + $0x28] sm:$0xff]  }
   0x6   :  { %v1750_v15 = vld [vmem:[%s2619_s0 + $0xa0] sm:$0xff]   ;;  %v1752_v17 = vld [vmem:[%s2619_s0 + $0xa8] sm:$0xff]   ;;  %v1753_v18 = vld [vmem:[%s2619_s0 + $0x30] sm:$0xff]  }
   0x7   :  { %1653 = vmatpush3.bf16.msra.mxu0 %v1737_v1  ;;  %1730 = vmatpush3.bf16.msra.mxu1 %v1737_v1  ;;  %v1754_v19 = vld [vmem:[%s2619_s0 + $0xb0] sm:$0xff]   ;;  %v1755_v20 = vld [vmem:[%s2619_s0 + $0x38] sm:$0xff]   ;;  %v1757_v22 = vld [vmem:[%s2619_s0 + $0x40] sm:$0xff]  }
   0x8   :  { %1654 = vmatprep.subr.bf16.mxu0 %v1738_v2  ;;  %1726 = vmatprep.subr.bf16.mxu1 %v1738_v2  ;;  %v1756_v21 = vld [vmem:[%s2619_s0 + $0xb8] sm:$0xff]   ;;  %v1758_v23 = vld [vmem:[%s2619_s0 + $0xc0] sm:$0xff]   ;;  %v1759_v24 = vld [vmem:[%s2619_s0 + $0x48] sm:$0xff]  }
   0x9   :  { %v1760_v25 = vld [vmem:[%s2619_s0 + $0xc8] sm:$0xff]   ;;  %v1761_v26 = vld [vmem:[%s2619_s0 + $0x50] sm:$0xff]   ;;  %v1763_v28 = vld [vmem:[%s2619_s0 + $0x58] sm:$0xff]  }
   0xa   :  { %v1762_v27 = vld [vmem:[%s2619_s0 + $0xd0] sm:$0xff]   ;;  %v1764_v29 = vld [vmem:[%s2619_s0 + $0xd8] sm:$0xff]   ;;  %v1765_v30 = vld [vmem:[%s2619_s0 + $0x60] sm:$0xff]  }
   0xb   :  { %1655 = vmatpush3.bf16.msra.mxu0 %v1738_v2  ;;  %1731 = vmatpush3.bf16.msra.mxu1 %v1738_v2  ;;  %v1766_v31 = vld [vmem:[%s2619_s0 + $0xe0] sm:$0xff]   ;;  %v1767_v32 = vld [vmem:[%s2619_s0 + $0x68] sm:$0xff]   ;;  %v1769_v34 = vld [vmem:[%s2619_s0 + $0x70] sm:$0xff]  }
   0xc   :  { %1656 = vmatprep.subr.bf16.mxu0 %v1739_v5  ;;  %1727 = vmatprep.subr.bf16.mxu1 %v1739_v5  ;;  %v1768_v33 = vld [vmem:[%s2619_s0 + $0xe8] sm:$0xff]   ;;  %v1770_v35 = vld [vmem:[%s2619_s0 + $0xf0] sm:$0xff]   ;;  %v1771_v36 = vld [vmem:[%s2619_s0 + $0x78] sm:$0xff]  }
   0xd   :  { %v1772_v37 = vld [vmem:[%s2619_s0 + $0xf8] sm:$0xff]   ;;  %v1944_v38 = vld [vmem:[%s2620_s3 + $0x8] sm:$0xff]   ;;  %v1954_v40 = vld [vmem:[%s2620_s3] sm:$0xff]  }
   0xe   :  { %v1949_v39 = vld [vmem:[%s2620_s3 + $0x88] sm:$0xff]   ;;  %v1959_v41 = vld [vmem:[%s2620_s3 + $0x80] sm:$0xff]   ;;  %v1964_v42 = vld [vmem:[%s2620_s3 + $0x18] sm:$0xff]   ;;  %v1460_v46 = vunpack.c.l.bf16 %v1944_v38  ;;  %v1456_v48 = vunpack.c.l.bf16 %v1954_v40  ;;  %v1461_v51 = vunpack.c.h.bf16 %v1944_v38  ;;  %v1457_v53 = vunpack.c.h.bf16 %v1954_v40 }
   0xf   :  { %1657 = vmatpush3.bf16.msra.mxu0 %v1739_v5  ;;  %1732 = vmatpush3.bf16.msra.mxu1 %v1739_v5  ;;  %v1969_v43 = vld [vmem:[%s2620_s3 + $0x98] sm:$0xff]   ;;  %v1974_v44 = vld [vmem:[%s2620_s3 + $0x10] sm:$0xff]   ;;  %v1524_v47 = vunpack.c.l.bf16 %v1949_v39  ;;  %v1520_v49 = vunpack.c.l.bf16 %v1959_v41  ;;  %v1988_v50 = vld [vmem:[%s2620_s3 + $0x28] sm:$0xff]   ;;  %v1525_v52 = vunpack.c.h.bf16 %v1949_v39  ;;  %v1521_v54 = vunpack.c.h.bf16 %v1959_v41 }
  0x10   :  { %1734 = vmatprep.subr.msk.bf16.mxu0 %vm382_vm1, %v1740_v6  ;;  %1735 = vmatprep.subr.msk.bf16.mxu1 %vm382_vm1, %v1740_v6  ;;  %v1979_v45 = vld [vmem:[%s2620_s3 + $0x90] sm:$0xff]   ;;  %v1997_v55 = vld [vmem:[%s2620_s3 + $0xa8] sm:$0xff]   ;;  %v2002_v56 = vld [vmem:[%s2620_s3 + $0x20] sm:$0xff]   ;;  %v1468_v58 = vunpack.c.l.bf16 %v1964_v42  ;;  %v1532_v59 = vunpack.c.l.bf16 %v1969_v43  ;;  %v1464_v60 = vunpack.c.l.bf16 %v1974_v44 }
  0x11   :  { %v2007_v57 = vld [vmem:[%s2620_s3 + $0xa0] sm:$0xff]   ;;  %v1528_v61 = vunpack.c.l.bf16 %v1979_v45  ;;  %v2016_v62 = vld [vmem:[%s2620_s3 + $0x38] sm:$0xff]   ;;  %v2030_v4 = vld [vmem:[%s2620_s3 + $0x30] sm:$0xff]  }
  0x12   :  { %v2025_v3 = vld [vmem:[%s2620_s3 + $0xb8] sm:$0xff]   ;;  %v2035_v5 = vld [vmem:[%s2620_s3 + $0xb0] sm:$0xff]  }
  0x13   :  { %1659 = vmatpush3.bf16.msra.mxu0 %v384_v7  ;;  %1733 = vmatpush3.bf16.msra.mxu1 %v384_v7 }
  0x16   :  { %1661 = vmatmul.mubr.msk.bf16.vlgmr.msra.gmra.mrb[0].mxu0 %vm285_vm0, %v1743_v8  ;;  %1693 = vmatmul.mubr.msk.bf16.vlgmr.msra.gmra.mrb[0].mxu1 %vm285_vm0, %v1744_v9 }
  0x17   :  { %1664 = vmatprep.mubr.msk.bf16.mxu0 %vm285_vm0, %v1745_v10  ;;  %1696 = vmatprep.mubr.msk.bf16.mxu1 %vm285_vm0, %v1746_v11  ;;  %v2044_v10 = vld [vmem:[%s2620_s3 + $0x48] sm:$0xff]  }
  0x1e   :  { %1665 = vmatmul.mubr.msk.bf16.gmra.mrb[4].mxu0 %vm285_vm0, %v1747_v12  ;;  %1697 = vmatmul.mubr.msk.bf16.gmra.mrb[4].mxu1 %vm285_vm0, %v1748_v13 }
  0x1f   :  { %1668 = vmatprep.mubr.msk.bf16.mxu0 %vm285_vm0, %v1749_v14  ;;  %1700 = vmatprep.mubr.msk.bf16.mxu1 %vm285_vm0, %v1750_v15  ;;  %v2053_v15 = vld [vmem:[%s2620_s3 + $0xc8] sm:$0xff]  }
  0x26   :  { %1669 = vmatmul.mubr.msk.bf16.gmra.mrb[8].mxu0 %vm285_vm0, %v1751_v16  ;;  %1701 = vmatmul.mubr.msk.bf16.gmra.mrb[8].mxu1 %vm285_vm0, %v1752_v17  ;;  %v2058_v16 = vld [vmem:[%s2620_s3 + $0x40] sm:$0xff]  }
  0x27   :  { %1672 = vmatprep.mubr.msk.bf16.mxu0 %vm285_vm0, %v1753_v18  ;;  %1704 = vmatprep.mubr.msk.bf16.mxu1 %vm285_vm0, %v1754_v19  ;;  %v2063_v17 = vld [vmem:[%s2620_s3 + $0xc0] sm:$0xff]  }
  0x2e   :  { %1673 = vmatmul.mubr.msk.bf16.gmra.mrb[12].mxu0 %vm285_vm0, %v1755_v20  ;;  %1705 = vmatmul.mubr.msk.bf16.gmra.mrb[12].mxu1 %vm285_vm0, %v1756_v21 }
  0x2f   :  { %1676 = vmatprep.mubr.msk.bf16.mxu0 %vm285_vm0, %v1757_v22  ;;  %1708 = vmatprep.mubr.msk.bf16.mxu1 %vm285_vm0, %v1758_v23  ;;  %v2072_v22 = vld [vmem:[%s2620_s3 + $0x58] sm:$0xff]   ;;  %v2152_v23 = vld [vmem:[%s2621_s2] ss:$0 sm:$0xff] }
  0x36   :  { %1677 = vmatmul.mubr.msk.bf16.gmra.mrb[16].mxu0 %vm285_vm0, %v1759_v24  ;;  %1709 = vmatmul.mubr.msk.bf16.gmra.mrb[16].mxu1 %vm285_vm0, %v1760_v25  ;;  %v2147_v25 = vld [vmem:[%s2620_s3 + $0xf0] sm:$0xff]  }
  0x37   :  { %1680 = vmatprep.mubr.msk.bf16.mxu0 %vm285_vm0, %v1761_v26  ;;  %1712 = vmatprep.mubr.msk.bf16.mxu1 %vm285_vm0, %v1762_v27  ;;  %v2081_v27 = vld [vmem:[%s2620_s3 + $0xd8] sm:$0xff]  }
  0x3e   :  { %1681 = vmatmul.mubr.msk.bf16.gmra.mrb[20].mxu0 %vm285_vm0, %v1763_v28  ;;  %1713 = vmatmul.mubr.msk.bf16.gmra.mrb[20].mxu1 %vm285_vm0, %v1764_v29  ;;  %v2086_v28 = vld [vmem:[%s2620_s3 + $0x50] sm:$0xff]  }
  0x3f   :  { %1684 = vmatprep.mubr.msk.bf16.mxu0 %vm285_vm0, %v1765_v30  ;;  %1716 = vmatprep.mubr.msk.bf16.mxu1 %vm285_vm0, %v1766_v31  ;;  %v2091_v29 = vld [vmem:[%s2620_s3 + $0xd0] sm:$0xff]   ;;  %v2109_v31 = vld [vmem:[%s2620_s3 + $0xe8] sm:$0xff]   ;;  %v2128_v30 = vld [vmem:[%s2620_s3 + $0x78] sm:$0xff]  }
  0x46   :  { %1685 = vmatmul.mubr.msk.bf16.gmra.mrb[24].mxu0 %vm285_vm0, %v1767_v32  ;;  %1717 = vmatmul.mubr.msk.bf16.gmra.mrb[24].mxu1 %vm285_vm0, %v1768_v33  ;;  %v2114_v33 = vld [vmem:[%s2620_s3 + $0x60] sm:$0xff]   ;;  %v2142_v32 = vld [vmem:[%s2620_s3 + $0x70] sm:$0xff]  }
  0x47   :  { %1688 = vmatprep.mubr.msk.bf16.mxu0 %vm285_vm0, %v1769_v34  ;;  %1720 = vmatprep.mubr.msk.bf16.mxu1 %vm285_vm0, %v1770_v35  ;;  %v2100_v34 = vld [vmem:[%s2620_s3 + $0x68] sm:$0xff]   ;;  %v2119_v35 = vld [vmem:[%s2620_s3 + $0xe0] sm:$0xff]  }
  0x4e   :  { %1689 = vmatmul.mubr.msk.bf16.gmra.mrb[28].mxu0 %vm285_vm0, %v1771_v36  ;;  %1721 = vmatmul.mubr.msk.bf16.gmra.mrb[28].mxu1 %vm285_vm0, %v1772_v37  ;;  %v2137_v37 = vld [vmem:[%s2620_s3 + $0xf8] sm:$0xff]  }
  0xe9   :  { %v1662_v13 = vpop.f32.mrb[0].mxu0  ;;  %v1694_v12 = vpop.f32.mrb[0].mxu1 }
  0xea   :  { %v429_v36 = vadd.f32 %v1662_v13, %v2152_v23  ;;  %v557_v20 = vadd.f32 %v1694_v12, %v2152_v23  ;;  %v420_v9 = vpop.f32.mrb[1].mxu0  ;;  %v548_v19 = vpop.f32.mrb[1].mxu1 }
  0xeb   :  { %v421_v8 = vadd.f32 %v2152_v23, %v420_v9  ;;  %v549_v11 = vadd.f32 %v2152_v23, %v548_v19  ;;  %v1663_v7 = vpop.f32.mrb[2].mxu0  ;;  %v1695_v21 = vpop.f32.mrb[2].mxu1 }
  0xec   :  { %v805_v6 = vmul.f32 0.1, %v429_v36  ;;  %v837_v13 = vmul.f32 0.1, %v557_v20  ;;  %v432_v12 = vadd.f32 %v1663_v7, %v2152_v23  ;;  %v560_v2 = vadd.f32 %v1695_v21, %v2152_v23  ;;  %v423_v1 = vpop.f32.mrb[3].mxu0  ;;  %v551_v18 = vpop.f32.mrb[3].mxu1 }
  0xed   :  { %v803_v0 = vmul.f32 0.1, %v421_v8  ;;  %v835_v14 = vmul.f32 0.1, %v549_v11  ;;  %v424_v9 = vadd.f32 %v2152_v23, %v423_v1  ;;  %v552_v19 = vadd.f32 %v2152_v23, %v551_v18 }
  0xee   :  { %v869_v63 = vadd.f32 %v1460_v46, %v805_v6  ;;  %v901_v26 = vadd.f32 %v1524_v47, %v837_v13  ;;  %v806_v36 = vmul.f32 0.1, %v432_v12  ;;  %v838_v20 = vmul.f32 0.1, %v560_v2 }
  0xef   :  { %v867_v7 = vadd.f32 %v1456_v48, %v803_v0  ;;  %v899_v21 = vadd.f32 %v1520_v49, %v835_v14  ;;  %v804_v8 = vmul.f32 0.1, %v424_v9  ;;  %v836_v11 = vmul.f32 0.1, %v552_v19 }
  0xf0   :  { %v1392_v24 = vpack.c.bf16 %v869_v63, %v869_v63  ;;  %v1424_v1 = vpack.c.bf16 %v901_v26, %v901_v26  ;;  %v870_v18 = vadd.f32 %v1461_v51, %v806_v36  ;;  %v902_v46 = vadd.f32 %v1525_v52, %v838_v20 }
  0xf1   :  { %v1390_v6 = vpack.c.bf16 %v867_v7, %v867_v7  ;;  %v1422_v47 = vpack.c.bf16 %v899_v21, %v899_v21  ;;  %v868_v2 = vadd.f32 %v1457_v53, %v804_v8  ;;  %v900_v48 = vadd.f32 %v1521_v54, %v836_v11  ;;  %v1666_v0 = vpop.f32.mrb[4].mxu0  ;;  %v1698_v49 = vpop.f32.mrb[4].mxu1 }
  0xf2   :  { %1190 = vst.msk [vmem:[%s2622_s4 + $0x8] sm:$0xf] %vm1187_vm2, %v1392_v24  ;;  %1222 = vst.msk [vmem:[%s2622_s4 + $0x88] sm:$0xf] %vm1187_vm2, %v1424_v1  ;;  %v1393_v38 = vpack.c.bf16 %v870_v18, %v870_v18  ;;  %v1425_v39 = vpack.c.bf16 %v902_v46, %v902_v46  ;;  %v445_v40 = vadd.f32 %v1666_v0, %v2152_v23  ;;  %v436_v41 = vpop.f32.mrb[5].mxu0  ;;  %v564_v52 = vpop.f32.mrb[5].mxu1 }
  0xf3   :  { %v573_v51 = vadd.f32 %v1698_v49, %v2152_v23  ;;  %1188 = vst.msk [vmem:[%s2622_s4] sm:$0xf] %vm1187_vm2, %v1390_v6  ;;  %1220 = vst.msk [vmem:[%s2622_s4 + $0x80] sm:$0xf] %vm1187_vm2, %v1422_v47  ;;  %v1391_v53 = vpack.c.bf16 %v868_v2, %v868_v2  ;;  %v1423_v54 = vpack.c.bf16 %v900_v48, %v900_v48  ;;  %v1667_v24 = vpop.f32.mrb[6].mxu0  ;;  %v1699_v26 = vpop.f32.mrb[6].mxu1 }
  0xf4   :  { %v437_v63 = vadd.f32 %v2152_v23, %v436_v41  ;;  %v565_v14 = vadd.f32 %v2152_v23, %v564_v52  ;;  %1191 = vst.msk [vmem:[%s2622_s4 + $0xc] sm:$0xf] %vm1187_vm2, %v1393_v38  ;;  %1223 = vst.msk [vmem:[%s2622_s4 + $0x8c] sm:$0xf] %vm1187_vm2, %v1425_v39  ;;  %v809_v13 = vmul.f32 0.1, %v445_v40  ;;  %v448_v9 = vadd.f32 %v1667_v24, %v2152_v23 }
  0xf5   :  { %v841_v12 = vmul.f32 0.1, %v573_v51  ;;  %v576_v19 = vadd.f32 %v1699_v26, %v2152_v23  ;;  %v439_v36 = vpop.f32.mrb[7].mxu0  ;;  %v567_v20 = vpop.f32.mrb[7].mxu1  ;;  %1189 = vst.msk [vmem:[%s2622_s4 + $0x4] sm:$0xf] %vm1187_vm2, %v1391_v53  ;;  %v2623_v39 = vunpack.c.h.bf16 %v1964_v42  ;;  %v2625_v52 = vunpack.c.h.bf16 %v1974_v44 }
  0xf6   :  { %1221 = vst.msk [vmem:[%s2622_s4 + $0x84] sm:$0xf] %vm1187_vm2, %v1423_v54  ;;  %v807_v7 = vmul.f32 0.1, %v437_v63  ;;  %v839_v21 = vmul.f32 0.1, %v565_v14  ;;  %v440_v8 = vadd.f32 %v2152_v23, %v439_v36  ;;  %v568_v11 = vadd.f32 %v2152_v23, %v567_v20 }
  0xf7   :  { %v873_v1 = vadd.f32 %v1468_v58, %v809_v13  ;;  %v905_v18 = vadd.f32 %v1532_v59, %v841_v12  ;;  %v810_v46 = vmul.f32 0.1, %v448_v9  ;;  %v842_v6 = vmul.f32 0.1, %v576_v19 }
  0xf8   :  { %v871_v47 = vadd.f32 %v1464_v60, %v807_v7  ;;  %v903_v2 = vadd.f32 %v1528_v61, %v839_v21  ;;  %v808_v48 = vmul.f32 0.1, %v440_v8  ;;  %v840_v0 = vmul.f32 0.1, %v568_v11 }
  0xf9   :  { %v1396_v49 = vpack.c.bf16 %v873_v1, %v873_v1  ;;  %v1428_v38 = vpack.c.bf16 %v905_v18, %v905_v18  ;;  %v874_v40 = vadd.f32 %v2623_v39, %v810_v46  ;;  %v2624_v58 = vunpack.c.h.bf16 %v1969_v43  ;;  %v1670_v63 = vpop.f32.mrb[8].mxu0  ;;  %v1702_v61 = vpop.f32.mrb[8].mxu1 }
  0xfa   :  { %v1394_v41 = vpack.c.bf16 %v871_v47, %v871_v47  ;;  %v1426_v59 = vpack.c.bf16 %v903_v2, %v903_v2  ;;  %v872_v53 = vadd.f32 %v2625_v52, %v808_v48  ;;  %v2626_v60 = vunpack.c.h.bf16 %v1979_v45  ;;  %v452_v45 = vpop.f32.mrb[9].mxu0  ;;  %v580_v24 = vpop.f32.mrb[9].mxu1 }
  0xfb   :  { %v906_v51 = vadd.f32 %v2624_v58, %v842_v6  ;;  %1194 = vst.msk [vmem:[%s2622_s4 + $0x18] sm:$0xf] %vm1187_vm2, %v1396_v49  ;;  %1226 = vst.msk [vmem:[%s2622_s4 + $0x98] sm:$0xf] %vm1187_vm2, %v1428_v38  ;;  %v1397_v42 = vpack.c.bf16 %v874_v40, %v874_v40  ;;  %v461_v44 = vadd.f32 %v1670_v63, %v2152_v23  ;;  %v1671_v19 = vpop.f32.mrb[10].mxu0  ;;  %v1703_v36 = vpop.f32.mrb[10].mxu1  ;;  %v2627_v2 = vunpack.c.l.bf16 %v1988_v50 }
  0xfc   :  { %v904_v54 = vadd.f32 %v2626_v60, %v840_v0  ;;  %v589_v14 = vadd.f32 %v1702_v61, %v2152_v23  ;;  %1192 = vst.msk [vmem:[%s2622_s4 + $0x10] sm:$0xf] %vm1187_vm2, %v1394_v41  ;;  %1224 = vst.msk [vmem:[%s2622_s4 + $0x90] sm:$0xf] %vm1187_vm2, %v1426_v59  ;;  %v1395_v26 = vpack.c.bf16 %v872_v53, %v872_v53  ;;  %v455_v11 = vpop.f32.mrb[11].mxu0  ;;  %v583_v1 = vpop.f32.mrb[11].mxu1  ;;  %v2628_v0 = vunpack.c.l.bf16 %v1997_v55 }
  0xfd   :  { %v1429_v43 = vpack.c.bf16 %v906_v51, %v906_v51  ;;  %v453_v12 = vadd.f32 %v2152_v23, %v452_v45  ;;  %v581_v9 = vadd.f32 %v2152_v23, %v580_v24  ;;  %1195 = vst.msk [vmem:[%s2622_s4 + $0x1c] sm:$0xf] %vm1187_vm2, %v1397_v42  ;;  %v813_v20 = vmul.f32 0.1, %v461_v44 }
  0xfe   :  { %v1427_v13 = vpack.c.bf16 %v904_v54, %v904_v54  ;;  %v845_v7 = vmul.f32 0.1, %v589_v14  ;;  %v464_v21 = vadd.f32 %v1671_v19, %v2152_v23  ;;  %v592_v8 = vadd.f32 %v1703_v36, %v2152_v23  ;;  %1193 = vst.msk [vmem:[%s2622_s4 + $0x14] sm:$0xf] %vm1187_vm2, %v1395_v26 }
  0xff   :  { %1227 = vst.msk [vmem:[%s2622_s4 + $0x9c] sm:$0xf] %vm1187_vm2, %v1429_v43  ;;  %v811_v18 = vmul.f32 0.1, %v453_v12  ;;  %v843_v46 = vmul.f32 0.1, %v581_v9  ;;  %v456_v6 = vadd.f32 %v2152_v23, %v455_v11  ;;  %v584_v47 = vadd.f32 %v2152_v23, %v583_v1 }
 0x100   :  { %1225 = vst.msk [vmem:[%s2622_s4 + $0x94] sm:$0xf] %vm1187_vm2, %v1427_v13  ;;  %v877_v48 = vadd.f32 %v2627_v2, %v813_v20  ;;  %v909_v49 = vadd.f32 %v2628_v0, %v845_v7  ;;  %v814_v38 = vmul.f32 0.1, %v464_v21  ;;  %v846_v39 = vmul.f32 0.1, %v592_v8 }
 0x101   :  { %v2629_v40 = vunpack.c.l.bf16 %v2002_v56  ;;  %v2630_v51 = vunpack.c.l.bf16 %v2007_v57  ;;  %v812_v59 = vmul.f32 0.1, %v456_v6  ;;  %v844_v52 = vmul.f32 0.1, %v584_v47  ;;  %v1674_v13 = vpop.f32.mrb[12].mxu0  ;;  %v1706_v12 = vpop.f32.mrb[12].mxu1 }
 0x102   :  { %v1400_v53 = vpack.c.bf16 %v877_v48, %v877_v48  ;;  %v1432_v60 = vpack.c.bf16 %v909_v49, %v909_v49  ;;  %v2631_v54 = vunpack.c.h.bf16 %v1988_v50  ;;  %v2632_v61 = vunpack.c.h.bf16 %v1997_v55  ;;  %v596_v19 = vpop.f32.mrb[13].mxu1 }
 0x103   :  { %v875_v58 = vadd.f32 %v2629_v40, %v811_v18  ;;  %v907_v41 = vadd.f32 %v2630_v51, %v843_v46  ;;  %v2633_v14 = vunpack.c.h.bf16 %v2002_v56  ;;  %v2634_v24 = vunpack.c.h.bf16 %v2007_v57  ;;  %v468_v57 = vpop.f32.mrb[13].mxu0  ;;  %v1707_v11 = vpop.f32.mrb[14].mxu1 }
 0x104   :  { %v878_v63 = vadd.f32 %v2631_v54, %v814_v38  ;;  %v910_v42 = vadd.f32 %v2632_v61, %v846_v39  ;;  %1198 = vst.msk [vmem:[%s2622_s4 + $0x28] sm:$0xf] %vm1187_vm2, %v1400_v53  ;;  %1230 = vst.msk [vmem:[%s2622_s4 + $0xa8] sm:$0xf] %vm1187_vm2, %v1432_v60  ;;  %v477_v56 = vadd.f32 %v1674_v13, %v2152_v23  ;;  %v1675_v8 = vpop.f32.mrb[14].mxu0  ;;  %v599_v2 = vpop.f32.mrb[15].mxu1  ;;  %v2635_v39 = vunpack.c.l.bf16 %v2016_v62 }
 0x105   :  { %v1398_v43 = vpack.c.bf16 %v875_v58, %v875_v58  ;;  %v1430_v44 = vpack.c.bf16 %v907_v41, %v907_v41  ;;  %v876_v45 = vadd.f32 %v2633_v14, %v812_v59  ;;  %v908_v26 = vadd.f32 %v2634_v24, %v844_v52  ;;  %v471_v47 = vpop.f32.mrb[15].mxu0 }
 0x106   :  { %v1401_v50 = vpack.c.bf16 %v878_v63, %v878_v63  ;;  %v1433_v55 = vpack.c.bf16 %v910_v42, %v910_v42  ;;  %v605_v9 = vadd.f32 %v1706_v12, %v2152_v23  ;;  %v469_v7 = vadd.f32 %v2152_v23, %v468_v57 }
 0x107   :  { %1196 = vst.msk [vmem:[%s2622_s4 + $0x20] sm:$0xf] %vm1187_vm2, %v1398_v43  ;;  %1228 = vst.msk [vmem:[%s2622_s4 + $0xa0] sm:$0xf] %vm1187_vm2, %v1430_v44  ;;  %v1399_v36 = vpack.c.bf16 %v876_v45, %v876_v45  ;;  %v1431_v20 = vpack.c.bf16 %v908_v26, %v908_v26  ;;  %v597_v21 = vadd.f32 %v2152_v23, %v596_v19  ;;  %v817_v1 = vmul.f32 0.1, %v477_v56 }
 0x108   :  { %1199 = vst.msk [vmem:[%s2622_s4 + $0x2c] sm:$0xf] %vm1187_vm2, %v1401_v50  ;;  %1231 = vst.msk [vmem:[%s2622_s4 + $0xac] sm:$0xf] %vm1187_vm2, %v1433_v55  ;;  %v849_v18 = vmul.f32 0.1, %v605_v9  ;;  %v480_v46 = vadd.f32 %v1675_v8, %v2152_v23  ;;  %v608_v6 = vadd.f32 %v1707_v11, %v2152_v23  ;;  %v472_v49 = vadd.f32 %v2152_v23, %v471_v47 }
 0x109   :  { %1197 = vst.msk [vmem:[%s2622_s4 + $0x24] sm:$0xf] %vm1187_vm2, %v1399_v36  ;;  %1229 = vst.msk [vmem:[%s2622_s4 + $0xa4] sm:$0xf] %vm1187_vm2, %v1431_v20  ;;  %v815_v48 = vmul.f32 0.1, %v469_v7  ;;  %v600_v38 = vadd.f32 %v2152_v23, %v599_v2  ;;  %v881_v40 = vadd.f32 %v2635_v39, %v817_v1  ;;  %v2636_v58 = vunpack.c.l.bf16 %v2025_v3 }
 0x10a   :  { %v847_v0 = vmul.f32 0.1, %v597_v21  ;;  %v818_v41 = vmul.f32 0.1, %v480_v46  ;;  %v850_v59 = vmul.f32 0.1, %v608_v6  ;;  %v2637_v52 = vunpack.c.l.bf16 %v2030_v4 }
 0x10b   :  { %v913_v51 = vadd.f32 %v2636_v58, %v849_v18  ;;  %v2638_v60 = vunpack.c.l.bf16 %v2035_v5  ;;  %v816_v63 = vmul.f32 0.1, %v472_v49  ;;  %v848_v61 = vmul.f32 0.1, %v600_v38  ;;  %v1678_v9 = vpop.f32.mrb[16].mxu0  ;;  %v1710_v57 = vpop.f32.mrb[16].mxu1 }
 0x10c   :  { %v879_v53 = vadd.f32 %v2637_v52, %v815_v48  ;;  %v1404_v42 = vpack.c.bf16 %v881_v40, %v881_v40  ;;  %v2639_v44 = vunpack.c.h.bf16 %v2016_v62  ;;  %v2640_v45 = vunpack.c.h.bf16 %v2025_v3  ;;  %v612_v36 = vpop.f32.mrb[17].mxu1 }
 0x10d   :  { %v911_v54 = vadd.f32 %v2638_v60, %v847_v0  ;;  %v1436_v43 = vpack.c.bf16 %v913_v51, %v913_v51  ;;  %v2641_v12 = vunpack.c.h.bf16 %v2030_v4  ;;  %v2642_v55 = vunpack.c.h.bf16 %v2035_v5  ;;  %v484_v5 = vpop.f32.mrb[17].mxu0  ;;  %v1711_v1 = vpop.f32.mrb[18].mxu1 }
 0x10e   :  { %v882_v14 = vadd.f32 %v2639_v44, %v818_v41  ;;  %v914_v24 = vadd.f32 %v2640_v45, %v850_v59  ;;  %v1402_v26 = vpack.c.bf16 %v879_v53, %v879_v53  ;;  %1202 = vst.msk [vmem:[%s2622_s4 + $0x38] sm:$0xf] %vm1187_vm2, %v1404_v42  ;;  %v493_v4 = vadd.f32 %v1678_v9, %v2152_v23  ;;  %v1679_v11 = vpop.f32.mrb[18].mxu0  ;;  %v615_v48 = vpop.f32.mrb[19].mxu1 }
 0x10f   :  { %v1434_v13 = vpack.c.bf16 %v911_v54, %v911_v54  ;;  %v880_v50 = vadd.f32 %v2641_v12, %v816_v63  ;;  %v912_v56 = vadd.f32 %v2642_v55, %v848_v61  ;;  %1234 = vst.msk [vmem:[%s2622_s4 + $0xb8] sm:$0xf] %vm1187_vm2, %v1436_v43  ;;  %v621_v19 = vadd.f32 %v1710_v57, %v2152_v23  ;;  %v487_v2 = vpop.f32.mrb[19].mxu0 }
 0x110   :  { %v1405_v62 = vpack.c.bf16 %v882_v14, %v882_v14  ;;  %v1437_v3 = vpack.c.bf16 %v914_v24, %v914_v24  ;;  %1200 = vst.msk [vmem:[%s2622_s4 + $0x30] sm:$0xf] %vm1187_vm2, %v1402_v26  ;;  %v485_v21 = vadd.f32 %v2152_v23, %v484_v5  ;;  %v613_v8 = vadd.f32 %v2152_v23, %v612_v36 }
 0x111   :  { %1232 = vst.msk [vmem:[%s2622_s4 + $0xb0] sm:$0xf] %vm1187_vm2, %v1434_v13  ;;  %v1403_v20 = vpack.c.bf16 %v880_v50, %v880_v50  ;;  %v1435_v7 = vpack.c.bf16 %v912_v56, %v912_v56  ;;  %v821_v18 = vmul.f32 0.1, %v493_v4  ;;  %v853_v46 = vmul.f32 0.1, %v621_v19 }
 0x112   :  { %1203 = vst.msk [vmem:[%s2622_s4 + $0x3c] sm:$0xf] %vm1187_vm2, %v1405_v62  ;;  %1235 = vst.msk [vmem:[%s2622_s4 + $0xbc] sm:$0xf] %vm1187_vm2, %v1437_v3  ;;  %v496_v6 = vadd.f32 %v1679_v11, %v2152_v23  ;;  %v624_v47 = vadd.f32 %v1711_v1, %v2152_v23  ;;  %v819_v0 = vmul.f32 0.1, %v485_v21  ;;  %v488_v38 = vadd.f32 %v2152_v23, %v487_v2 }
 0x113   :  { %1201 = vst.msk [vmem:[%s2622_s4 + $0x34] sm:$0xf] %vm1187_vm2, %v1403_v20  ;;  %1233 = vst.msk [vmem:[%s2622_s4 + $0xb4] sm:$0xf] %vm1187_vm2, %v1435_v7  ;;  %v851_v49 = vmul.f32 0.1, %v613_v8  ;;  %v616_v39 = vadd.f32 %v2152_v23, %v615_v48  ;;  %v2643_v40 = vunpack.c.l.bf16 %v2044_v10  ;;  %v2644_v51 = vunpack.c.l.bf16 %v2053_v15 }
 0x114   :  { %v822_v59 = vmul.f32 0.1, %v496_v6  ;;  %v854_v52 = vmul.f32 0.1, %v624_v47  ;;  %v2645_v53 = vunpack.c.l.bf16 %v2058_v16  ;;  %v2646_v54 = vunpack.c.l.bf16 %v2063_v17  ;;  %v1682_v57 = vpop.f32.mrb[20].mxu0  ;;  %v1714_v62 = vpop.f32.mrb[20].mxu1 }
 0x115   :  { %v885_v58 = vadd.f32 %v2643_v40, %v821_v18  ;;  %v917_v41 = vadd.f32 %v2644_v51, %v853_v46  ;;  %v820_v61 = vmul.f32 0.1, %v488_v38  ;;  %v852_v42 = vmul.f32 0.1, %v616_v39  ;;  %v628_v4 = vpop.f32.mrb[21].mxu1 }
 0x116   :  { %v883_v60 = vadd.f32 %v2645_v53, %v819_v0  ;;  %v915_v63 = vadd.f32 %v2646_v54, %v851_v49  ;;  %v2647_v14 = vunpack.c.h.bf16 %v2044_v10  ;;  %v2648_v24 = vunpack.c.h.bf16 %v2053_v15  ;;  %v1715_v21 = vpop.f32.mrb[22].mxu1 }
 0x117   :  { %v1408_v43 = vpack.c.bf16 %v885_v58, %v885_v58  ;;  %v1440_v44 = vpack.c.bf16 %v917_v41, %v917_v41  ;;  %v2649_v50 = vunpack.c.h.bf16 %v2058_v16  ;;  %v2650_v56 = vunpack.c.h.bf16 %v2063_v17  ;;  %v500_v17 = vpop.f32.mrb[21].mxu0  ;;  %v631_v6 = vpop.f32.mrb[23].mxu1 }
 0x118   :  { %v886_v45 = vadd.f32 %v2647_v14, %v822_v59  ;;  %v918_v26 = vadd.f32 %v2648_v24, %v854_v52  ;;  %v1406_v13 = vpack.c.bf16 %v883_v60, %v883_v60  ;;  %v1438_v12 = vpack.c.bf16 %v915_v63, %v915_v63  ;;  %v1683_v7 = vpop.f32.mrb[22].mxu0 }
 0x119   :  { %v884_v55 = vadd.f32 %v2649_v50, %v820_v61  ;;  %v916_v9 = vadd.f32 %v2650_v56, %v852_v42  ;;  %1206 = vst.msk [vmem:[%s2622_s4 + $0x48] sm:$0xf] %vm1187_vm2, %v1408_v43  ;;  %1238 = vst.msk [vmem:[%s2622_s4 + $0xc8] sm:$0xf] %vm1187_vm2, %v1440_v44  ;;  %v509_v16 = vadd.f32 %v1682_v57, %v2152_v23  ;;  %v503_v46 = vpop.f32.mrb[23].mxu0  ;;  %v2651_v49 = vunpack.c.l.bf16 %v2072_v22  ;;  %v1718_v56 = vpop.f32.mrb[24].mxu1 }
 0x11a   :  { %v1409_v10 = vpack.c.bf16 %v886_v45, %v886_v45  ;;  %v1441_v15 = vpack.c.bf16 %v918_v26, %v918_v26  ;;  %v637_v3 = vadd.f32 %v1714_v62, %v2152_v23  ;;  %1204 = vst.msk [vmem:[%s2622_s4 + $0x40] sm:$0xf] %vm1187_vm2, %v1406_v13  ;;  %1236 = vst.msk [vmem:[%s2622_s4 + $0xc0] sm:$0xf] %vm1187_vm2, %v1438_v12  ;;  %v2652_v39 = vunpack.c.l.bf16 %v2081_v27  ;;  %v644_v57 = vpop.f32.mrb[25].mxu1 }
 0x11b   :  { %v1407_v19 = vpack.c.bf16 %v884_v55, %v884_v55  ;;  %v1439_v5 = vpack.c.bf16 %v916_v9, %v916_v9  ;;  %v501_v36 = vadd.f32 %v2152_v23, %v500_v17  ;;  %v629_v20 = vadd.f32 %v2152_v23, %v628_v4  ;;  %v1686_v55 = vpop.f32.mrb[24].mxu0  ;;  %v1719_v17 = vpop.f32.mrb[26].mxu1 }
 0x11c   :  { %1207 = vst.msk [vmem:[%s2622_s4 + $0x4c] sm:$0xf] %vm1187_vm2, %v1409_v10  ;;  %1239 = vst.msk [vmem:[%s2622_s4 + $0xcc] sm:$0xf] %vm1187_vm2, %v1441_v15  ;;  %v825_v8 = vmul.f32 0.1, %v509_v16  ;;  %v512_v1 = vadd.f32 %v1683_v7, %v2152_v23  ;;  %v640_v18 = vadd.f32 %v1715_v21, %v2152_v23  ;;  %v504_v48 = vadd.f32 %v2152_v23, %v503_v46 }
 0x11d   :  { %v857_v11 = vmul.f32 0.1, %v637_v3  ;;  %1205 = vst.msk [vmem:[%s2622_s4 + $0x44] sm:$0xf] %vm1187_vm2, %v1407_v19  ;;  %1237 = vst.msk [vmem:[%s2622_s4 + $0xc4] sm:$0xf] %vm1187_vm2, %v1439_v5  ;;  %v632_v0 = vadd.f32 %v2152_v23, %v631_v6  ;;  %v2653_v41 = vunpack.c.l.bf16 %v2086_v28  ;;  %v2654_v52 = vunpack.c.l.bf16 %v2091_v29 }
 0x11e   :  { %v823_v47 = vmul.f32 0.1, %v501_v36  ;;  %v855_v2 = vmul.f32 0.1, %v629_v20  ;;  %v889_v38 = vadd.f32 %v2651_v49, %v825_v8  ;;  %v826_v58 = vmul.f32 0.1, %v512_v1 }
 0x11f   :  { %v921_v40 = vadd.f32 %v2652_v39, %v857_v11  ;;  %v858_v51 = vmul.f32 0.1, %v640_v18  ;;  %v824_v60 = vmul.f32 0.1, %v504_v48  ;;  %v856_v54 = vmul.f32 0.1, %v632_v0 }
 0x120   :  { %v887_v59 = vadd.f32 %v2653_v41, %v823_v47  ;;  %v919_v53 = vadd.f32 %v2654_v52, %v855_v2  ;;  %v1412_v63 = vpack.c.bf16 %v889_v38, %v889_v38  ;;  %v2655_v42 = vunpack.c.h.bf16 %v2072_v22  ;;  %v647_v7 = vpop.f32.mrb[27].mxu1 }
 0x121   :  { %v1444_v61 = vpack.c.bf16 %v921_v40, %v921_v40  ;;  %v2656_v44 = vunpack.c.h.bf16 %v2081_v27  ;;  %v2657_v26 = vunpack.c.h.bf16 %v2086_v28  ;;  %v2658_v12 = vunpack.c.h.bf16 %v2091_v29  ;;  %v516_v29 = vpop.f32.mrb[25].mxu0 }
 0x122   :  { %v890_v43 = vadd.f32 %v2655_v42, %v826_v58  ;;  %v1410_v45 = vpack.c.bf16 %v887_v59, %v887_v59  ;;  %v1442_v24 = vpack.c.bf16 %v919_v53, %v919_v53  ;;  %1210 = vst.msk [vmem:[%s2622_s4 + $0x58] sm:$0xf] %vm1187_vm2, %v1412_v63  ;;  %v525_v28 = vadd.f32 %v1686_v55, %v2152_v23  ;;  %v1687_v3 = vpop.f32.mrb[26].mxu0 }
 0x123   :  { %v922_v14 = vadd.f32 %v2656_v44, %v858_v51  ;;  %v888_v13 = vadd.f32 %v2657_v26, %v824_v60  ;;  %v920_v50 = vadd.f32 %v2658_v12, %v856_v54  ;;  %1242 = vst.msk [vmem:[%s2622_s4 + $0xd8] sm:$0xf] %vm1187_vm2, %v1444_v61  ;;  %v653_v9 = vadd.f32 %v1718_v56, %v2152_v23  ;;  %v519_v20 = vpop.f32.mrb[27].mxu0 }
 0x124   :  { %v1413_v22 = vpack.c.bf16 %v890_v43, %v890_v43  ;;  %1208 = vst.msk [vmem:[%s2622_s4 + $0x50] sm:$0xf] %vm1187_vm2, %v1410_v45  ;;  %1240 = vst.msk [vmem:[%s2622_s4 + $0xd0] sm:$0xf] %vm1187_vm2, %v1442_v24  ;;  %v517_v15 = vadd.f32 %v2152_v23, %v516_v29  ;;  %v645_v16 = vadd.f32 %v2152_v23, %v644_v57  ;;  %v829_v4 = vmul.f32 0.1, %v525_v28 }
 0x125   :  { %v1445_v27 = vpack.c.bf16 %v922_v14, %v922_v14  ;;  %v1411_v62 = vpack.c.bf16 %v888_v13, %v888_v13  ;;  %v1443_v10 = vpack.c.bf16 %v920_v50, %v920_v50  ;;  %v861_v19 = vmul.f32 0.1, %v653_v9  ;;  %v1690_v14 = vpop.f32.mrb[28].mxu0  ;;  %v1722_v45 = vpop.f32.mrb[28].mxu1 }
 0x126   :  { %1211 = vst.msk [vmem:[%s2622_s4 + $0x5c] sm:$0xf] %vm1187_vm2, %v1413_v22  ;;  %v528_v5 = vadd.f32 %v1687_v3, %v2152_v23  ;;  %v656_v36 = vadd.f32 %v1719_v17, %v2152_v23  ;;  %v827_v21 = vmul.f32 0.1, %v517_v15  ;;  %v859_v8 = vmul.f32 0.1, %v645_v16 }
 0x127   :  { %1243 = vst.msk [vmem:[%s2622_s4 + $0xdc] sm:$0xf] %vm1187_vm2, %v1445_v27  ;;  %1209 = vst.msk [vmem:[%s2622_s4 + $0x54] sm:$0xf] %vm1187_vm2, %v1411_v62  ;;  %v520_v11 = vadd.f32 %v2152_v23, %v519_v20  ;;  %v648_v1 = vadd.f32 %v2152_v23, %v647_v7  ;;  %v2659_v18 = vunpack.c.l.bf16 %v2100_v34  ;;  %v2660_v6 = vunpack.c.l.bf16 %v2109_v31  ;;  %v660_v26 = vpop.f32.mrb[29].mxu1 }
 0x128   :  { %1241 = vst.msk [vmem:[%s2622_s4 + $0xd4] sm:$0xf] %vm1187_vm2, %v1443_v10  ;;  %v830_v2 = vmul.f32 0.1, %v528_v5  ;;  %v862_v48 = vmul.f32 0.1, %v656_v36  ;;  %v2661_v0 = vunpack.c.l.bf16 %v2114_v33  ;;  %v2662_v38 = vunpack.c.l.bf16 %v2119_v35 }
 0x129   :  { %v893_v46 = vadd.f32 %v2659_v18, %v829_v4  ;;  %v925_v47 = vadd.f32 %v2660_v6, %v861_v19  ;;  %v828_v40 = vmul.f32 0.1, %v520_v11  ;;  %v860_v58 = vmul.f32 0.1, %v648_v1  ;;  %v1723_v22 = vpop.f32.mrb[30].mxu1 }
 0x12a   :  { %v891_v49 = vadd.f32 %v2661_v0, %v827_v21  ;;  %v923_v39 = vadd.f32 %v2662_v38, %v859_v8  ;;  %v2663_v59 = vunpack.c.h.bf16 %v2100_v34  ;;  %v2664_v53 = vunpack.c.h.bf16 %v2109_v31  ;;  %v663_v62 = vpop.f32.mrb[31].mxu1 }
 0x12b   :  { %v1416_v51 = vpack.c.bf16 %v893_v46, %v893_v46  ;;  %v1448_v41 = vpack.c.bf16 %v925_v47, %v925_v47  ;;  %v2665_v61 = vunpack.c.h.bf16 %v2114_v33  ;;  %v2666_v43 = vunpack.c.h.bf16 %v2119_v35  ;;  %v532_v35 = vpop.f32.mrb[29].mxu0 }
 0x12c   :  { %v894_v52 = vadd.f32 %v2663_v59, %v830_v2  ;;  %v926_v60 = vadd.f32 %v2664_v53, %v862_v48  ;;  %v1414_v54 = vpack.c.bf16 %v891_v49, %v891_v49  ;;  %v1446_v63 = vpack.c.bf16 %v923_v39, %v923_v39  ;;  %v1691_v56 = vpop.f32.mrb[30].mxu0 }
 0x12d   :  { %v892_v42 = vadd.f32 %v2665_v61, %v828_v40  ;;  %v924_v44 = vadd.f32 %v2666_v43, %v860_v58  ;;  %1214 = vst.msk [vmem:[%s2622_s4 + $0x68] sm:$0xf] %vm1187_vm2, %v1416_v51  ;;  %1246 = vst.msk [vmem:[%s2622_s4 + $0xe8] sm:$0xf] %vm1187_vm2, %v1448_v41  ;;  %v541_v33 = vadd.f32 %v1690_v14, %v2152_v23  ;;  %v535_v57 = vpop.f32.mrb[31].mxu0  ;;  %v2667_v17 = vunpack.c.l.bf16 %v2128_v30 }
 0x12e   :  { %v1417_v31 = vpack.c.bf16 %v894_v52, %v894_v52  ;;  %v1449_v34 = vpack.c.bf16 %v926_v60, %v926_v60  ;;  %v669_v24 = vadd.f32 %v1722_v45, %v2152_v23  ;;  %1212 = vst.msk [vmem:[%s2622_s4 + $0x60] sm:$0xf] %vm1187_vm2, %v1414_v54  ;;  %1244 = vst.msk [vmem:[%s2622_s4 + $0xe0] sm:$0xf] %vm1187_vm2, %v1446_v63  ;;  %v2668_v19 = vunpack.c.l.bf16 %v2137_v37 }
 0x12f   :  { %v1415_v13 = vpack.c.bf16 %v892_v42, %v892_v42  ;;  %v1447_v12 = vpack.c.bf16 %v924_v44, %v924_v44  ;;  %v533_v50 = vadd.f32 %v2152_v23, %v532_v35  ;;  %v661_v55 = vadd.f32 %v2152_v23, %v660_v26 }
 0x130   :  { %1215 = vst.msk [vmem:[%s2622_s4 + $0x6c] sm:$0xf] %vm1187_vm2, %v1417_v31  ;;  %1247 = vst.msk [vmem:[%s2622_s4 + $0xec] sm:$0xf] %vm1187_vm2, %v1449_v34  ;;  %v833_v27 = vmul.f32 0.1, %v541_v33  ;;  %v544_v9 = vadd.f32 %v1691_v56, %v2152_v23  ;;  %v672_v29 = vadd.f32 %v1723_v22, %v2152_v23  ;;  %v536_v16 = vadd.f32 %v2152_v23, %v535_v57 }
 0x131   :  { %v865_v28 = vmul.f32 0.1, %v669_v24  ;;  %1213 = vst.msk [vmem:[%s2622_s4 + $0x64] sm:$0xf] %vm1187_vm2, %v1415_v13  ;;  %1245 = vst.msk [vmem:[%s2622_s4 + $0xe4] sm:$0xf] %vm1187_vm2, %v1447_v12  ;;  %v664_v3 = vadd.f32 %v2152_v23, %v663_v62  ;;  %v2669_v7 = vunpack.c.l.bf16 %v2142_v32  ;;  %v2670_v8 = vunpack.c.l.bf16 %v2147_v25 }
 0x132   :  { %v831_v10 = vmul.f32 0.1, %v533_v50  ;;  %v863_v15 = vmul.f32 0.1, %v661_v55  ;;  %v897_v4 = vadd.f32 %v2667_v17, %v833_v27  ;;  %v834_v36 = vmul.f32 0.1, %v544_v9 }
 0x133   :  { %v929_v5 = vadd.f32 %v2668_v19, %v865_v28  ;;  %v866_v20 = vmul.f32 0.1, %v672_v29  ;;  %v832_v1 = vmul.f32 0.1, %v536_v16  ;;  %v864_v18 = vmul.f32 0.1, %v664_v3 }
 0x134   :  { %v895_v21 = vadd.f32 %v2669_v7, %v831_v10  ;;  %v927_v11 = vadd.f32 %v2670_v8, %v863_v15  ;;  %v1420_v46 = vpack.c.bf16 %v897_v4, %v897_v4  ;;  %v2671_v23 = vunpack.c.h.bf16 %v2128_v30 }
 0x135   :  { %v1452_v6 = vpack.c.bf16 %v929_v5, %v929_v5  ;;  %v2672_v2 = vunpack.c.h.bf16 %v2137_v37  ;;  %v2673_v38 = vunpack.c.h.bf16 %v2142_v32  ;;  %v2674_v40 = vunpack.c.h.bf16 %v2147_v25 }
 0x136   :  { %v898_v47 = vadd.f32 %v2671_v23, %v834_v36  ;;  %v1418_v0 = vpack.c.bf16 %v895_v21, %v895_v21  ;;  %v1450_v49 = vpack.c.bf16 %v927_v11, %v927_v11  ;;  %1218 = vst.msk [vmem:[%s2622_s4 + $0x78] sm:$0xf] %vm1187_vm2, %v1420_v46 }
 0x137   :  { %v930_v48 = vadd.f32 %v2672_v2, %v866_v20  ;;  %v896_v39 = vadd.f32 %v2673_v38, %v832_v1  ;;  %v928_v58 = vadd.f32 %v2674_v40, %v864_v18  ;;  %1250 = vst.msk [vmem:[%s2622_s4 + $0xf8] sm:$0xf] %vm1187_vm2, %v1452_v6 }
 0x138   :  { %v1421_v30 = vpack.c.bf16 %v898_v47, %v898_v47  ;;  %1216 = vst.msk [vmem:[%s2622_s4 + $0x70] sm:$0xf] %vm1187_vm2, %v1418_v0  ;;  %1248 = vst.msk [vmem:[%s2622_s4 + $0xf0] sm:$0xf] %vm1187_vm2, %v1450_v49 }
 0x139   :  { %v1453_v37 = vpack.c.bf16 %v930_v48, %v930_v48  ;;  %v1419_v25 = vpack.c.bf16 %v896_v39, %v896_v39  ;;  %v1451_v32 = vpack.c.bf16 %v928_v58, %v928_v58 }
 0x13a   :  { %1219 = vst.msk [vmem:[%s2622_s4 + $0x7c] sm:$0xf] %vm1187_vm2, %v1421_v30 }
 0x13b   :  { %1251 = vst.msk [vmem:[%s2622_s4 + $0xfc] sm:$0xf] %vm1187_vm2, %v1453_v37  ;;  %1217 = vst.msk [vmem:[%s2622_s4 + $0x74] sm:$0xf] %vm1187_vm2, %v1419_v25 }
 0x13c   :  { %1249 = vst.msk [vmem:[%s2622_s4 + $0xf4] sm:$0xf] %vm1187_vm2, %v1451_v32 }

// kernel: _forward_impl.16
= control target key start
LH: loop header
LB: loop body
LE: loop exit
PB: predicated region body
PF: predicated region fallthrough
CT: control target
= control target key end

     0   :  { %s1302_s21 = smov 0   ;;  %s1304_s22 = smov 0   ;;  %s1436_s0 = inlined_call_operand.vmem [shape: bf16[2,9,9,8], index: 0, kind: input, shape index: {}, may-alias: {0,4}]   ;;  %s1437_s1 = inlined_call_operand.vmem [shape: bf16[2,9,9,8], index: 1, kind: input, shape index: {}, may-alias: {1,5}]   ;;  %s1438_s2 = inlined_call_operand.vmem [shape: bf16[2,9,9,8], index: 2, kind: input, shape index: {}]   ;;  %s1439_s3 = inlined_call_operand.vmem [shape: bf16[2,9,9,8], index: 3, kind: input, shape index: {}]   ;;  %s1440_s4 = inlined_call_operand.vmem [shape: bf16[2,9,9,8], index: 4, kind: input, shape index: {}, may-alias: {0,4}]   ;;  %s1441_s5 = inlined_call_operand.vmem [shape: bf16[2,9,9,8], index: 5, kind: input, shape index: {}, may-alias: {1,5}]   ;;  %s1442_s6 = inlined_call_operand.vmem [shape: bf16[2,8,8,8], index: 6, kind: output, shape index: {}]  }
   0x1   :  { %s1306_s23 = smov 0  }
   0x2 LB: > { %s35_s24 = sadd.s32 1, %s1261_s22  ;;  %p1199_p0 = scmp.ge.s32.totalorder %s1265_s23, 1  ;;  %s1265_s23 = sphi %s1306_s23, %s16_s23   ;;  %s1261_s22 = sphi %s1304_s22, %s1444_s22   ;;  %s1257_s21 = sphi %s1302_s21, %s1443_s21  }
   0x3   : > { %p37_p1 = scmp.ge.s32.totalorder %s35_s24, 2  ;;  %p415_p2 = scmp.lt.s32.totalorder %s1265_s23, 3 }
   0x5   : > { %s1446_s24 = smov (%p37_p1, %s35_s24), 0  ;;  %p416_p3 = pnand %p1199_p0, %p415_p2 }
   0x6   : > { %p553_p4 = scmp.lt.s32.totalorder (!%p416_p3), %s1257_s21, 1  ;;  %vm814_vm0 = vcmask (!%p416_p3), 1046528   ;;  %vm956_vm1 = vcmask (!%p416_p3), 60416  }
   0x7   : > { %419 = sbr.rel (%p416_p3) target bundleno = 70 (0x46), region = 44 }
   0xe   : > { %s1448_s21 = smov (!%p553_p4, %s1257_s21), 1 }
   0xf   : > { %s1323_s25 = smul.u32 72, %s1448_s21  ;;  %s1215_s14 = sshll.u32 %s1448_s21, 5 }
  0x10   : > { %s1377_s17 = scalar_lea.vmem %s1442_s6, %s1215_s14 }
  0x11   : > { %s1329_s28 = scalar_lea.vmem %s1436_s0, %s1323_s25  ;;  %s1335_s7 = scalar_lea.vmem %s1437_s1, %s1323_s25 }
  0x12   : > { %s1341_s10 = scalar_lea.vmem %s1438_s2, %s1323_s25  ;;  %s1347_s13 = scalar_lea.vmem %s1439_s3, %s1323_s25  ;;  %v688_v0 = vld [vmem:[%s1329_s28] ss:$8 sps:$4 sm:$0xff]   ;;  %v689_v1 = vld [vmem:[%s1329_s28 + $0x4] sm:$0x1]  ;;  %v691_v2 = vld [vmem:[%s1329_s28 + $0xc] sm:$0x1] }
  0x13   : > { %v704_v3 = vunpack.c.l.bf16 %v688_v0  ;;  %v705_v4 = vunpack.c.l.bf16 %v689_v1  ;;  %v706_v5 = vunpack.c.h.bf16 %v688_v0  ;;  %v707_v6 = vunpack.c.l.bf16 %v691_v2  ;;  %v720_v7 = vld [vmem:[%s1335_s7] ss:$8 sps:$4 sm:$0xff]   ;;  %v737_v9 = vld [vmem:[%s1341_s10 + $0x4] sm:$0x1]  ;;  %v692_v15 = vld [vmem:[%s1329_s28 + $0x10] ss:$8 sps:$4 sm:$0xff]  }
  0x14   : > { %v736_v8 = vld [vmem:[%s1341_s10] ss:$8 sps:$4 sm:$0xff]   ;;  %v728_v10 = vunpack.c.l.bf16 %v720_v7  ;;  %v729_v11 = vunpack.c.h.bf16 %v720_v7  ;;  %v753_v13 = vunpack.c.l.bf16 %v737_v9  ;;  %v693_v16 = vld [vmem:[%s1329_s28 + $0x14] sm:$0x1]  ;;  %v722_v21 = vld [vmem:[%s1335_s7 + $0x10] ss:$8 sps:$4 sm:$0xff]   ;;  %v708_v30 = vunpack.c.l.bf16 %v692_v15 }
  0x15   : > { %v752_v12 = vunpack.c.l.bf16 %v736_v8  ;;  %v768_v14 = vld [vmem:[%s1347_s13] ss:$8 sps:$4 sm:$0xff]   ;;  %v815_v18 = vrot.slane %v704_v3, 1  ;;  %v816_v19 = vrot.slane %v705_v4, 1  ;;  %v818_v20 = vrot.slane %v706_v5, 1  ;;  %s1212_s18 = sadd.s32 64, %s1323_s25 }
  0x16   : > { %v776_v17 = vunpack.c.l.bf16 %v768_v14  ;;  %v790_v22 = vadd.f32 %v728_v10, %v704_v3  ;;  %v791_v23 = vadd.f32 %v729_v11, %v706_v5  ;;  %v819_v24 = vrot.slane %v707_v6, 1  ;;  %v739_v26 = vld [vmem:[%s1341_s10 + $0xc] sm:$0x1]  ;;  %v695_v39 = vld [vmem:[%s1329_s28 + $0x1c] sm:$0x1]  ;;  %s656_s21 = scalar_lea.vmem %s1440_s4, %s1212_s18  ;;  %s672_s27 = scalar_lea.vmem %s1441_s5, %s1212_s18 }
  0x17   : > { %v879_v25 = vrot.slane %v752_v12, 1  ;;  %v817_v27 = vsel %vm814_vm0, %v815_v18, %v816_v19  ;;  %v880_v29 = vrot.slane %v753_v13, 1  ;;  %v709_v33 = vunpack.c.l.bf16 %v693_v16  ;;  %v740_v44 = vld [vmem:[%s1341_s10 + $0x10] ss:$8 sps:$4 sm:$0xff]   ;;  %v741_v45 = vld [vmem:[%s1341_s10 + $0x14] sm:$0x1] }
  0x18   : > { %v855_v28 = vadd.f32 %v776_v17, %v752_v12  ;;  %v820_v31 = vsel %vm814_vm0, %v818_v20, %v819_v24  ;;  %v847_v32 = vadd.f32 %v817_v27, %v790_v22  ;;  %v730_v34 = vunpack.c.l.bf16 %v722_v21  ;;  %v770_v50 = vld [vmem:[%s1347_s13 + $0x10] ss:$8 sps:$4 sm:$0xff]   ;;  %v696_v63 = vld [vmem:[%s1329_s28 + $0x20] ss:$8 sps:$4 sm:$0xff]   ;;  %v697_v0 = vld [vmem:[%s1329_s28 + $0x24] sm:$0x1] }
  0x19   : > { %v848_v35 = vadd.f32 %v820_v31, %v791_v23  ;;  %v881_v36 = vsel %vm814_vm0, %v879_v25, %v880_v29  ;;  %v754_v37 = vunpack.c.h.bf16 %v736_v8  ;;  %v755_v38 = vunpack.c.l.bf16 %v739_v26  ;;  %v724_v1 = vld [vmem:[%s1335_s7 + $0x20] ss:$8 sps:$4 sm:$0xff]   ;;  %v743_v10 = vld [vmem:[%s1341_s10 + $0x1c] sm:$0x1]  ;;  %v699_v23 = vld [vmem:[%s1329_s28 + $0x2c] sm:$0x1] }
  0x1a   : > { %v911_v40 = vadd.f32 %v881_v36, %v855_v28  ;;  %v777_v41 = vunpack.c.h.bf16 %v768_v14  ;;  %v792_v42 = vadd.f32 %v730_v34, %v708_v30  ;;  %v821_v43 = vrot.slane %v708_v30, 1  ;;  %v744_v28 = vld [vmem:[%s1341_s10 + $0x20] ss:$8 sps:$4 sm:$0xff]  }
  0x1b   : > { %v822_v46 = vrot.slane %v709_v33, 1  ;;  %v882_v47 = vrot.slane %v754_v37, 1  ;;  %v883_v48 = vrot.slane %v755_v38, 1  ;;  %v710_v49 = vunpack.c.h.bf16 %v692_v15  ;;  %v745_v33 = vld [vmem:[%s1341_s10 + $0x24] sm:$0x1] }
  0x1c   : > { %v927_v51 = vadd.f32 %v911_v40, %v847_v32  ;;  %v856_v52 = vadd.f32 %v777_v41, %v754_v37  ;;  %v711_v53 = vunpack.c.l.bf16 %v695_v39  ;;  %v731_v54 = vunpack.c.h.bf16 %v722_v21  ;;  %v772_v34 = vld [vmem:[%s1347_s13 + $0x20] ss:$8 sps:$4 sm:$0xff]  }
  0x1d   : > { %v823_v55 = vsel %vm814_vm0, %v821_v43, %v822_v46  ;;  %v884_v56 = vsel %vm814_vm0, %v882_v47, %v883_v48  ;;  %v756_v57 = vunpack.c.l.bf16 %v740_v44  ;;  %v757_v58 = vunpack.c.l.bf16 %v741_v45  ;;  %v700_v47 = vld [vmem:[%s1329_s28 + $0x30] ss:$8 sps:$4 sm:$0xff]   ;;  %v701_v48 = vld [vmem:[%s1329_s28 + $0x34] sm:$0x1] }
  0x1e   : > { %v935_v59 = vadd.f32 %v927_v51, %v848_v35  ;;  %v849_v60 = vadd.f32 %v823_v55, %v792_v42  ;;  %v912_v61 = vadd.f32 %v884_v56, %v856_v52  ;;  %v778_v62 = vunpack.c.l.bf16 %v770_v50 }
  0x1f   : > { %v793_v2 = vadd.f32 %v731_v54, %v710_v49  ;;  %v824_v3 = vrot.slane %v710_v49, 1  ;;  %v825_v4 = vrot.slane %v711_v53, 1  ;;  %v885_v5 = vrot.slane %v756_v57, 1  ;;  %v726_v53 = vld [vmem:[%s1335_s7 + $0x30] ss:$8 sps:$4 sm:$0xff]  }
  0x20   : > { %v942_v6 = vmul.f32 0.11111111, %v935_v59  ;;  %v928_v7 = vadd.f32 %v912_v61, %v848_v35  ;;  %v857_v8 = vadd.f32 %v778_v62, %v756_v57  ;;  %v886_v9 = vrot.slane %v757_v58, 1  ;;  %v747_v58 = vld [vmem:[%s1341_s10 + $0x2c] sm:$0x1] }
  0x21   : > { %v826_v11 = vsel %vm814_vm0, %v824_v3, %v825_v4  ;;  %v712_v12 = vunpack.c.l.bf16 %v696_v63  ;;  %v713_v13 = vunpack.c.l.bf16 %v697_v0  ;;  %v732_v14 = vunpack.c.l.bf16 %v724_v1 }
  0x22   : > { %v949_v15 = vpack.c.bf16 %v942_v6, %v942_v6  ;;  %v936_v16 = vadd.f32 %v928_v7, %v849_v60  ;;  %v850_v17 = vadd.f32 %v826_v11, %v793_v2  ;;  %v887_v18 = vsel %vm814_vm0, %v885_v5, %v886_v9  ;;  %v703_v7 = vld [vmem:[%s1329_s28 + $0x3c] sm:$0x1] }
  0x23   : > { %v913_v19 = vadd.f32 %v887_v18, %v857_v8  ;;  %v758_v20 = vunpack.c.h.bf16 %v740_v44  ;;  %v759_v21 = vunpack.c.l.bf16 %v743_v10  ;;  %v779_v22 = vunpack.c.h.bf16 %v770_v50  ;;  %v774_v18 = vld [vmem:[%s1347_s13 + $0x30] ss:$8 sps:$4 sm:$0xff]  }
  0x24   : > { %957 = vst.msk [vmem:[%s1377_s17] sm:$0xf] %vm956_vm1, %v949_v15  ;;  %v943_v24 = vmul.f32 0.11111111, %v936_v16  ;;  %v794_v25 = vadd.f32 %v732_v14, %v712_v12  ;;  %v827_v26 = vrot.slane %v712_v12, 1  ;;  %v828_v27 = vrot.slane %v713_v13, 1 }
  0x25   : > { %v929_v29 = vadd.f32 %v913_v19, %v849_v60  ;;  %v858_v30 = vadd.f32 %v779_v22, %v758_v20  ;;  %v888_v31 = vrot.slane %v758_v20, 1  ;;  %v889_v32 = vrot.slane %v759_v21, 1  ;;  %v748_v12 = vld [vmem:[%s1341_s10 + $0x30] ss:$8 sps:$4 sm:$0xff]  }
  0x26   : > { %v950_v35 = vpack.c.bf16 %v943_v24, %v943_v24  ;;  %v829_v36 = vsel %vm814_vm0, %v827_v26, %v828_v27  ;;  %v714_v37 = vunpack.c.h.bf16 %v696_v63  ;;  %v715_v38 = vunpack.c.l.bf16 %v699_v23 }
  0x27   : > { %v937_v39 = vadd.f32 %v929_v29, %v850_v17  ;;  %v851_v40 = vadd.f32 %v829_v36, %v794_v25  ;;  %v890_v41 = vsel %vm814_vm0, %v888_v31, %v889_v32  ;;  %v733_v42 = vunpack.c.h.bf16 %v724_v1  ;;  %v751_v31 = vld [vmem:[%s1341_s10 + $0x3c] sm:$0x1]  ;;  %v784_v36 = vld [vmem:[%s656_s21] sm:$0xf] }
  0x28   : > { %958 = vst.msk [vmem:[%s1377_s17 + $0x4] sm:$0xf] %vm956_vm1, %v950_v35  ;;  %v914_v43 = vadd.f32 %v890_v41, %v858_v30  ;;  %v760_v44 = vunpack.c.l.bf16 %v744_v28  ;;  %v761_v45 = vunpack.c.l.bf16 %v745_v33  ;;  %v780_v46 = vunpack.c.l.bf16 %v772_v34  ;;  %v785_v41 = vld [vmem:[%s656_s21 + $0x4] sm:$0x1] }
  0x29   : > { %v944_v49 = vmul.f32 0.11111111, %v937_v39  ;;  %v795_v50 = vadd.f32 %v733_v42, %v714_v37  ;;  %v830_v51 = vrot.slane %v714_v37, 1  ;;  %v831_v52 = vrot.slane %v715_v38, 1  ;;  %v788_v42 = vld [vmem:[%s672_s27] sm:$0xf] }
  0x2a   : > { %v930_v54 = vadd.f32 %v914_v43, %v850_v17  ;;  %v859_v55 = vadd.f32 %v780_v46, %v760_v44  ;;  %v891_v56 = vrot.slane %v760_v44, 1  ;;  %v892_v57 = vrot.slane %v761_v45, 1  ;;  %v749_v17 = vld [vmem:[%s1341_s10 + $0x34] sm:$0x1] }
  0x2b   : > { %v951_v59 = vpack.c.bf16 %v944_v49, %v944_v49  ;;  %v832_v60 = vsel %vm814_vm0, %v830_v51, %v831_v52  ;;  %v716_v61 = vunpack.c.l.bf16 %v700_v47  ;;  %v717_v62 = vunpack.c.l.bf16 %v701_v48 }
  0x2c   : > { %v938_v63 = vadd.f32 %v930_v54, %v851_v40  ;;  %v852_v0 = vadd.f32 %v832_v60, %v795_v50  ;;  %v893_v1 = vsel %vm814_vm0, %v891_v56, %v892_v57  ;;  %v734_v2 = vunpack.c.l.bf16 %v726_v53 }
  0x2d   : > { %959 = vst.msk [vmem:[%s1377_s17 + $0x8] sm:$0xf] %vm956_vm1, %v951_v59  ;;  %v915_v3 = vadd.f32 %v893_v1, %v859_v55  ;;  %v762_v4 = vunpack.c.h.bf16 %v744_v28  ;;  %v763_v5 = vunpack.c.l.bf16 %v747_v58  ;;  %v781_v6 = vunpack.c.h.bf16 %v772_v34 }
  0x2e   : > { %v945_v8 = vmul.f32 0.11111111, %v938_v63  ;;  %v796_v9 = vadd.f32 %v734_v2, %v716_v61  ;;  %v833_v10 = vrot.slane %v716_v61, 1  ;;  %v834_v11 = vrot.slane %v717_v62, 1 }
  0x2f   : > { %v931_v13 = vadd.f32 %v915_v3, %v851_v40  ;;  %v860_v14 = vadd.f32 %v781_v6, %v762_v4  ;;  %v894_v15 = vrot.slane %v762_v4, 1  ;;  %v895_v16 = vrot.slane %v763_v5, 1 }
  0x30   : > { %v952_v19 = vpack.c.bf16 %v945_v8, %v945_v8  ;;  %v835_v20 = vsel %vm814_vm0, %v833_v10, %v834_v11  ;;  %v718_v21 = vunpack.c.h.bf16 %v700_v47  ;;  %v719_v22 = vunpack.c.l.bf16 %v703_v7 }
  0x31   : > { %v939_v23 = vadd.f32 %v931_v13, %v852_v0  ;;  %v853_v24 = vadd.f32 %v835_v20, %v796_v9  ;;  %v896_v25 = vsel %vm814_vm0, %v894_v15, %v895_v16  ;;  %v735_v26 = vunpack.c.h.bf16 %v726_v53 }
  0x32   : > { %960 = vst.msk [vmem:[%s1377_s17 + $0xc] sm:$0xf] %vm956_vm1, %v952_v19  ;;  %v916_v27 = vadd.f32 %v896_v25, %v860_v14  ;;  %v764_v28 = vunpack.c.l.bf16 %v748_v12  ;;  %v765_v29 = vunpack.c.l.bf16 %v749_v17  ;;  %v782_v30 = vunpack.c.l.bf16 %v774_v18 }
  0x33   : > { %v946_v32 = vmul.f32 0.11111111, %v939_v23  ;;  %v797_v33 = vadd.f32 %v735_v26, %v718_v21  ;;  %v836_v34 = vrot.slane %v718_v21, 1  ;;  %v837_v35 = vrot.slane %v719_v22, 1 }
  0x34   : > { %v932_v37 = vadd.f32 %v916_v27, %v852_v0  ;;  %v861_v38 = vadd.f32 %v782_v30, %v764_v28  ;;  %v897_v39 = vrot.slane %v764_v28, 1  ;;  %v898_v40 = vrot.slane %v765_v29, 1 }
  0x35   : > { %v953_v43 = vpack.c.bf16 %v946_v32, %v946_v32  ;;  %v838_v44 = vsel %vm814_vm0, %v836_v34, %v837_v35  ;;  %v766_v45 = vunpack.c.h.bf16 %v748_v12  ;;  %v767_v46 = vunpack.c.l.bf16 %v751_v31 }
  0x36   : > { %v940_v47 = vadd.f32 %v932_v37, %v853_v24  ;;  %v854_v48 = vadd.f32 %v838_v44, %v797_v33  ;;  %v899_v49 = vsel %vm814_vm0, %v897_v39, %v898_v40  ;;  %v783_v50 = vunpack.c.h.bf16 %v774_v18 }
  0x37   : > { %961 = vst.msk [vmem:[%s1377_s17 + $0x10] sm:$0xf] %vm956_vm1, %v953_v43  ;;  %v917_v51 = vadd.f32 %v899_v49, %v861_v38  ;;  %v786_v52 = vunpack.c.l.bf16 %v784_v36  ;;  %v787_v53 = vunpack.c.l.bf16 %v785_v41  ;;  %v789_v54 = vunpack.c.l.bf16 %v788_v42 }
  0x38   : > { %v947_v55 = vmul.f32 0.11111111, %v940_v47  ;;  %v862_v56 = vadd.f32 %v783_v50, %v766_v45  ;;  %v900_v57 = vrot.slane %v766_v45, 1  ;;  %v901_v58 = vrot.slane %v767_v46, 1 }
  0x39   : > { %v933_v59 = vadd.f32 %v917_v51, %v853_v24  ;;  %v919_v60 = vadd.f32 %v789_v54, %v786_v52  ;;  %v922_v61 = vrot.slane %v786_v52, 1  ;;  %v923_v62 = vrot.slane %v787_v53, 1 }
  0x3a   : > { %v954_v63 = vpack.c.bf16 %v947_v55, %v947_v55  ;;  %v902_v0 = vsel %vm814_vm0, %v900_v57, %v901_v58 }
  0x3b   : > { %v941_v1 = vadd.f32 %v933_v59, %v854_v48  ;;  %v918_v2 = vadd.f32 %v902_v0, %v862_v56  ;;  %v924_v3 = vsel %vm814_vm0, %v922_v61, %v923_v62 }
  0x3c   : > { %962 = vst.msk [vmem:[%s1377_s17 + $0x14] sm:$0xf] %vm956_vm1, %v954_v63  ;;  %v926_v4 = vadd.f32 %v924_v3, %v919_v60 }
  0x3d   : > { %v948_v5 = vmul.f32 0.11111111, %v941_v1  ;;  %v934_v6 = vadd.f32 %v918_v2, %v854_v48 }
  0x3f   : > { %v955_v7 = vpack.c.bf16 %v948_v5, %v948_v5  ;;  %v964_v8 = vadd.f32 %v934_v6, %v926_v4 }
  0x41   : > { %963 = vst.msk [vmem:[%s1377_s17 + $0x18] sm:$0xf] %vm956_vm1, %v955_v7  ;;  %v965_v9 = vmul.f32 0.11111111, %v964_v8 }
  0x43   : > { %v966_v10 = vpack.c.bf16 %v965_v9, %v965_v9 }
  0x45   : > { %1208 = vst.msk [vmem:[%s1377_s17 + $0x1c] sm:$0xf] %vm956_vm1, %v966_v10 }
  0x46 PF: > { %s16_s23 = sadd.s32 1, %s1265_s23   ;;  %s1443_s21 = smov %s1261_s22 }
  0x47   : > { %p13_p5 = scmp.ge.s32.totalorder %s16_s23, 4   ;;  %s1444_s22 = smov %s1446_s24 }
  0x49   :  { %15 = sbr.rel (!%p13_p5) target bundleno = 2 (0x2), region = 90 }

// kernel: _forward_impl.18
= control target key start
LH: loop header
LB: loop body
LE: loop exit
PB: predicated region body
PF: predicated region fallthrough
CT: control target
= control target key end

     0   :  { %vm114_vm0 = vcmask 588800   ;;  %vm139_vm1 = vcmask 1043456   ;;  %vm352_vm2 = vcmask 60416   ;;  %s643_s1 = inlined_call_operand.vmem [shape: bf16[72,8], index: 1, kind: input, shape index: {}]   ;;  %s644_s0 = inlined_call_operand.vmem [shape: bf16[128,72], index: 0, kind: input, shape index: {}]   ;;  %s645_s2 = inlined_call_operand.vmem [shape: f32[1,8], index: 2, kind: input, shape index: {}]   ;;  %s646_s3 = inlined_call_operand.vmem [shape: bf16[128,8], index: 3, kind: output, shape index: {}]  }
   0x1   :  { %v478_v0 = vld [vmem:[%s643_s1] sm:$0xff]   ;;  %v479_v1 = vld [vmem:[%s643_s1 + $0x8] sm:$0xff]   ;;  %v480_v2 = vld [vmem:[%s643_s1 + $0x10] sm:$0xff]  }
   0x2   :  { %440 = vmatprep.subr.bf16.mxu0 %v478_v0  ;;  %466 = vmatprep.subr.bf16.mxu1 %v478_v0  ;;  %v483_v3 = vld [vmem:[%s644_s0] sm:$0xff]   ;;  %v481_v5 = vld [vmem:[%s643_s1 + $0x18] sm:$0xff]   ;;  %v485_v8 = vld [vmem:[%s644_s0 + $0x8] sm:$0xff]  }
   0x3   :  { %441 = vmatpush3.bf16.msra.mxu0 %v478_v0  ;;  %471 = vmatpush3.bf16.msra.mxu1 %v478_v0  ;;  %v484_v4 = vld [vmem:[%s644_s0 + $0x20] sm:$0xff]   ;;  %v486_v9 = vld [vmem:[%s644_s0 + $0x28] sm:$0xff]   ;;  %v487_v10 = vld [vmem:[%s644_s0 + $0x10] sm:$0xff]  }
   0x4   :  { %442 = vmatprep.subr.bf16.mxu0 %v479_v1  ;;  %467 = vmatprep.subr.bf16.mxu1 %v479_v1  ;;  %v482_v6 = vld [vmem:[%s643_s1 + $0x20] ss:$0 sps:$4 sm:$0xff]   ;;  %v488_v11 = vld [vmem:[%s644_s0 + $0x30] sm:$0xff]   ;;  %v489_v12 = vld [vmem:[%s644_s0 + $0x18] sm:$0xff]  }
   0x5   :  { %450 = vmatprep.mubr.msk.bf16.mxu0 %vm114_vm0, %v483_v3  ;;  %458 = vmatprep.mubr.msk.bf16.mxu1 %vm114_vm0, %v484_v4  ;;  %v141_v7 = vsel %vm139_vm1, %v482_v6, 0  ;;  %v490_v13 = vld [vmem:[%s644_s0 + $0x38] sm:$0xff]   ;;  %v561_v14 = vld [vmem:[%s645_s2] ss:$0 sm:$0xff] }
   0x7   :  { %443 = vmatpush3.bf16.msra.mxu0 %v479_v1  ;;  %472 = vmatpush3.bf16.msra.mxu1 %v479_v1 }
   0x8   :  { %444 = vmatprep.subr.bf16.mxu0 %v480_v2  ;;  %468 = vmatprep.subr.bf16.mxu1 %v480_v2 }
   0xb   :  { %445 = vmatpush3.bf16.msra.mxu0 %v480_v2  ;;  %473 = vmatpush3.bf16.msra.mxu1 %v480_v2 }
   0xc   :  { %446 = vmatprep.subr.bf16.mxu0 %v481_v5  ;;  %469 = vmatprep.subr.bf16.mxu1 %v481_v5 }
   0xf   :  { %447 = vmatpush3.bf16.msra.mxu0 %v481_v5  ;;  %474 = vmatpush3.bf16.msra.mxu1 %v481_v5 }
  0x10   :  { %476 = vmatprep.subr.msk.bf16.mxu0 %vm139_vm1, %v482_v6  ;;  %477 = vmatprep.subr.msk.bf16.mxu1 %vm139_vm1, %v482_v6 }
  0x13   :  { %449 = vmatpush3.bf16.msra.mxu0 %v141_v7  ;;  %475 = vmatpush3.bf16.msra.mxu1 %v141_v7 }
  0x16   :  { %451 = vmatmul.mubr.msk.bf16.vlgmr.msra.gmra.mrb[0].mxu0 %vm114_vm0, %v485_v8  ;;  %459 = vmatmul.mubr.msk.bf16.vlgmr.msra.gmra.mrb[0].mxu1 %vm114_vm0, %v486_v9 }
  0x17   :  { %454 = vmatprep.mubr.msk.bf16.mxu0 %vm114_vm0, %v487_v10  ;;  %462 = vmatprep.mubr.msk.bf16.mxu1 %vm114_vm0, %v488_v11 }
  0x1e   :  { %455 = vmatmul.mubr.msk.bf16.gmra.mrb[4].mxu0 %vm114_vm0, %v489_v12  ;;  %463 = vmatmul.mubr.msk.bf16.gmra.mrb[4].mxu1 %vm114_vm0, %v490_v13 }
  0xe9   :  { %v452_v15 = vpop.f32.mrb[0].mxu0  ;;  %v460_v16 = vpop.f32.mrb[0].mxu1 }
  0xea   :  { %v186_v17 = vadd.f32 %v452_v15, %v561_v14  ;;  %v218_v18 = vadd.f32 %v460_v16, %v561_v14  ;;  %v177_v19 = vpop.f32.mrb[1].mxu0  ;;  %v209_v20 = vpop.f32.mrb[1].mxu1 }
  0xeb   :  { %v178_v21 = vadd.f32 %v561_v14, %v177_v19  ;;  %v210_v22 = vadd.f32 %v561_v14, %v209_v20  ;;  %v453_v23 = vpop.f32.mrb[2].mxu0  ;;  %v461_v24 = vpop.f32.mrb[2].mxu1 }
  0xec   :  { %vm242_vm3 = vcmp.ge.f32.partialorder %v186_v17, 0.0  ;;  %v258_v25 = vmul.f32 0.2, %v186_v17  ;;  %vm250_vm4 = vcmp.ge.f32.partialorder %v218_v18, 0.0  ;;  %v266_v26 = vmul.f32 0.2, %v218_v18 }
  0xed   :  { %vm240_vm5 = vcmp.ge.f32.partialorder %v178_v21, 0.0  ;;  %v256_v27 = vmul.f32 0.2, %v178_v21  ;;  %vm248_vm6 = vcmp.ge.f32.partialorder %v210_v22, 0.0  ;;  %v264_v28 = vmul.f32 0.2, %v210_v22 }
  0xee   :  { %v274_v29 = vsel %vm242_vm3, %v186_v17, %v258_v25  ;;  %v282_v30 = vsel %vm250_vm4, %v218_v18, %v266_v26  ;;  %v189_v31 = vadd.f32 %v453_v23, %v561_v14  ;;  %v221_v32 = vadd.f32 %v461_v24, %v561_v14  ;;  %v180_v33 = vpop.f32.mrb[3].mxu0  ;;  %v212_v34 = vpop.f32.mrb[3].mxu1 }
  0xef   :  { %v413_v35 = vpack.c.bf16 %v274_v29, %v274_v29  ;;  %v421_v36 = vpack.c.bf16 %v282_v30, %v282_v30  ;;  %v272_v37 = vsel %vm240_vm5, %v178_v21, %v256_v27  ;;  %v280_v38 = vsel %vm248_vm6, %v210_v22, %v264_v28 }
  0xf0   :  { %v411_v39 = vpack.c.bf16 %v272_v37, %v272_v37  ;;  %v419_v40 = vpack.c.bf16 %v280_v38, %v280_v38  ;;  %vm243_vm7 = vcmp.ge.f32.partialorder %v189_v31, 0.0  ;;  %v259_v41 = vmul.f32 0.2, %v189_v31 }
  0xf1   :  { %355 = vst.msk [vmem:[%s646_s3 + $0x8] sm:$0xf] %vm352_vm2, %v413_v35  ;;  %363 = vst.msk [vmem:[%s646_s3 + $0x28] sm:$0xf] %vm352_vm2, %v421_v36  ;;  %vm251_vm8 = vcmp.ge.f32.partialorder %v221_v32, 0.0  ;;  %v181_v43 = vadd.f32 %v561_v14, %v180_v33  ;;  %v213_v44 = vadd.f32 %v561_v14, %v212_v34  ;;  %v456_v45 = vpop.f32.mrb[4].mxu0 }
  0xf2   :  { %v267_v42 = vmul.f32 0.2, %v221_v32  ;;  %v464_v46 = vpop.f32.mrb[4].mxu1  ;;  %353 = vst.msk [vmem:[%s646_s3] sm:$0xf] %vm352_vm2, %v411_v39  ;;  %v275_v47 = vsel %vm243_vm7, %v189_v31, %v259_v41  ;;  %v202_v48 = vadd.f32 %v456_v45, %v561_v14  ;;  %v193_v50 = vpop.f32.mrb[5].mxu0 }
  0xf3   :  { %361 = vst.msk [vmem:[%s646_s3 + $0x20] sm:$0xf] %vm352_vm2, %v419_v40  ;;  %v234_v49 = vadd.f32 %v464_v46, %v561_v14  ;;  %v225_v51 = vpop.f32.mrb[5].mxu1  ;;  %v414_v52 = vpack.c.bf16 %v275_v47, %v275_v47  ;;  %vm241_vm9 = vcmp.ge.f32.partialorder %v181_v43, 0.0  ;;  %v257_v54 = vmul.f32 0.2, %v181_v43 }
  0xf4   :  { %v283_v53 = vsel %vm251_vm8, %v221_v32, %v267_v42  ;;  %v457_v55 = vpop.f32.mrb[6].mxu0  ;;  %v465_v56 = vpop.f32.mrb[6].mxu1  ;;  %vm249_vm10 = vcmp.ge.f32.partialorder %v213_v44, 0.0  ;;  %v265_v58 = vmul.f32 0.2, %v213_v44  ;;  %vm246_vm11 = vcmp.ge.f32.partialorder %v202_v48, 0.0 }
  0xf5   :  { %v422_v57 = vpack.c.bf16 %v283_v53, %v283_v53  ;;  %v196_v59 = vpop.f32.mrb[7].mxu0  ;;  %v228_v60 = vpop.f32.mrb[7].mxu1  ;;  %356 = vst.msk [vmem:[%s646_s3 + $0xc] sm:$0xf] %vm352_vm2, %v414_v52  ;;  %v273_v61 = vsel %vm241_vm9, %v181_v43, %v257_v54  ;;  %v262_v62 = vmul.f32 0.2, %v202_v48  ;;  %v194_v2 = vadd.f32 %v561_v14, %v193_v50 }
  0xf6   :  { %vm254_vm12 = vcmp.ge.f32.partialorder %v234_v49, 0.0  ;;  %v270_v63 = vmul.f32 0.2, %v234_v49  ;;  %v412_v0 = vpack.c.bf16 %v273_v61, %v273_v61  ;;  %v281_v1 = vsel %vm249_vm10, %v213_v44, %v265_v58 }
  0xf7   :  { %364 = vst.msk [vmem:[%s646_s3 + $0x2c] sm:$0xf] %vm352_vm2, %v422_v57  ;;  %v226_v3 = vadd.f32 %v561_v14, %v225_v51  ;;  %v420_v4 = vpack.c.bf16 %v281_v1, %v281_v1  ;;  %v278_v5 = vsel %vm246_vm11, %v202_v48, %v262_v62  ;;  %v205_v7 = vadd.f32 %v457_v55, %v561_v14 }
  0xf8   :  { %v286_v6 = vsel %vm254_vm12, %v234_v49, %v270_v63  ;;  %354 = vst.msk [vmem:[%s646_s3 + $0x4] sm:$0xf] %vm352_vm2, %v412_v0  ;;  %v417_v8 = vpack.c.bf16 %v278_v5, %v278_v5  ;;  %vm244_vm13 = vcmp.ge.f32.partialorder %v194_v2, 0.0  ;;  %v260_v10 = vmul.f32 0.2, %v194_v2 }
  0xf9   :  { %v425_v9 = vpack.c.bf16 %v286_v6, %v286_v6  ;;  %362 = vst.msk [vmem:[%s646_s3 + $0x24] sm:$0xf] %vm352_vm2, %v420_v4  ;;  %vm252_vm14 = vcmp.ge.f32.partialorder %v226_v3, 0.0  ;;  %v268_v11 = vmul.f32 0.2, %v226_v3  ;;  %vm247_vm15 = vcmp.ge.f32.partialorder %v205_v7, 0.0 }
  0xfa   :  { %v263_v12 = vmul.f32 0.2, %v205_v7  ;;  %359 = vst.msk [vmem:[%s646_s3 + $0x18] sm:$0xf] %vm352_vm2, %v417_v8  ;;  %v276_v13 = vsel %vm244_vm13, %v194_v2, %v260_v10  ;;  %v237_v15 = vadd.f32 %v465_v56, %v561_v14  ;;  %v197_v16 = vadd.f32 %v561_v14, %v196_v59 }
  0xfb   :  { %367 = vst.msk [vmem:[%s646_s3 + $0x38] sm:$0xf] %vm352_vm2, %v425_v9  ;;  %v229_v17 = vadd.f32 %v561_v14, %v228_v60  ;;  %v415_v18 = vpack.c.bf16 %v276_v13, %v276_v13  ;;  %v284_v19 = vsel %vm252_vm14, %v226_v3, %v268_v11 }
  0xfc   :  { %v279_v20 = vsel %vm247_vm15, %v205_v7, %v263_v12  ;;  %v423_v21 = vpack.c.bf16 %v284_v19, %v284_v19  ;;  %vm255_vm0 = vcmp.ge.f32.partialorder %v237_v15, 0.0  ;;  %v271_v23 = vmul.f32 0.2, %v237_v15 }
  0xfd   :  { %v418_v22 = vpack.c.bf16 %v279_v20, %v279_v20  ;;  %357 = vst.msk [vmem:[%s646_s3 + $0x10] sm:$0xf] %vm352_vm2, %v415_v18  ;;  %vm245_vm1 = vcmp.ge.f32.partialorder %v197_v16, 0.0  ;;  %v261_v24 = vmul.f32 0.2, %v197_v16  ;;  %vm253_vm3 = vcmp.ge.f32.partialorder %v229_v17, 0.0 }
  0xfe   :  { %v269_v25 = vmul.f32 0.2, %v229_v17  ;;  %365 = vst.msk [vmem:[%s646_s3 + $0x30] sm:$0xf] %vm352_vm2, %v423_v21  ;;  %v287_v14 = vsel %vm255_vm0, %v237_v15, %v271_v23 }
  0xff   :  { %360 = vst.msk [vmem:[%s646_s3 + $0x1c] sm:$0xf] %vm352_vm2, %v418_v22  ;;  %v426_v26 = vpack.c.bf16 %v287_v14, %v287_v14  ;;  %v277_v27 = vsel %vm245_vm1, %v197_v16, %v261_v24 }
 0x100   :  { %v285_v28 = vsel %vm253_vm3, %v229_v17, %v269_v25  ;;  %v416_v29 = vpack.c.bf16 %v277_v27, %v277_v27 }
 0x101   :  { %v424_v30 = vpack.c.bf16 %v285_v28, %v285_v28  ;;  %368 = vst.msk [vmem:[%s646_s3 + $0x3c] sm:$0xf] %vm352_vm2, %v426_v26 }
 0x102   :  { %358 = vst.msk [vmem:[%s646_s3 + $0x14] sm:$0xf] %vm352_vm2, %v416_v29 }
 0x103   :  { %366 = vst.msk [vmem:[%s646_s3 + $0x34] sm:$0xf] %vm352_vm2, %v424_v30 }

// kernel: _forward_impl.17
= control target key start
LH: loop header
LB: loop body
LE: loop exit
PB: predicated region body
PF: predicated region fallthrough
CT: control target
= control target key end

     0   :  { %vm94_vm0 = vcmask 1043456   ;;  %vm69_vm1 = vcmask 64512   ;;  %vm259_vm2 = vcmask 125952   ;;  %s481_s1 = inlined_call_operand.vmem [shape: bf16[8,16], index: 1, kind: input, shape index: {}]   ;;  %s482_s0 = inlined_call_operand.vmem [shape: bf16[128,8], index: 0, kind: input, shape index: {}]   ;;  %s483_s2 = inlined_call_operand.vmem [shape: bf16[128,16], index: 2, kind: output, shape index: {}]  }
   0x1   :  { %v28_v0 = vld [vmem:[%s481_s1] sm:$0xf]  ;;  %v361_v4 = vld [vmem:[%s482_s0 + $0x8] sm:$0xff]   ;;  %v363_v6 = vld [vmem:[%s482_s0 + $0x10] sm:$0xff]  }
   0x2   :  { %357 = vmatprep.subr.msk.bf16.mxu0 %vm94_vm0, %v28_v0  ;;  %358 = vmatprep.subr.msk.bf16.mxu1 %vm94_vm0, %v28_v0  ;;  %v96_v1 = vsel %vm94_vm0, %v28_v0, 0  ;;  %v359_v2 = vld [vmem:[%s482_s0] sm:$0xff]   ;;  %v362_v5 = vld [vmem:[%s482_s0 + $0x28] sm:$0xff]   ;;  %v364_v7 = vld [vmem:[%s482_s0 + $0x30] sm:$0xff]  }
   0x3   :  { %338 = vmatpush3.bf16.msra.mxu0 %v96_v1  ;;  %356 = vmatpush3.bf16.msra.mxu1 %v96_v1  ;;  %v360_v3 = vld [vmem:[%s482_s0 + $0x20] sm:$0xff]   ;;  %v365_v8 = vld [vmem:[%s482_s0 + $0x18] sm:$0xff]  }
   0x4   :  { %339 = vmatprep.mubr.msk.bf16.mxu0 %vm69_vm1, %v359_v2  ;;  %347 = vmatprep.mubr.msk.bf16.mxu1 %vm69_vm1, %v360_v3  ;;  %v366_v9 = vld [vmem:[%s482_s0 + $0x38] sm:$0xff]  }
   0x6   :  { %340 = vmatmul.mubr.msk.bf16.vlgmr.msra.gmra.mrb[0].mxu0 %vm69_vm1, %v361_v4  ;;  %348 = vmatmul.mubr.msk.bf16.vlgmr.msra.gmra.mrb[0].mxu1 %vm69_vm1, %v362_v5 }
   0x7   :  { %343 = vmatprep.mubr.msk.bf16.mxu0 %vm69_vm1, %v363_v6  ;;  %351 = vmatprep.mubr.msk.bf16.mxu1 %vm69_vm1, %v364_v7 }
   0xe   :  { %344 = vmatmul.mubr.msk.bf16.gmra.mrb[4].mxu0 %vm69_vm1, %v365_v8  ;;  %352 = vmatmul.mubr.msk.bf16.gmra.mrb[4].mxu1 %vm69_vm1, %v366_v9 }
  0xd9   :  { %v341_v10 = vpop.f32.mrb[0].mxu0  ;;  %v349_v12 = vpop.f32.mrb[0].mxu1 }
  0xda   :  { %v314_v11 = vpack.c.bf16 %v341_v10, %v341_v10  ;;  %v132_v13 = vpop.f32.mrb[1].mxu0  ;;  %v322_v14 = vpack.c.bf16 %v349_v12, %v349_v12  ;;  %v164_v16 = vpop.f32.mrb[1].mxu1 }
  0xdb   :  { %v312_v15 = vpack.c.bf16 %v132_v13, %v132_v13  ;;  %v342_v17 = vpop.f32.mrb[2].mxu0  ;;  %v320_v18 = vpack.c.bf16 %v164_v16, %v164_v16  ;;  %v350_v20 = vpop.f32.mrb[2].mxu1 }
  0xdc   :  { %262 = vst.msk [vmem:[%s483_s2 + $0x8] sm:$0xf] %vm259_vm2, %v314_v11  ;;  %v315_v19 = vpack.c.bf16 %v342_v17, %v342_v17  ;;  %v135_v21 = vpop.f32.mrb[3].mxu0  ;;  %270 = vst.msk [vmem:[%s483_s2 + $0x28] sm:$0xf] %vm259_vm2, %v322_v14  ;;  %v323_v22 = vpack.c.bf16 %v350_v20, %v350_v20  ;;  %v167_v24 = vpop.f32.mrb[3].mxu1 }
  0xdd   :  { %260 = vst.msk [vmem:[%s483_s2] sm:$0xf] %vm259_vm2, %v312_v15  ;;  %v313_v23 = vpack.c.bf16 %v135_v21, %v135_v21  ;;  %268 = vst.msk [vmem:[%s483_s2 + $0x20] sm:$0xf] %vm259_vm2, %v320_v18  ;;  %v321_v25 = vpack.c.bf16 %v167_v24, %v167_v24 }
  0xde   :  { %263 = vst.msk [vmem:[%s483_s2 + $0xc] sm:$0xf] %vm259_vm2, %v315_v19  ;;  %271 = vst.msk [vmem:[%s483_s2 + $0x2c] sm:$0xf] %vm259_vm2, %v323_v22 }
  0xdf   :  { %261 = vst.msk [vmem:[%s483_s2 + $0x4] sm:$0xf] %vm259_vm2, %v313_v23  ;;  %269 = vst.msk [vmem:[%s483_s2 + $0x24] sm:$0xf] %vm259_vm2, %v321_v25 }
  0xe1   :  { %v345_v26 = vpop.f32.mrb[4].mxu0  ;;  %v353_v28 = vpop.f32.mrb[4].mxu1 }
  0xe2   :  { %v318_v27 = vpack.c.bf16 %v345_v26, %v345_v26  ;;  %v148_v29 = vpop.f32.mrb[5].mxu0  ;;  %v326_v30 = vpack.c.bf16 %v353_v28, %v353_v28  ;;  %v180_v32 = vpop.f32.mrb[5].mxu1 }
  0xe3   :  { %v316_v31 = vpack.c.bf16 %v148_v29, %v148_v29  ;;  %v346_v33 = vpop.f32.mrb[6].mxu0  ;;  %v324_v34 = vpack.c.bf16 %v180_v32, %v180_v32  ;;  %v354_v36 = vpop.f32.mrb[6].mxu1 }
  0xe4   :  { %266 = vst.msk [vmem:[%s483_s2 + $0x18] sm:$0xf] %vm259_vm2, %v318_v27  ;;  %v319_v35 = vpack.c.bf16 %v346_v33, %v346_v33  ;;  %v151_v37 = vpop.f32.mrb[7].mxu0  ;;  %274 = vst.msk [vmem:[%s483_s2 + $0x38] sm:$0xf] %vm259_vm2, %v326_v30  ;;  %v327_v38 = vpack.c.bf16 %v354_v36, %v354_v36  ;;  %v183_v40 = vpop.f32.mrb[7].mxu1 }
  0xe5   :  { %264 = vst.msk [vmem:[%s483_s2 + $0x10] sm:$0xf] %vm259_vm2, %v316_v31  ;;  %v317_v39 = vpack.c.bf16 %v151_v37, %v151_v37  ;;  %272 = vst.msk [vmem:[%s483_s2 + $0x30] sm:$0xf] %vm259_vm2, %v324_v34  ;;  %v325_v41 = vpack.c.bf16 %v183_v40, %v183_v40 }
  0xe6   :  { %267 = vst.msk [vmem:[%s483_s2 + $0x1c] sm:$0xf] %vm259_vm2, %v319_v35  ;;  %275 = vst.msk [vmem:[%s483_s2 + $0x3c] sm:$0xf] %vm259_vm2, %v327_v38 }
  0xe7   :  { %265 = vst.msk [vmem:[%s483_s2 + $0x14] sm:$0xf] %vm259_vm2, %v317_v39  ;;  %273 = vst.msk [vmem:[%s483_s2 + $0x34] sm:$0xf] %vm259_vm2, %v325_v41 }

// kernel: _forward_impl.19
= control target key start
LH: loop header
LB: loop body
LE: loop exit
PB: predicated region body
PF: predicated region fallthrough
CT: control target
= control target key end

     0   :  { %vm117_vm0 = vcmask 588800   ;;  %vm142_vm1 = vcmask 1043456   ;;  %vm371_vm2 = vcmask 125952   ;;  %s762_s1 = inlined_call_operand.vmem [shape: bf16[72,16], index: 1, kind: input, shape index: {}]   ;;  %s763_s0 = inlined_call_operand.vmem [shape: bf16[128,72], index: 0, kind: input, shape index: {}]   ;;  %s764_s3 = inlined_call_operand.vmem [shape: bf16[128,16], index: 3, kind: input, shape index: {}]   ;;  %s765_s2 = inlined_call_operand.vmem [shape: f32[1,16], index: 2, kind: input, shape index: {}]   ;;  %s766_s4 = inlined_call_operand.vmem [shape: bf16[128,16], index: 4, kind: output, shape index: {}]  }
   0x1   :  { %v536_v0 = vld [vmem:[%s762_s1] sm:$0xff]   ;;  %v537_v1 = vld [vmem:[%s762_s1 + $0x8] sm:$0xff]   ;;  %v538_v2 = vld [vmem:[%s762_s1 + $0x10] sm:$0xff]  }
   0x2   :  { %498 = vmatprep.subr.bf16.mxu0 %v536_v0  ;;  %524 = vmatprep.subr.bf16.mxu1 %v536_v0  ;;  %v541_v3 = vld [vmem:[%s763_s0] sm:$0xff]   ;;  %v539_v5 = vld [vmem:[%s762_s1 + $0x18] sm:$0xff]   ;;  %v543_v8 = vld [vmem:[%s763_s0 + $0x8] sm:$0xff]  }
   0x3   :  { %499 = vmatpush3.bf16.msra.mxu0 %v536_v0  ;;  %529 = vmatpush3.bf16.msra.mxu1 %v536_v0  ;;  %v542_v4 = vld [vmem:[%s763_s0 + $0x20] sm:$0xff]   ;;  %v544_v9 = vld [vmem:[%s763_s0 + $0x28] sm:$0xff]   ;;  %v545_v10 = vld [vmem:[%s763_s0 + $0x10] sm:$0xff]  }
   0x4   :  { %500 = vmatprep.subr.bf16.mxu0 %v537_v1  ;;  %525 = vmatprep.subr.bf16.mxu1 %v537_v1  ;;  %v540_v6 = vld [vmem:[%s762_s1 + $0x20] ss:$0 sps:$4 sm:$0xff]   ;;  %v546_v11 = vld [vmem:[%s763_s0 + $0x30] sm:$0xff]   ;;  %v547_v12 = vld [vmem:[%s763_s0 + $0x18] sm:$0xff]  }
   0x5   :  { %508 = vmatprep.mubr.msk.bf16.mxu0 %vm117_vm0, %v541_v3  ;;  %516 = vmatprep.mubr.msk.bf16.mxu1 %vm117_vm0, %v542_v4  ;;  %v144_v7 = vsel %vm142_vm1, %v540_v6, 0  ;;  %v548_v13 = vld [vmem:[%s763_s0 + $0x38] sm:$0xff]   ;;  %v478_v14 = vld [vmem:[%s764_s3 + $0x8] sm:$0xff]   ;;  %v447_v16 = vld [vmem:[%s764_s3] sm:$0xff]  }
   0x6   :  { %v482_v15 = vld [vmem:[%s764_s3 + $0x28] sm:$0xff]   ;;  %v481_v17 = vld [vmem:[%s764_s3 + $0x20] sm:$0xff]   ;;  %v636_v18 = vld [vmem:[%s764_s3 + $0x18] sm:$0xff]   ;;  %v452_v19 = vunpack.c.l.bf16 %v478_v14  ;;  %v448_v25 = vunpack.c.l.bf16 %v447_v16  ;;  %v453_v27 = vunpack.c.h.bf16 %v478_v14  ;;  %v449_v29 = vunpack.c.h.bf16 %v447_v16 }
   0x7   :  { %501 = vmatpush3.bf16.msra.mxu0 %v537_v1  ;;  %530 = vmatpush3.bf16.msra.mxu1 %v537_v1  ;;  %v641_v20 = vld [vmem:[%s764_s3 + $0x38] sm:$0xff]   ;;  %v646_v21 = vld [vmem:[%s764_s3 + $0x10] sm:$0xff]   ;;  %v656_v23 = vld [vmem:[%s765_s2] ss:$0 sm:$0xff]  ;;  %v468_v24 = vunpack.c.l.bf16 %v482_v15  ;;  %v464_v26 = vunpack.c.l.bf16 %v481_v17  ;;  %v469_v28 = vunpack.c.h.bf16 %v482_v15  ;;  %v465_v30 = vunpack.c.h.bf16 %v481_v17 }
   0x8   :  { %502 = vmatprep.subr.bf16.mxu0 %v538_v2  ;;  %526 = vmatprep.subr.bf16.mxu1 %v538_v2  ;;  %v651_v22 = vld [vmem:[%s764_s3 + $0x30] sm:$0xff]   ;;  %v460_v33 = vunpack.c.l.bf16 %v636_v18  ;;  %v476_v34 = vunpack.c.l.bf16 %v641_v20  ;;  %v456_v35 = vunpack.c.l.bf16 %v646_v21  ;;  %v461_v41 = vunpack.c.h.bf16 %v636_v18 }
   0x9   :  { %v472_v36 = vunpack.c.l.bf16 %v651_v22  ;;  %v477_v42 = vunpack.c.h.bf16 %v641_v20  ;;  %v457_v47 = vunpack.c.h.bf16 %v646_v21  ;;  %v473_v48 = vunpack.c.h.bf16 %v651_v22 }
   0xb   :  { %503 = vmatpush3.bf16.msra.mxu0 %v538_v2  ;;  %531 = vmatpush3.bf16.msra.mxu1 %v538_v2 }
   0xc   :  { %504 = vmatprep.subr.bf16.mxu0 %v539_v5  ;;  %527 = vmatprep.subr.bf16.mxu1 %v539_v5 }
   0xf   :  { %505 = vmatpush3.bf16.msra.mxu0 %v539_v5  ;;  %532 = vmatpush3.bf16.msra.mxu1 %v539_v5 }
  0x10   :  { %534 = vmatprep.subr.msk.bf16.mxu0 %vm142_vm1, %v540_v6  ;;  %535 = vmatprep.subr.msk.bf16.mxu1 %vm142_vm1, %v540_v6 }
  0x13   :  { %507 = vmatpush3.bf16.msra.mxu0 %v144_v7  ;;  %533 = vmatpush3.bf16.msra.mxu1 %v144_v7 }
  0x16   :  { %509 = vmatmul.mubr.msk.bf16.vlgmr.msra.gmra.mrb[0].mxu0 %vm117_vm0, %v543_v8  ;;  %517 = vmatmul.mubr.msk.bf16.vlgmr.msra.gmra.mrb[0].mxu1 %vm117_vm0, %v544_v9 }
  0x17   :  { %512 = vmatprep.mubr.msk.bf16.mxu0 %vm117_vm0, %v545_v10  ;;  %520 = vmatprep.mubr.msk.bf16.mxu1 %vm117_vm0, %v546_v11 }
  0x1e   :  { %513 = vmatmul.mubr.msk.bf16.gmra.mrb[4].mxu0 %vm117_vm0, %v547_v12  ;;  %521 = vmatmul.mubr.msk.bf16.gmra.mrb[4].mxu1 %vm117_vm0, %v548_v13 }
  0xe9   :  { %v510_v31 = vpop.f32.mrb[0].mxu0  ;;  %v518_v32 = vpop.f32.mrb[0].mxu1 }
  0xea   :  { %v189_v37 = vadd.f32 %v510_v31, %v656_v23  ;;  %v221_v38 = vadd.f32 %v518_v32, %v656_v23  ;;  %v180_v39 = vpop.f32.mrb[1].mxu0  ;;  %v212_v40 = vpop.f32.mrb[1].mxu1 }
  0xeb   :  { %v181_v43 = vadd.f32 %v656_v23, %v180_v39  ;;  %v213_v44 = vadd.f32 %v656_v23, %v212_v40  ;;  %v511_v45 = vpop.f32.mrb[2].mxu0  ;;  %v519_v46 = vpop.f32.mrb[2].mxu1 }
  0xec   :  { %v277_v49 = vmul.f32 0.1, %v189_v37  ;;  %v285_v50 = vmul.f32 0.1, %v221_v38  ;;  %v192_v51 = vadd.f32 %v511_v45, %v656_v23  ;;  %v224_v52 = vadd.f32 %v519_v46, %v656_v23  ;;  %v183_v53 = vpop.f32.mrb[3].mxu0  ;;  %v215_v54 = vpop.f32.mrb[3].mxu1 }
  0xed   :  { %v275_v55 = vmul.f32 0.1, %v181_v43  ;;  %v283_v56 = vmul.f32 0.1, %v213_v44  ;;  %v184_v57 = vadd.f32 %v656_v23, %v183_v53  ;;  %v216_v58 = vadd.f32 %v656_v23, %v215_v54 }
  0xee   :  { %v293_v59 = vadd.f32 %v452_v19, %v277_v49  ;;  %v301_v60 = vadd.f32 %v468_v24, %v285_v50  ;;  %v278_v61 = vmul.f32 0.1, %v192_v51  ;;  %v286_v62 = vmul.f32 0.1, %v224_v52 }
  0xef   :  { %v291_v63 = vadd.f32 %v448_v25, %v275_v55  ;;  %v299_v0 = vadd.f32 %v464_v26, %v283_v56  ;;  %v276_v1 = vmul.f32 0.1, %v184_v57  ;;  %v284_v2 = vmul.f32 0.1, %v216_v58 }
  0xf0   :  { %v432_v3 = vpack.c.bf16 %v293_v59, %v293_v59  ;;  %v440_v4 = vpack.c.bf16 %v301_v60, %v301_v60  ;;  %v294_v5 = vadd.f32 %v453_v27, %v278_v61  ;;  %v302_v6 = vadd.f32 %v469_v28, %v286_v62 }
  0xf1   :  { %v430_v7 = vpack.c.bf16 %v291_v63, %v291_v63  ;;  %v438_v8 = vpack.c.bf16 %v299_v0, %v299_v0  ;;  %v292_v9 = vadd.f32 %v449_v29, %v276_v1  ;;  %v300_v10 = vadd.f32 %v465_v30, %v284_v2  ;;  %v514_v11 = vpop.f32.mrb[4].mxu0  ;;  %v522_v12 = vpop.f32.mrb[4].mxu1 }
  0xf2   :  { %374 = vst.msk [vmem:[%s766_s4 + $0x8] sm:$0xf] %vm371_vm2, %v432_v3  ;;  %382 = vst.msk [vmem:[%s766_s4 + $0x28] sm:$0xf] %vm371_vm2, %v440_v4  ;;  %v433_v13 = vpack.c.bf16 %v294_v5, %v294_v5  ;;  %v441_v14 = vpack.c.bf16 %v302_v6, %v302_v6  ;;  %v205_v15 = vadd.f32 %v514_v11, %v656_v23  ;;  %v196_v17 = vpop.f32.mrb[5].mxu0  ;;  %v228_v19 = vpop.f32.mrb[5].mxu1 }
  0xf3   :  { %v237_v16 = vadd.f32 %v522_v12, %v656_v23  ;;  %372 = vst.msk [vmem:[%s766_s4] sm:$0xf] %vm371_vm2, %v430_v7  ;;  %380 = vst.msk [vmem:[%s766_s4 + $0x20] sm:$0xf] %vm371_vm2, %v438_v8  ;;  %v431_v24 = vpack.c.bf16 %v292_v9, %v292_v9  ;;  %v439_v25 = vpack.c.bf16 %v300_v10, %v300_v10  ;;  %v515_v28 = vpop.f32.mrb[6].mxu0  ;;  %v523_v29 = vpop.f32.mrb[6].mxu1 }
  0xf4   :  { %v197_v26 = vadd.f32 %v656_v23, %v196_v17  ;;  %v229_v27 = vadd.f32 %v656_v23, %v228_v19  ;;  %375 = vst.msk [vmem:[%s766_s4 + $0xc] sm:$0xf] %vm371_vm2, %v433_v13  ;;  %383 = vst.msk [vmem:[%s766_s4 + $0x2c] sm:$0xf] %vm371_vm2, %v441_v14  ;;  %v281_v30 = vmul.f32 0.1, %v205_v15  ;;  %v208_v32 = vadd.f32 %v515_v28, %v656_v23 }
  0xf5   :  { %v289_v31 = vmul.f32 0.1, %v237_v16  ;;  %v240_v37 = vadd.f32 %v523_v29, %v656_v23  ;;  %v199_v38 = vpop.f32.mrb[7].mxu0  ;;  %v231_v39 = vpop.f32.mrb[7].mxu1  ;;  %373 = vst.msk [vmem:[%s766_s4 + $0x4] sm:$0xf] %vm371_vm2, %v431_v24 }
  0xf6   :  { %381 = vst.msk [vmem:[%s766_s4 + $0x24] sm:$0xf] %vm371_vm2, %v439_v25  ;;  %v279_v40 = vmul.f32 0.1, %v197_v26  ;;  %v287_v43 = vmul.f32 0.1, %v229_v27  ;;  %v200_v44 = vadd.f32 %v656_v23, %v199_v38  ;;  %v232_v45 = vadd.f32 %v656_v23, %v231_v39 }
  0xf7   :  { %v297_v46 = vadd.f32 %v460_v33, %v281_v30  ;;  %v305_v49 = vadd.f32 %v476_v34, %v289_v31  ;;  %v282_v50 = vmul.f32 0.1, %v208_v32  ;;  %v290_v51 = vmul.f32 0.1, %v240_v37 }
  0xf8   :  { %v295_v52 = vadd.f32 %v456_v35, %v279_v40  ;;  %v303_v53 = vadd.f32 %v472_v36, %v287_v43  ;;  %v280_v54 = vmul.f32 0.1, %v200_v44  ;;  %v288_v55 = vmul.f32 0.1, %v232_v45 }
  0xf9   :  { %v436_v56 = vpack.c.bf16 %v297_v46, %v297_v46  ;;  %v444_v57 = vpack.c.bf16 %v305_v49, %v305_v49  ;;  %v298_v23 = vadd.f32 %v461_v41, %v282_v50  ;;  %v306_v33 = vadd.f32 %v477_v42, %v290_v51 }
  0xfa   :  { %v434_v58 = vpack.c.bf16 %v295_v52, %v295_v52  ;;  %v442_v34 = vpack.c.bf16 %v303_v53, %v303_v53  ;;  %v296_v59 = vadd.f32 %v457_v47, %v280_v54  ;;  %v304_v35 = vadd.f32 %v473_v48, %v288_v55 }
  0xfb   :  { %378 = vst.msk [vmem:[%s766_s4 + $0x18] sm:$0xf] %vm371_vm2, %v436_v56  ;;  %386 = vst.msk [vmem:[%s766_s4 + $0x38] sm:$0xf] %vm371_vm2, %v444_v57  ;;  %v437_v18 = vpack.c.bf16 %v298_v23, %v298_v23  ;;  %v445_v20 = vpack.c.bf16 %v306_v33, %v306_v33 }
  0xfc   :  { %376 = vst.msk [vmem:[%s766_s4 + $0x10] sm:$0xf] %vm371_vm2, %v434_v58  ;;  %384 = vst.msk [vmem:[%s766_s4 + $0x30] sm:$0xf] %vm371_vm2, %v442_v34  ;;  %v435_v21 = vpack.c.bf16 %v296_v59, %v296_v59  ;;  %v443_v22 = vpack.c.bf16 %v304_v35, %v304_v35 }
  0xfd   :  { %379 = vst.msk [vmem:[%s766_s4 + $0x1c] sm:$0xf] %vm371_vm2, %v437_v18  ;;  %387 = vst.msk [vmem:[%s766_s4 + $0x3c] sm:$0xf] %vm371_vm2, %v445_v20 }
  0xfe   :  { %377 = vst.msk [vmem:[%s766_s4 + $0x14] sm:$0xf] %vm371_vm2, %v435_v21  ;;  %385 = vst.msk [vmem:[%s766_s4 + $0x34] sm:$0xf] %vm371_vm2, %v443_v22 }

// kernel: _forward_impl.20
= control target key start
LH: loop header
LB: loop body
LE: loop exit
PB: predicated region body
PF: predicated region fallthrough
CT: control target
= control target key end

     0   :  { %s1068_s21 = smov 0   ;;  %s1070_s22 = smov 0   ;;  %s1143_s0 = inlined_call_operand.vmem [shape: bf16[2,5,5,16], index: 0, kind: input, shape index: {}, may-alias: {0,4}]   ;;  %s1144_s1 = inlined_call_operand.vmem [shape: bf16[2,5,5,16], index: 1, kind: input, shape index: {}, may-alias: {1,5}]   ;;  %s1145_s2 = inlined_call_operand.vmem [shape: bf16[2,5,5,16], index: 2, kind: input, shape index: {}]   ;;  %s1146_s3 = inlined_call_operand.vmem [shape: bf16[2,5,5,16], index: 3, kind: input, shape index: {}]   ;;  %s1147_s4 = inlined_call_operand.vmem [shape: bf16[2,5,5,16], index: 4, kind: input, shape index: {}, may-alias: {0,4}]   ;;  %s1148_s5 = inlined_call_operand.vmem [shape: bf16[2,5,5,16], index: 5, kind: input, shape index: {}, may-alias: {1,5}]   ;;  %s1149_s6 = inlined_call_operand.vmem [shape: bf16[2,4,4,16], index: 6, kind: output, shape index: {}]  }
   0x1   :  { %s1072_s23 = smov 0  }
   0x2 LB: > { %s35_s24 = sadd.s32 1, %s1027_s22  ;;  %p965_p0 = scmp.ge.s32.totalorder %s1031_s23, 1  ;;  %s1031_s23 = sphi %s1072_s23, %s16_s23   ;;  %s1027_s22 = sphi %s1070_s22, %s1151_s22   ;;  %s1023_s21 = sphi %s1068_s21, %s1150_s21  }
   0x3   : > { %p37_p1 = scmp.ge.s32.totalorder %s35_s24, 2  ;;  %p401_p2 = scmp.lt.s32.totalorder %s1031_s23, 3 }
   0x5   : > { %s1153_s24 = smov (%p37_p1, %s35_s24), 0  ;;  %p402_p3 = pnand %p965_p0, %p401_p2 }
   0x6   : > { %p528_p4 = scmp.lt.s32.totalorder (!%p402_p3), %s1023_s21, 1  ;;  %vm744_vm0 = vcmask (!%p402_p3), 123904  }
   0x7   : > { %405 = sbr.rel (%p402_p3) target bundleno = 42 (0x2a), region = 44 }
   0xe   : > { %s1155_s21 = smov (!%p528_p4, %s1023_s21), 1 }
   0xf   : > { %s1089_s25 = smul.u32 20, %s1155_s21 }
  0x11   : > { %s538_s28 = scalar_lea.vmem %s1143_s0, %s1089_s25  ;;  %s559_s7 = scalar_lea.vmem %s1144_s1, %s1089_s25 }
  0x12   : > { %s1103_s10 = scalar_lea.vmem %s1145_s2, %s1089_s25  ;;  %s1109_s13 = scalar_lea.vmem %s1146_s3, %s1089_s25  ;;  %v650_v0 = vld [vmem:[%s538_s28] sm:$0x7]  ;;  %v651_v1 = vld [vmem:[%s538_s28 + $0x4] sm:$0x7]  ;;  %v652_v12 = vld [vmem:[%s538_s28 + $0x8] sm:$0x7] }
  0x13   : > { %v658_v2 = vld [vmem:[%s559_s7] sm:$0x7]  ;;  %v654_v3 = vunpack.c.l.bf16 %v650_v0  ;;  %v655_v4 = vunpack.c.l.bf16 %v651_v1  ;;  %v659_v5 = vld [vmem:[%s559_s7 + $0x4] sm:$0x7]  ;;  %v660_v13 = vld [vmem:[%s559_s7 + $0x8] sm:$0x7]  ;;  %v656_v18 = vunpack.c.l.bf16 %v652_v12 }
  0x14   : > { %v662_v6 = vunpack.c.l.bf16 %v658_v2  ;;  %v666_v7 = vld [vmem:[%s1103_s10] sm:$0x7]  ;;  %v663_v9 = vunpack.c.l.bf16 %v659_v5  ;;  %v667_v14 = vld [vmem:[%s1103_s10 + $0x4] sm:$0x7]  ;;  %v653_v20 = vld [vmem:[%s538_s28 + $0xc] sm:$0x7]  ;;  %v664_v24 = vunpack.c.l.bf16 %v660_v13 }
  0x15   : > { %v674_v8 = vld [vmem:[%s1109_s13] sm:$0x7]  ;;  %v670_v10 = vunpack.c.l.bf16 %v666_v7  ;;  %v694_v16 = vrot.slane %v654_v3, 1  ;;  %v695_v17 = vrot.slane %v655_v4, 1  ;;  %v675_v19 = vld [vmem:[%s1109_s13 + $0x4] sm:$0x7]  ;;  %v671_v28 = vunpack.c.l.bf16 %v667_v14 }
  0x16   : > { %v678_v11 = vunpack.c.l.bf16 %v674_v8  ;;  %v686_v15 = vadd.f32 %v662_v6, %v654_v3  ;;  %v687_v21 = vadd.f32 %v663_v9, %v655_v4  ;;  %v661_v25 = vld [vmem:[%s559_s7 + $0xc] sm:$0x7]  ;;  %v668_v26 = vld [vmem:[%s1103_s10 + $0x8] sm:$0x7]  ;;  %s978_s14 = sadd.s32 16, %s1089_s25  ;;  %v679_v29 = vunpack.c.l.bf16 %v675_v19  ;;  %s981_s25 = sshll.u32 %s1155_s21, 3 }
  0x17   : > { %v714_v23 = vrot.slane %v670_v10, 1  ;;  %v696_v30 = vrot.slane %v656_v18, 1  ;;  %v676_v31 = vld [vmem:[%s1109_s13 + $0x8] sm:$0x7]  ;;  %s619_s17 = scalar_lea.vmem %s1147_s4, %s978_s14  ;;  %s634_s20 = scalar_lea.vmem %s1148_s5, %s978_s14  ;;  %v688_v34 = vadd.f32 %v664_v24, %v656_v18  ;;  %v657_v35 = vunpack.c.l.bf16 %v653_v20  ;;  %v669_v36 = vld [vmem:[%s1103_s10 + $0xc] sm:$0x7] }
  0x18   : > { %v706_v22 = vadd.f32 %v678_v11, %v670_v10  ;;  %v702_v27 = vadd.f32 %v694_v16, %v686_v15  ;;  %v703_v32 = vadd.f32 %v695_v17, %v687_v21  ;;  %v707_v37 = vadd.f32 %v679_v29, %v671_v28  ;;  %v677_v41 = vld [vmem:[%s1109_s13 + $0xc] sm:$0x7]  ;;  %v682_v42 = vld [vmem:[%s619_s17] sm:$0x7]  ;;  %s648_s28 = scalar_lea.vmem %s1149_s6, %s981_s25 }
  0x19   : > { %v715_v38 = vrot.slane %v671_v28, 1  ;;  %v665_v39 = vunpack.c.l.bf16 %v661_v25  ;;  %v672_v40 = vunpack.c.l.bf16 %v668_v26  ;;  %v704_v44 = vadd.f32 %v696_v30, %v688_v34  ;;  %v684_v47 = vld [vmem:[%s634_s20] sm:$0x7] }
  0x1a   : > { %v722_v33 = vadd.f32 %v714_v23, %v706_v22  ;;  %v680_v45 = vunpack.c.l.bf16 %v676_v31  ;;  %v697_v46 = vrot.slane %v657_v35, 1  ;;  %v673_v51 = vunpack.c.l.bf16 %v669_v36 }
  0x1b   : > { %v723_v48 = vadd.f32 %v715_v38, %v707_v37  ;;  %v689_v49 = vadd.f32 %v665_v39, %v657_v35  ;;  %v716_v50 = vrot.slane %v672_v40, 1  ;;  %v681_v54 = vunpack.c.l.bf16 %v677_v41 }
  0x1c   : > { %v731_v43 = vadd.f32 %v722_v33, %v702_v27  ;;  %v708_v53 = vadd.f32 %v680_v45, %v672_v40  ;;  %v683_v55 = vunpack.c.l.bf16 %v682_v42  ;;  %v685_v58 = vunpack.c.l.bf16 %v684_v47 }
  0x1d   : > { %v732_v56 = vadd.f32 %v723_v48, %v703_v32  ;;  %v705_v57 = vadd.f32 %v697_v46, %v689_v49  ;;  %v717_v59 = vrot.slane %v673_v51, 1  ;;  %v709_v62 = vadd.f32 %v681_v54, %v673_v51 }
  0x1e   : > { %v735_v52 = vadd.f32 %v731_v43, %v703_v32  ;;  %v724_v61 = vadd.f32 %v716_v50, %v708_v53  ;;  %v728_v63 = vrot.slane %v683_v55, 1  ;;  %v726_v1 = vadd.f32 %v685_v58, %v683_v55 }
  0x1f   : > { %v736_v0 = vadd.f32 %v732_v56, %v704_v44  ;;  %v725_v4 = vadd.f32 %v717_v59, %v709_v62 }
  0x20   : > { %v738_v60 = vmul.f32 0.11111111, %v735_v52  ;;  %v733_v3 = vadd.f32 %v724_v61, %v704_v44  ;;  %v730_v6 = vadd.f32 %v728_v63, %v726_v1 }
  0x21   : > { %v739_v5 = vmul.f32 0.11111111, %v736_v0  ;;  %v734_v8 = vadd.f32 %v725_v4, %v705_v57 }
  0x22   : > { %v741_v2 = vpack.c.bf16 %v738_v60, %v738_v60  ;;  %v737_v7 = vadd.f32 %v733_v3, %v705_v57 }
  0x23   : > { %v742_v9 = vpack.c.bf16 %v739_v5, %v739_v5  ;;  %v748_v11 = vadd.f32 %v734_v8, %v730_v6 }
  0x24   : > { %745 = vst.msk [vmem:[%s648_s28] sm:$0x3] %vm744_vm0, %v741_v2  ;;  %v740_v10 = vmul.f32 0.11111111, %v737_v7 }
  0x25   : > { %746 = vst.msk [vmem:[%s648_s28 + $0x2] sm:$0x3] %vm744_vm0, %v742_v9  ;;  %v749_v13 = vmul.f32 0.11111111, %v748_v11 }
  0x26   : > { %v743_v12 = vpack.c.bf16 %v740_v10, %v740_v10 }
  0x27   : > { %v750_v14 = vpack.c.bf16 %v749_v13, %v749_v13 }
  0x28   : > { %747 = vst.msk [vmem:[%s648_s28 + $0x4] sm:$0x3] %vm744_vm0, %v743_v12 }
  0x29   : > { %974 = vst.msk [vmem:[%s648_s28 + $0x6] sm:$0x3] %vm744_vm0, %v750_v14 }
  0x2a PF: > { %s16_s23 = sadd.s32 1, %s1031_s23   ;;  %s1150_s21 = smov %s1027_s22 }
  0x2b   : > { %p13_p5 = scmp.ge.s32.totalorder %s16_s23, 4   ;;  %s1151_s22 = smov %s1153_s24 }
  0x2d   :  { %15 = sbr.rel (!%p13_p5) target bundleno = 2 (0x2), region = 90 }

// kernel: _forward_impl.22
= control target key start
LH: loop header
LB: loop body
LE: loop exit
PB: predicated region body
PF: predicated region fallthrough
CT: control target
= control target key end

     0   :  { %v267_v0 = vmov 0   ;;  %vm116_vm0 = vcmask 130048   ;;  %vm200_vm3 = vcmask 125952   ;;  %s342_s1 = inlined_call_operand.vmem [shape: bf16[144,16], index: 1, kind: input, shape index: {}]   ;;  %s343_s0 = inlined_call_operand.vmem [shape: bf16[32,144], index: 0, kind: input, shape index: {}]   ;;  %s344_s2 = inlined_call_operand.vmem [shape: f32[1,16], index: 2, kind: input, shape index: {}]   ;;  %s345_s3 = inlined_call_operand.vmem [shape: bf16[32,16], index: 3, kind: output, shape index: {}]  }
   0x1   :  { %123 = vmatprep.subr.bf16.mxu0 %v267_v0  ;;  %233 = vmatprep.subr.bf16.mxu1 %v267_v0  ;;  %v252_v1 = vld [vmem:[%s342_s1] sm:$0xff]   ;;  %v253_v2 = vld [vmem:[%s342_s1 + $0x8] sm:$0xff]   ;;  %v254_v3 = vld [vmem:[%s342_s1 + $0x10] sm:$0xff]  }
   0x2   :  { %124 = vmatpush1.bf16.msra.mxu0 %v252_v1  ;;  %242 = vmatpush1.bf16.msra.mxu1 %v252_v1  ;;  %v255_v4 = vld [vmem:[%s342_s1 + $0x18] sm:$0xff]   ;;  %v263_v5 = vld [vmem:[%s343_s0 + $0x4] ss:$8 sps:$4 sm:$0xff]   ;;  %v258_v9 = vld [vmem:[%s342_s1 + $0x30] sm:$0xff]  }
   0x3   :  { %125 = vmatprep.subr.bf16.mxu0 %v267_v0  ;;  %234 = vmatprep.subr.bf16.mxu1 %v267_v0  ;;  %v266_v6 = vld [vmem:[%s343_s0 + $0x14] ss:$8 sps:$4 sm:$0xff]   ;;  %v256_v7 = vld [vmem:[%s342_s1 + $0x20] sm:$0xff]   ;;  %v257_v8 = vld [vmem:[%s342_s1 + $0x28] sm:$0xff]  }
   0x4   :  { %223 = vmatprep.mubr.msk.bf16.mxu0 %vm116_vm0, %v263_v5  ;;  %224 = vmatprep.mubr.msk.bf16.mxu1 %vm116_vm0, %v266_v6  ;;  %v259_v10 = vld [vmem:[%s342_s1 + $0x38] sm:$0xff]   ;;  %v260_v11 = vld [vmem:[%s342_s1 + $0x40] sm:$0xff]  }
   0x5   :  { %v261_v12 = vld [vmem:[%s343_s0] ss:$8 sps:$4 sm:$0xff]   ;;  %v264_v13 = vld [vmem:[%s343_s0 + $0x10] ss:$8 sps:$4 sm:$0xff]  }
   0x6   :  { %126 = vmatpush1.bf16.msra.mxu0 %v253_v2  ;;  %243 = vmatpush1.bf16.msra.mxu1 %v253_v2  ;;  %v209_v14 = vld [vmem:[%s344_s2] ss:$0 sm:$0xff] }
   0x7   :  { %127 = vmatprep.subr.bf16.mxu0 %v267_v0  ;;  %235 = vmatprep.subr.bf16.mxu1 %v267_v0 }
   0xa   :  { %128 = vmatpush1.bf16.msra.mxu0 %v254_v3  ;;  %244 = vmatpush1.bf16.msra.mxu1 %v254_v3 }
   0xb   :  { %129 = vmatprep.subr.bf16.mxu0 %v267_v0  ;;  %236 = vmatprep.subr.bf16.mxu1 %v267_v0 }
   0xe   :  { %130 = vmatpush1.bf16.msra.mxu0 %v255_v4  ;;  %245 = vmatpush1.bf16.msra.mxu1 %v255_v4 }
   0xf   :  { %131 = vmatprep.subr.bf16.mxu0 %v267_v0  ;;  %237 = vmatprep.subr.bf16.mxu1 %v267_v0 }
  0x12   :  { %132 = vmatpush1.bf16.msra.mxu0 %v256_v7  ;;  %246 = vmatpush1.bf16.msra.mxu1 %v256_v7 }
  0x13   :  { %133 = vmatprep.subr.bf16.mxu0 %v267_v0  ;;  %238 = vmatprep.subr.bf16.mxu1 %v267_v0 }
  0x16   :  { %134 = vmatpush1.bf16.msra.mxu0 %v257_v8  ;;  %247 = vmatpush1.bf16.msra.mxu1 %v257_v8 }
  0x17   :  { %135 = vmatprep.subr.bf16.mxu0 %v267_v0  ;;  %239 = vmatprep.subr.bf16.mxu1 %v267_v0 }
  0x1a   :  { %136 = vmatpush1.bf16.msra.mxu0 %v258_v9  ;;  %248 = vmatpush1.bf16.msra.mxu1 %v258_v9 }
  0x1b   :  { %137 = vmatprep.subr.bf16.mxu0 %v267_v0  ;;  %240 = vmatprep.subr.bf16.mxu1 %v267_v0 }
  0x1e   :  { %138 = vmatpush1.bf16.msra.mxu0 %v259_v10  ;;  %249 = vmatpush1.bf16.msra.mxu1 %v259_v10 }
  0x1f   :  { %139 = vmatprep.subr.bf16.mxu0 %v267_v0  ;;  %241 = vmatprep.subr.bf16.mxu1 %v267_v0 }
  0x22   :  { %140 = vmatpush1.bf16.msra.mxu0 %v260_v11  ;;  %250 = vmatpush1.bf16.msra.mxu1 %v260_v11 }
  0x25   :  { %156 = vmatmul.mubr.bf16.vlgmr.msra.gmra.mrb[0].mxu0 %v261_v12  ;;  %164 = vmatmul.mubr.bf16.vlgmr.msra.gmra.mrb[0].mxu1 %v264_v13 }
  0xf8   :  { %v157_v15 = vpop.f32.mrb[0].mxu0  ;;  %v165_v16 = vpop.f32.mrb[0].mxu1 }
  0xf9   :  { %v158_v17 = vadd.f32 %v209_v14, %v157_v15  ;;  %v166_v18 = vadd.f32 %v209_v14, %v165_v16  ;;  %v159_v19 = vpop.f32.mrb[1].mxu0  ;;  %v167_v20 = vpop.f32.mrb[1].mxu1 }
  0xfa   :  { %v160_v21 = vpop.f32.mrb[2].mxu0  ;;  %v168_v22 = vpop.f32.mrb[2].mxu1 }
  0xfb   :  { %vm172_vm1 = vcmp.ge.f32.partialorder %v158_v17, 0.0  ;;  %v176_v23 = vmul.f32 0.2, %v158_v17  ;;  %vm174_vm2 = vcmp.ge.f32.partialorder %v166_v18, 0.0  ;;  %v178_v24 = vmul.f32 0.2, %v166_v18 }
  0xfc   :  { %v161_v25 = vadd.f32 %v209_v14, %v160_v21  ;;  %v169_v26 = vadd.f32 %v209_v14, %v168_v22  ;;  %v162_v27 = vpop.f32.mrb[3].mxu0  ;;  %v170_v28 = vpop.f32.mrb[3].mxu1 }
  0xfd   :  { %v180_v29 = vsel %vm172_vm1, %v158_v17, %v176_v23  ;;  %v182_v30 = vsel %vm174_vm2, %v166_v18, %v178_v24 }
  0xfe   :  { %v229_v31 = vpack.c.bf16 %v180_v29, %v180_v29  ;;  %v231_v32 = vpack.c.bf16 %v182_v30, %v182_v30  ;;  %vm173_vm4 = vcmp.ge.f32.partialorder %v161_v25, 0.0  ;;  %v177_v33 = vmul.f32 0.2, %v161_v25 }
  0xff   :  { %vm175_vm5 = vcmp.ge.f32.partialorder %v169_v26, 0.0  ;;  %v179_v34 = vmul.f32 0.2, %v169_v26 }
 0x100   :  { %201 = vst.msk [vmem:[%s345_s3] sm:$0xf] %vm200_vm3, %v229_v31  ;;  %203 = vst.msk [vmem:[%s345_s3 + $0x8] sm:$0xf] %vm200_vm3, %v231_v32  ;;  %v181_v35 = vsel %vm173_vm4, %v161_v25, %v177_v33 }
 0x101   :  { %v230_v36 = vpack.c.bf16 %v181_v35, %v181_v35  ;;  %v183_v37 = vsel %vm175_vm5, %v169_v26, %v179_v34 }
 0x102   :  { %v232_v38 = vpack.c.bf16 %v183_v37, %v183_v37 }
 0x103   :  { %202 = vst.msk [vmem:[%s345_s3 + $0x4] sm:$0xf] %vm200_vm3, %v230_v36 }
 0x104   :  { %204 = vst.msk [vmem:[%s345_s3 + $0xc] sm:$0xf] %vm200_vm3, %v232_v38 }

// kernel: _forward_impl.21
= control target key start
LH: loop header
LB: loop body
LE: loop exit
PB: predicated region body
PF: predicated region fallthrough
CT: control target
= control target key end

     0   :  { %vm34_vm0 = vcmask 130048   ;;  %vm106_vm1 = vcmask 257024   ;;  %s176_s1 = inlined_call_operand.vmem [shape: bf16[16,32], index: 1, kind: input, shape index: {}]   ;;  %s177_s0 = inlined_call_operand.vmem [shape: bf16[32,16], index: 0, kind: input, shape index: {}]   ;;  %s178_s2 = inlined_call_operand.vmem [shape: bf16[32,32], index: 2, kind: output, shape index: {}]  }
   0x1   :  { %v137_v0 = vld [vmem:[%s176_s1] sm:$0xff]   ;;  %v139_v2 = vld [vmem:[%s177_s0 + $0x8] sm:$0xff]  }
   0x2   :  { %v138_v1 = vld [vmem:[%s177_s0] sm:$0xff]   ;;  %131 = vmatprep.subr.bf16.mxu0 %v137_v0 }
   0x3   :  { %132 = vmatpush3.bf16.msra.mxu0 %v137_v0  ;;  %133 = vmatprep.mubr.msk.bf16.mxu0 %vm34_vm0, %v138_v1 }
   0x6   :  { %134 = vmatmul.mubr.msk.bf16.vlgmr.msra.gmra.mrb[0].mxu0 %vm34_vm0, %v139_v2 }
  0xd9   :  { %v135_v3 = vpop.f32.mrb[0].mxu0 }
  0xda   :  { %v126_v4 = vpack.c.bf16 %v135_v3, %v135_v3  ;;  %v75_v5 = vpop.f32.mrb[1].mxu0 }
  0xdb   :  { %v124_v6 = vpack.c.bf16 %v75_v5, %v75_v5  ;;  %v136_v7 = vpop.f32.mrb[2].mxu0 }
  0xdc   :  { %109 = vst.msk [vmem:[%s178_s2 + $0x8] sm:$0xf] %vm106_vm1, %v126_v4  ;;  %v127_v8 = vpack.c.bf16 %v136_v7, %v136_v7  ;;  %v78_v9 = vpop.f32.mrb[3].mxu0 }
  0xdd   :  { %107 = vst.msk [vmem:[%s178_s2] sm:$0xf] %vm106_vm1, %v124_v6  ;;  %v125_v10 = vpack.c.bf16 %v78_v9, %v78_v9 }
  0xde   :  { %110 = vst.msk [vmem:[%s178_s2 + $0xc] sm:$0xf] %vm106_vm1, %v127_v8 }
  0xdf   :  { %108 = vst.msk [vmem:[%s178_s2 + $0x4] sm:$0xf] %vm106_vm1, %v125_v10 }

// kernel: _forward_impl.23
= control target key start
LH: loop header
LB: loop body
LE: loop exit
PB: predicated region body
PF: predicated region fallthrough
CT: control target
= control target key end

     0   :  { %v283_v0 = vmov 0   ;;  %vm119_vm0 = vcmask 130048   ;;  %vm207_vm1 = vcmask 257024   ;;  %s369_s1 = inlined_call_operand.vmem [shape: bf16[144,32], index: 1, kind: input, shape index: {}]   ;;  %s370_s0 = inlined_call_operand.vmem [shape: bf16[32,144], index: 0, kind: input, shape index: {}]   ;;  %s371_s2 = inlined_call_operand.vmem [shape: f32[1,32], index: 2, kind: input, shape index: {}]   ;;  %s372_s3 = inlined_call_operand.vmem [shape: bf16[32,32], index: 3, kind: input, shape index: {}]   ;;  %s373_s4 = inlined_call_operand.vmem [shape: bf16[32,32], index: 4, kind: output, shape index: {}]  }
   0x1   :  { %126 = vmatprep.subr.bf16.mxu0 %v283_v0  ;;  %249 = vmatprep.subr.bf16.mxu1 %v283_v0  ;;  %v268_v1 = vld [vmem:[%s369_s1] sm:$0xff]   ;;  %v269_v2 = vld [vmem:[%s369_s1 + $0x8] sm:$0xff]   ;;  %v270_v3 = vld [vmem:[%s369_s1 + $0x10] sm:$0xff]  }
   0x2   :  { %127 = vmatpush1.bf16.msra.mxu0 %v268_v1  ;;  %258 = vmatpush1.bf16.msra.mxu1 %v268_v1  ;;  %v271_v4 = vld [vmem:[%s369_s1 + $0x18] sm:$0xff]   ;;  %v279_v5 = vld [vmem:[%s370_s0 + $0x4] ss:$8 sps:$4 sm:$0xff]   ;;  %v274_v9 = vld [vmem:[%s369_s1 + $0x30] sm:$0xff]  }
   0x3   :  { %128 = vmatprep.subr.bf16.mxu0 %v283_v0  ;;  %250 = vmatprep.subr.bf16.mxu1 %v283_v0  ;;  %v282_v6 = vld [vmem:[%s370_s0 + $0x14] ss:$8 sps:$4 sm:$0xff]   ;;  %v272_v7 = vld [vmem:[%s369_s1 + $0x20] sm:$0xff]   ;;  %v273_v8 = vld [vmem:[%s369_s1 + $0x28] sm:$0xff]  }
   0x4   :  { %230 = vmatprep.mubr.msk.bf16.mxu0 %vm119_vm0, %v279_v5  ;;  %231 = vmatprep.mubr.msk.bf16.mxu1 %vm119_vm0, %v282_v6  ;;  %v275_v10 = vld [vmem:[%s369_s1 + $0x38] sm:$0xff]   ;;  %v276_v11 = vld [vmem:[%s369_s1 + $0x40] sm:$0xff]   ;;  %v248_v16 = vld [vmem:[%s372_s3 + $0x8] sm:$0xff]  }
   0x5   :  { %v277_v12 = vld [vmem:[%s370_s0] ss:$8 sps:$4 sm:$0xff]   ;;  %v280_v13 = vld [vmem:[%s370_s0 + $0x10] ss:$8 sps:$4 sm:$0xff]   ;;  %v246_v22 = vunpack.c.l.bf16 %v248_v16  ;;  %v247_v28 = vunpack.c.h.bf16 %v248_v16 }
   0x6   :  { %129 = vmatpush1.bf16.msra.mxu0 %v269_v2  ;;  %259 = vmatpush1.bf16.msra.mxu1 %v269_v2  ;;  %v216_v14 = vld [vmem:[%s371_s2] ss:$0 sm:$0xff] }
   0x7   :  { %130 = vmatprep.subr.bf16.mxu0 %v283_v0  ;;  %251 = vmatprep.subr.bf16.mxu1 %v283_v0  ;;  %v241_v15 = vld [vmem:[%s372_s3] sm:$0xff]  }
   0x8   :  { %v242_v20 = vunpack.c.l.bf16 %v241_v15  ;;  %v243_v26 = vunpack.c.h.bf16 %v241_v15 }
   0xa   :  { %131 = vmatpush1.bf16.msra.mxu0 %v270_v3  ;;  %260 = vmatpush1.bf16.msra.mxu1 %v270_v3 }
   0xb   :  { %132 = vmatprep.subr.bf16.mxu0 %v283_v0  ;;  %252 = vmatprep.subr.bf16.mxu1 %v283_v0 }
   0xe   :  { %133 = vmatpush1.bf16.msra.mxu0 %v271_v4  ;;  %261 = vmatpush1.bf16.msra.mxu1 %v271_v4 }
   0xf   :  { %134 = vmatprep.subr.bf16.mxu0 %v283_v0  ;;  %253 = vmatprep.subr.bf16.mxu1 %v283_v0 }
  0x12   :  { %135 = vmatpush1.bf16.msra.mxu0 %v272_v7  ;;  %262 = vmatpush1.bf16.msra.mxu1 %v272_v7 }
  0x13   :  { %136 = vmatprep.subr.bf16.mxu0 %v283_v0  ;;  %254 = vmatprep.subr.bf16.mxu1 %v283_v0 }
  0x16   :  { %137 = vmatpush1.bf16.msra.mxu0 %v273_v8  ;;  %263 = vmatpush1.bf16.msra.mxu1 %v273_v8 }
  0x17   :  { %138 = vmatprep.subr.bf16.mxu0 %v283_v0  ;;  %255 = vmatprep.subr.bf16.mxu1 %v283_v0 }
  0x1a   :  { %139 = vmatpush1.bf16.msra.mxu0 %v274_v9  ;;  %264 = vmatpush1.bf16.msra.mxu1 %v274_v9 }
  0x1b   :  { %140 = vmatprep.subr.bf16.mxu0 %v283_v0  ;;  %256 = vmatprep.subr.bf16.mxu1 %v283_v0 }
  0x1e   :  { %141 = vmatpush1.bf16.msra.mxu0 %v275_v10  ;;  %265 = vmatpush1.bf16.msra.mxu1 %v275_v10 }
  0x1f   :  { %142 = vmatprep.subr.bf16.mxu0 %v283_v0  ;;  %257 = vmatprep.subr.bf16.mxu1 %v283_v0 }
  0x22   :  { %143 = vmatpush1.bf16.msra.mxu0 %v276_v11  ;;  %266 = vmatpush1.bf16.msra.mxu1 %v276_v11 }
  0x25   :  { %159 = vmatmul.mubr.bf16.vlgmr.msra.gmra.mrb[0].mxu0 %v277_v12  ;;  %167 = vmatmul.mubr.bf16.vlgmr.msra.gmra.mrb[0].mxu1 %v280_v13 }
  0xf8   :  { %v160_v17 = vpop.f32.mrb[0].mxu0  ;;  %v168_v18 = vpop.f32.mrb[0].mxu1 }
  0xf9   :  { %v161_v19 = vadd.f32 %v216_v14, %v160_v17  ;;  %v169_v21 = vadd.f32 %v216_v14, %v168_v18  ;;  %v162_v23 = vpop.f32.mrb[1].mxu0  ;;  %v170_v24 = vpop.f32.mrb[1].mxu1 }
  0xfa   :  { %v163_v25 = vpop.f32.mrb[2].mxu0  ;;  %v171_v27 = vpop.f32.mrb[2].mxu1 }
  0xfb   :  { %v183_v29 = vmul.f32 0.1, %v161_v19  ;;  %v185_v30 = vmul.f32 0.1, %v169_v21  ;;  %v164_v31 = vadd.f32 %v216_v14, %v163_v25  ;;  %v172_v32 = vadd.f32 %v216_v14, %v171_v27  ;;  %v165_v33 = vpop.f32.mrb[3].mxu0  ;;  %v173_v34 = vpop.f32.mrb[3].mxu1 }
  0xfd   :  { %v187_v35 = vadd.f32 %v242_v20, %v183_v29  ;;  %v189_v36 = vadd.f32 %v246_v22, %v185_v30  ;;  %v184_v37 = vmul.f32 0.1, %v164_v31  ;;  %v186_v38 = vmul.f32 0.1, %v172_v32 }
  0xff   :  { %v236_v39 = vpack.c.bf16 %v187_v35, %v187_v35  ;;  %v238_v40 = vpack.c.bf16 %v189_v36, %v189_v36  ;;  %v188_v41 = vadd.f32 %v243_v26, %v184_v37  ;;  %v190_v42 = vadd.f32 %v247_v28, %v186_v38 }
 0x101   :  { %208 = vst.msk [vmem:[%s373_s4] sm:$0xf] %vm207_vm1, %v236_v39  ;;  %210 = vst.msk [vmem:[%s373_s4 + $0x8] sm:$0xf] %vm207_vm1, %v238_v40  ;;  %v237_v43 = vpack.c.bf16 %v188_v41, %v188_v41  ;;  %v239_v44 = vpack.c.bf16 %v190_v42, %v190_v42 }
 0x103   :  { %209 = vst.msk [vmem:[%s373_s4 + $0x4] sm:$0xf] %vm207_vm1, %v237_v43  ;;  %211 = vst.msk [vmem:[%s373_s4 + $0xc] sm:$0xf] %vm207_vm1, %v239_v44 }

// kernel: _forward_impl.25
= control target key start
LH: loop header
LB: loop body
LE: loop exit
PB: predicated region body
PF: predicated region fallthrough
CT: control target
= control target key end

     0   :  { %s276_s0 = inlined_call_operand.vmem [shape: f32[2,32], index: 0, kind: input, shape index: {}]   ;;  %s277_s1 = inlined_call_operand.vmem [shape: bf16[16,1], index: 1, kind: input, shape index: {}]   ;;  %s278_s2 = inlined_call_operand.<no memory space> [shape: f32[1,1], index: 2, kind: input, shape index: {}]   ;;  %s279_s3 = inlined_call_operand.vmem [shape: f32[2,1], index: 3, kind: output, shape index: {0}]   ;;  %s280_s4 = inlined_call_operand.hbm [shape: f32[2,16], index: 4, kind: output, shape index: {1}]   ;;  %s281_s5 = inlined_call_operand.hbm [shape: f32[2,16], index: 5, kind: output, shape index: {2}]  }
   0x1   :  { %v11_v0 = vstv %s278_s2 }
   0x2   :  { %12 = vst [vmem:[#allocation2] sm:$0x1] %v11_v0 }
   0x3   :  { %13 = vsyncpa [#allocation4], 0  ;;  %v150_v1 = vld [vmem:[%s277_s1] sm:$0xff]   ;;  %v203_v2 = vmov 0.0   ;;  %vm204_vm0 = vmmov 0  }
   0x4   :  { %139 = vmatprep.subr.bf16.mxu0 %v203_v2  ;;  %v22_v3 = vld [vmem:[%s276_s0] sm:$0x3]  ;;  %141 = vmatprep.mubr.msk.bf16.mxu0 %vm204_vm0, %v203_v2 }
   0x5   :  { %140 = vmatpush3.bf16.msra.mxu0 %v150_v1  ;;  %vm36_vm1 = vcmp.ge.f32.partialorder %v22_v3, 0.0  ;;  %v37_v4 = vmul.f32 0.2, %v22_v3  ;;  %v133_v5 = vmul.f32 -1.442695, %v22_v3 }
   0x6   :  { %14 = vsyncpa [#allocation6], 0  ;;  %vm55_vm2 = vcmask 130048   ;;  %s205_s1 = smov 112   ;;  %vm29_vm3 = vcmask 123904   ;;  %s206_s0 = smov [#allocation3]  }
   0x7   :  { %v38_v6 = vsel %vm36_vm1, %v22_v3, %v37_v4  ;;  %151 = vpow2.f32 %v133_v5  ;;  %s109_s2 = sshll.u32 %s206_s0, 4  ;;  %30 = vst.msk [vmem:[#allocation3] sm:$0x3] %vm29_vm3, %v22_v3  ;;  %s110_s2 = int_to_ptr.vmem [resolvable:$true] %s109_s2 }
   0x8   :  { %v39_v7 = vpack.c.bf16 %v38_v6, %v38_v6  ;;  %s155_s24 = scalar_lea.vmem %s110_s2, 32  ;;  %p160_p1 = scmp.lt.s32.totalorder %s110_s2, %s110_s2 }
   0x9   :  { %p156_p0 = scmp.ne.s32.totalorder %s110_s2, %s155_s24  ;;  %p161_p2 = scmp.lt.s32.totalorder %s155_s24, %s155_s24 }
   0xa   :  { %142 = vmatmul.mubr.msk.bf16.vlgmr.msra.gmra.mrb[0].mxu0 %vm55_vm2, %v39_v7 }
   0xb   :  { %p162_p3 = por %p161_p2, %p160_p1 }
   0xd   :  { %p163_p4 = pnand %p162_p3, %p156_p0 }
  0x11   :  { %v152_v8 = vpop.eup %151 }
  0x12   :  { %v26_v9 = vadd.f32 1.0, %v152_v8 }
  0x14   :  { %153 = vrcp.f32 %v26_v9 }
  0x1e   :  { %v154_v10 = vpop.eup %153 }
  0x1f   :  { %32 = vrot.lane.b32.xlu0 %v154_v10, %s205_s1 }
  0x20   :  { %166 = shalt.err (!%p163_p4)
}
  0x21   :  { %s167_s27 = scalar_lea.hbm %s280_s4, 32 }
  0x22   :  { %p168_p5 = scmp.ne.s32.totalorder %s280_s4, %s167_s27  ;;  %p171_p6 = scmp.lt.u32.totalorder %s167_s27, %s280_s4 }
  0x24   :  { %p173_p7 = pnand %p171_p6, %p168_p5 }
  0x26   :  { %176 = shalt.err (!%p173_p7)
}
  0x27   :  { %112 = dma.vmem_to_hbm [thread:$0]  %s110_s2, 32, %s280_s4, [#allocation4]  }
  0x28   :  { %s207_s9 = smov [#allocation5]  }
  0x29   :  { %s119_s10 = sshll.u32 %s207_s9, 4  ;;  %s120_s10 = int_to_ptr.vmem [resolvable:$true] %s119_s10 }
  0x2a   :  { %s177_s11 = scalar_lea.vmem %s120_s10, 32  ;;  %p182_p9 = scmp.lt.s32.totalorder %s120_s10, %s120_s10 }
  0x2b   :  { %p178_p8 = scmp.ne.s32.totalorder %s120_s10, %s177_s11  ;;  %p183_p10 = scmp.lt.s32.totalorder %s177_s11, %s177_s11 }
  0x2d   :  { %p184_p11 = por %p183_p10, %p182_p9 }
  0x2f   :  { %p185_p12 = pnand %p184_p11, %p178_p8 }
  0x91   :  { %v33_v11 = vpop.permute.xlu0 %32 }
  0x92   :  { %35 = vst.msk [vmem:[#allocation5] sm:$0x3] %vm29_vm3, %v33_v11 }
  0x93   :  { %188 = shalt.err (!%p185_p12)
}
  0x94   :  { %s189_s14 = scalar_lea.hbm %s281_s5, 32 }
  0x95   :  { %p190_p13 = scmp.ne.s32.totalorder %s281_s5, %s189_s14  ;;  %p193_p0 = scmp.lt.u32.totalorder %s189_s14, %s281_s5 }
  0x97   :  { %p195_p1 = pnand %p193_p0, %p190_p13 }
  0x99   :  { %198 = shalt.err (!%p195_p1)
}
  0x9a   :  { %122 = dma.vmem_to_hbm [thread:$0]  %s120_s10, 32, %s281_s5, [#allocation6]   ;;  %v134_v12 = vld [vmem:[#allocation2] ss:$0 sm:$0xff]  ;;  %vm99_vm4 = vcmask 1024  }
  0xdd   :  { %v93_v13 = vpop.f32.mrb[0].mxu0 }
  0xde   :  { %v94_v14 = vadd.f32 %v134_v12, %v93_v13  ;;  %v143_v15 = vpop.f32.mrb[1].mxu0 }
  0xdf   :  { %v96_v16 = vpop.f32.mrb[2].mxu0 }
  0xe0   :  { %100 = vst.msk [vmem:[%s279_s3] sm:$0x3] %vm99_vm4, %v94_v14  ;;  %v144_v17 = vpop.f32.mrb[3].mxu0 }
  0xe1   :  { %199 = dma.done.wait [#allocation4], 32  }
  0xe2   :  { %200 = vsyncadd [#allocation4], 4294967264 }
  0xe3   :  { %201 = dma.done.wait [#allocation6], 32  }
  0xe4   :  { %202 = vsyncadd [#allocation6], 4294967264 }
  0xe5   :  { %131 = vsyncpa [#allocation4], 1 }
  0xe6   :  { %132 = vsyncpa [#allocation6], 1 }

// kernel: _forward_impl.24
= control target key start
LH: loop header
LB: loop body
LE: loop exit
PB: predicated region body
PF: predicated region fallthrough
CT: control target
= control target key end

     0   :  { %v505_v22 = vmov 1966171168   ;;  %v99_v24 = vlaneseq  ;;  %vm388_vm0 = vcmask 254976   ;;  %s631_s1 = inlined_call_operand.vmem [shape: bf16[512,32], index: 1, kind: input, shape index: {}]   ;;  %s632_s0 = inlined_call_operand.vmem [shape: bf16[2,512], index: 0, kind: input, shape index: {}]   ;;  %s633_s2 = inlined_call_operand.vmem [shape: f32[1,32], index: 2, kind: input, shape index: {}]   ;;  %s634_s3 = inlined_call_operand.vmem [shape: f32[2,32], index: 3, kind: output, shape index: {}]  }
   0x1   :  { %v473_v0 = vld [vmem:[%s631_s1 + $0x40] sm:$0xff]   ;;  %v477_v4 = vld [vmem:[%s631_s1 + $0x48] sm:$0xff]   ;;  %v481_v8 = vld [vmem:[%s631_s1 + $0x50] sm:$0xff]   ;;  %v97_v23 = vunpack.c.l.s4 %v505_v22 }
   0x2   :  { %v474_v1 = vld [vmem:[%s631_s1 + $0xc0] sm:$0xff]   ;;  %428 = vmatprep.subr.bf16.mxu0 %v473_v0  ;;  %v478_v5 = vld [vmem:[%s631_s1 + $0xc8] sm:$0xff]   ;;  %v482_v9 = vld [vmem:[%s631_s1 + $0xd0] sm:$0xff]   ;;  %v100_v30 = vshrl.u32 %v99_v24, 7 }
   0x3   :  { %v475_v2 = vld [vmem:[%s631_s1] sm:$0xff]   ;;  %450 = vmatprep.subr.bf16.mxu1 %v474_v1  ;;  %v479_v6 = vld [vmem:[%s631_s1 + $0x8] sm:$0xff]   ;;  %v483_v10 = vld [vmem:[%s631_s1 + $0x10] sm:$0xff]   ;;  %v98_v29 = vunpack.c.0.s8 %v97_v23 }
   0x4   :  { %v476_v3 = vld [vmem:[%s631_s1 + $0x80] sm:$0xff]   ;;  %429 = vmatpush3.bf16.msra.mxu0 %v475_v2  ;;  %v480_v7 = vld [vmem:[%s631_s1 + $0x88] sm:$0xff]   ;;  %v484_v11 = vld [vmem:[%s631_s1 + $0x90] sm:$0xff]  }
   0x5   :  { %451 = vmatpush3.bf16.msra.mxu1 %v476_v3  ;;  %430 = vmatprep.subr.bf16.mxu0 %v477_v4  ;;  %v485_v12 = vld [vmem:[%s631_s1 + $0x58] sm:$0xff]   ;;  %v489_v16 = vld [vmem:[%s631_s1 + $0x60] sm:$0xff]   ;;  %v493_v20 = vld [vmem:[%s631_s1 + $0x68] sm:$0xff]   ;;  %v101_v35 = vsub.s32 %v98_v29, %v100_v30 }
   0x6   :  { %452 = vmatprep.subr.bf16.mxu1 %v478_v5  ;;  %v486_v13 = vld [vmem:[%s631_s1 + $0xd8] sm:$0xff]   ;;  %v490_v17 = vld [vmem:[%s631_s1 + $0xe0] sm:$0xff]   ;;  %v494_v21 = vld [vmem:[%s631_s1 + $0xe8] sm:$0xff]  }
   0x7   :  { %v487_v14 = vld [vmem:[%s631_s1 + $0x18] sm:$0xff]   ;;  %v491_v18 = vld [vmem:[%s631_s1 + $0x20] sm:$0xff]   ;;  %v495_v25 = vld [vmem:[%s631_s1 + $0x28] sm:$0xff]  }
   0x8   :  { %431 = vmatpush3.bf16.msra.mxu0 %v479_v6  ;;  %v488_v15 = vld [vmem:[%s631_s1 + $0x98] sm:$0xff]   ;;  %v492_v19 = vld [vmem:[%s631_s1 + $0xa0] sm:$0xff]   ;;  %v496_v26 = vld [vmem:[%s631_s1 + $0xa8] sm:$0xff]  }
   0x9   :  { %453 = vmatpush3.bf16.msra.mxu1 %v480_v7  ;;  %432 = vmatprep.subr.bf16.mxu0 %v481_v8  ;;  %v497_v27 = vld [vmem:[%s631_s1 + $0x70] sm:$0xff]   ;;  %v501_v33 = vld [vmem:[%s631_s1 + $0x78] sm:$0xff]   ;;  %v395_v38 = vld.sshfl [vmem:[%s632_s0] sm:$0x33 pattern:$0x75316420] }
   0xa   :  { %454 = vmatprep.subr.bf16.mxu1 %v482_v9  ;;  %v498_v28 = vld [vmem:[%s631_s1 + $0xf0] sm:$0xff]   ;;  %v502_v34 = vld [vmem:[%s631_s1 + $0xf8] sm:$0xff]   ;;  %v95_v39 = vcombine.high %v395_v38, %v395_v38  ;;  %v102_v40 = vrot.slane %v395_v38, %v101_v35  ;;  %v394_v45 = vld [vmem:[%s633_s2] ss:$0 sm:$0xff] }
   0xb   :  { %v499_v31 = vld [vmem:[%s631_s1 + $0x30] sm:$0xff]   ;;  %v503_v36 = vld [vmem:[%s631_s1 + $0x38] sm:$0xff]  }
   0xc   :  { %433 = vmatpush3.bf16.msra.mxu0 %v483_v10  ;;  %v500_v32 = vld [vmem:[%s631_s1 + $0xb0] sm:$0xff]   ;;  %v504_v37 = vld [vmem:[%s631_s1 + $0xb8] sm:$0xff]   ;;  %v109_v41 = vrot.slane %v95_v39, %v101_v35  ;;  %v110_v42 = vcombine.high %v102_v40, %v102_v40 }
   0xd   :  { %455 = vmatpush3.bf16.msra.mxu1 %v484_v11  ;;  %434 = vmatprep.subr.bf16.mxu0 %v485_v12 }
   0xe   :  { %456 = vmatprep.subr.bf16.mxu1 %v486_v13  ;;  %340 = vmatprep.mubr.bf16.mxu0 %v109_v41  ;;  %v111_v43 = vcombine.high %v109_v41, %v109_v41 }
  0x10   :  { %435 = vmatpush3.bf16.msra.mxu0 %v487_v14  ;;  %380 = vmatprep.mubr.bf16.mxu1 %v111_v43 }
  0x11   :  { %457 = vmatpush3.bf16.msra.mxu1 %v488_v15  ;;  %436 = vmatprep.subr.bf16.mxu0 %v489_v16 }
  0x12   :  { %458 = vmatprep.subr.bf16.mxu1 %v490_v17 }
  0x14   :  { %437 = vmatpush3.bf16.msra.mxu0 %v491_v18 }
  0x15   :  { %459 = vmatpush3.bf16.msra.mxu1 %v492_v19  ;;  %438 = vmatprep.subr.bf16.mxu0 %v493_v20 }
  0x16   :  { %460 = vmatprep.subr.bf16.mxu1 %v494_v21 }
  0x18   :  { %439 = vmatpush3.bf16.msra.mxu0 %v495_v25 }
  0x19   :  { %461 = vmatpush3.bf16.msra.mxu1 %v496_v26  ;;  %440 = vmatprep.subr.bf16.mxu0 %v497_v27 }
  0x1a   :  { %462 = vmatprep.subr.bf16.mxu1 %v498_v28 }
  0x1c   :  { %441 = vmatpush3.bf16.msra.mxu0 %v499_v31 }
  0x1d   :  { %463 = vmatpush3.bf16.msra.mxu1 %v500_v32  ;;  %442 = vmatprep.subr.bf16.mxu0 %v501_v33 }
  0x1e   :  { %464 = vmatprep.subr.bf16.mxu1 %v502_v34 }
  0x20   :  { %443 = vmatpush3.bf16.msra.mxu0 %v503_v36 }
  0x21   :  { %465 = vmatpush3.bf16.msra.mxu1 %v504_v37 }
  0x23   :  { %341 = vmatmul.mubr.bf16.vlgmr.msra.gmra.mrb[0].mxu0 %v102_v40 }
  0x24   :  { %381 = vmatmul.mubr.bf16.vlgmr.msra.gmra.mrb[0].mxu1 %v110_v42 }
  0xf6   :  { %v444_v44 = vpop.f32.mrb[0].mxu0 }
  0xf7   :  { %v445_v46 = vpop.f32.mrb[1].mxu0  ;;  %v466_v47 = vpop.f32.mrb[0].mxu1 }
  0xf8   :  { %v446_v48 = vadd.f32 %v445_v46, %v444_v44  ;;  %v447_v49 = vpop.f32.mrb[2].mxu0  ;;  %v467_v50 = vpop.f32.mrb[1].mxu1 }
  0xf9   :  { %v448_v51 = vpop.f32.mrb[3].mxu0  ;;  %v468_v53 = vadd.f32 %v467_v50, %v466_v47  ;;  %v469_v54 = vpop.f32.mrb[2].mxu1 }
  0xfa   :  { %v343_v52 = vadd.f32 %v446_v48, %v394_v45  ;;  %v470_v55 = vpop.f32.mrb[3].mxu1 }
  0xfc   :  { %v383_v56 = vadd.f32 %v468_v53, %v343_v52 }
  0xfe   :  { %389 = vst.msk [vmem:[%s634_s3] sm:$0x3] %vm388_vm0, %v383_v56 }

</bundles_post_ra>
